<compile_context>
chip_gen: v7x
topology: tpu7x:2x2x1
jax: 0.10.0
libtpu: 0.0.40
codegen_flags: <defaults>
</compile_context>

<pallas_src>
import functools

import numpy as np

import jax
import jax.numpy as jnp
from jax import lax
from jax.experimental import pallas as pl
from jax.experimental.pallas import tpu as pltpu


# ------------------------------ static config -------------------------------

N, CIN, HX, WX = 1, 4, 8, 8          # input  (1, 4, 8, 8)
COUT, K = 5, 5                       # Conv2d(4, 5, 5)
HO, WO = HX - K + 1, WX - K + 1      # 4, 4
NP_PIX = HO * WO                     # 16 output pixels == GRU sequence length
HID = 5                              # GRU hidden size
G = 8                                # gate lane stride (HID padded to 8)
LANES = 128
P_DROP = 0.5
BN_EPS = 1e-5
SEED_DROP_IN, SEED_BN1, SEED_BN2, SEED_DROP_OUT = 1, 2, 3, 4


def _i32(v):
    """Wrap a python int into signed-int32 range (two's complement)."""
    v &= 0xFFFFFFFF
    return v - (1 << 32) if v >= (1 << 31) else v


def _u01(seed, idx):
    """U[0,1) from an integer-hash of `idx` (int32 array) + static seed.

    Uses only jnp int32 ops (mul wraps, logical shifts emulated with
    arithmetic-shift + mask), so it lowers on TPU Mosaic and in interpret mode.
    """
    x = idx * jnp.int32(_i32(0x9E3779B1)) + jnp.int32(_i32(seed * 2654435761 + 12345))
    x = (x ^ ((x >> 16) & 0xFFFF)) * jnp.int32(_i32(0x85EBCA6B))
    x = (x ^ ((x >> 13) & 0x7FFFF)) * jnp.int32(_i32(0xC2B2AE35))
    x = x ^ ((x >> 16) & 0xFFFF)
    return (x & 0x7FFFFF).astype(jnp.float32) * (1.0 / float(1 << 23))


def _build_im2col_index():
    """(16, 128) int32: flat index into x.reshape(-1) for each patch element.

    Column ordering is c*25 + kh*5 + kw (matches the padded conv weight).
    The x.transpose(2, 3) is folded in: patch element = x[0, c, ow+kw, oh+kh].
    Padding columns (>=100) point at element 0; they hit zero weight rows.
    """
    idx = np.zeros((NP_PIX, LANES), np.int32)
    for oh in range(HO):
        for ow in range(WO):
            p = oh * WO + ow
            for c in range(CIN):
                for kh in range(K):
                    for kw in range(K):
                        col = c * K * K + kh * K + kw
                        idx[p, col] = c * HX * WX + (ow + kw) * WX + (oh + kh)
    return jnp.asarray(idx)


_IM2COL_IDX = _build_im2col_index()


# -------------------------------- fused kernel ------------------------------

def _fused_kernel(idx_ref, patches_ref, wconv_ref, bconv_ref,
                  wx_ref, wh_ref, bih_ref, bhh_ref, gamma_ref, beta_ref,
                  conv_ref, gru_ref, out_ref):
    scale = jnp.float32(1.0 / (1.0 - P_DROP))

    # -- stage 1: x = F.dropout(x); x = x.transpose(2,3); x1 = conv(x)
    # dropout mask keyed by the ORIGINAL flat element index -> consistent mask
    # for elements that appear in several im2col patches.
    u_in = _u01(SEED_DROP_IN, idx_ref[...])
    patches = jnp.where(u_in >= P_DROP, patches_ref[...] * scale, jnp.float32(0.0))
    convo = jnp.dot(patches.astype(jnp.bfloat16), wconv_ref[...],
                    preferred_element_type=jnp.float32) + bconv_ref[...]
    conv_ref[...] = convo                       # (16,128); cols>=5 are exactly 0

    # element ids for the generator stages (seq layout: row = pixel, col = chan)
    rows = lax.broadcasted_iota(jnp.int32, (NP_PIX, LANES), 0)
    cols = lax.broadcasted_iota(jnp.int32, (NP_PIX, LANES), 1)
    ids = rows * LANES + cols

    def rand_batchnorm(seed):
        # rand_like + training-mode BatchNorm2d; stats per channel (column)
        # over the 16 (= N*H*W) pixels (rows).
        u = _u01(seed, ids)
        mean = jnp.mean(u, axis=0, keepdims=True)
        var = jnp.mean(jnp.square(u - mean), axis=0, keepdims=True)
        return gamma_ref[...] * (u - mean) * lax.rsqrt(var + BN_EPS) + beta_ref[...]

    # -- stage 2: x2 = rand_like(x1); x3 = batchnorm(x2)
    x3 = rand_batchnorm(SEED_BN1)               # (16,128); cols>=5 are 0

    # -- stage 3: x4 = gru(x3)
    # TODO(synk): nn.GRU rejects 4-D input in PyTorch; x3 is reinterpreted as a
    # sequence (seq=H*W=16, batch=N=1, features=C=5), as before.
    # Gate-packed layout: r/z/n weight blocks live at lanes [0:8)/[8:16)/[16:24)
    # so the per-step hidden projection is ONE 128-wide bf16 MXU pass.  Input
    # projections are hoisted out of the recurrence; the 16-step loop is fully
    # unrolled; per-step h rows are collected and stored once after the loop.
    # TODO(synk): wh could be staged in the MXU across the recurrence via
    # pltpu.matmul_push_rhs / matmul_acc_lhs; kept on the portable jnp.dot path.
    gx_all = jnp.dot(x3.astype(jnp.bfloat16), wx_ref[...],
                     preferred_element_type=jnp.float32) + bih_ref[...]   # (16,128)
    zero_pad = jnp.zeros((1, LANES - G), jnp.float32)
    h_row = jnp.zeros((1, LANES), jnp.float32)                            # h0 = 0
    h_rows = []
    for t in range(NP_PIX):
        gx_t = gx_all[t:t + 1, :]                                         # (1,128)
        gh = jnp.dot(h_row.astype(jnp.bfloat16), wh_ref[...],
                     preferred_element_type=jnp.float32) + bhh_ref[...]   # (1,128)
        rz = jax.nn.sigmoid(gx_t + gh)            # r valid at [0:8), z at [8:16)
        r = rz[:, 0:G]
        z = rz[:, G:2 * G]
        n = jnp.tanh(gx_t[:, 2 * G:3 * G] + r * gh[:, 2 * G:3 * G])
        h_small = (1.0 - z) * n + z * h_row[:, 0:G]                       # (1,8)
        h_row = jnp.concatenate([h_small, zero_pad], axis=1)              # (1,128)
        h_rows.append(h_row)
    gru_ref[...] = jnp.concatenate(h_rows, axis=0)   # single dense (16,128) store

    # -- stage 4/5: x5 = rand_like(x4); x6 = batchnorm(x5); x7 = dropout(x6, 0.5)
    # TODO(synk): BatchNorm2d rejects the GRU's 3-D output; x5 is reinterpreted
    # back as (N, C, H, W) = (1, 5, 4, 4) before normalizing (as before).
    x6 = rand_batchnorm(SEED_BN2)
    u_out = _u01(SEED_DROP_OUT, ids)
    out_ref[...] = jnp.where(u_out >= P_DROP, x6 * scale, jnp.float32(0.0))


# ------------------------------ pallas wrapper -------------------------------

def _fused_call(patches, params):
    vmem = functools.partial(pl.BlockSpec, memory_space=pltpu.MemorySpace.VMEM)
    slab = jax.ShapeDtypeStruct((NP_PIX, LANES), jnp.float32)
    return pl.pallas_call(
        _fused_kernel,
        out_shape=(slab, slab, slab),           # conv_out, gru_out, x7
        in_specs=[vmem()] * 10,
        out_specs=(vmem(), vmem(), vmem()),
    )(_IM2COL_IDX, patches,
      params["wconv"], params["bconv"],
      params["wx"], params["wh"], params["bih"], params["bhh"],
      params["gamma"], params["beta"])


@jax.jit
def model_forward(x, params):
    # Single gather builds the (transposed) im2col patches; everything else,
    # including the first dropout, runs inside the one fused kernel.
    patches = x.reshape(-1)[_IM2COL_IDX]                     # (16, 128)
    conv_o, gru_o, x7_o = _fused_call(patches, params)

    x1 = conv_o[:, :COUT].T.reshape(N, COUT, HO, WO)          # (1, 5, 4, 4)
    x4 = gru_o[:, :HID].reshape(NP_PIX, N, HID)               # (16, 1, 5)
    x7 = x7_o[:, :COUT].T.reshape(N, COUT, HO, WO)            # (1, 5, 4, 4)
    return x7, {"x1": x1, "x4": x4}


# -------------------------------- param init --------------------------------

def init_params(key):
    ks = jax.random.split(key, 6)
    conv_w = 0.1 * jax.random.normal(ks[0], (COUT, CIN, K, K), jnp.float32)
    conv_b = 0.1 * jax.random.normal(ks[1], (COUT,), jnp.float32)
    w_ih = 0.3 * jax.random.normal(ks[2], (3 * HID, HID), jnp.float32)   # [r; z; n]
    w_hh = 0.3 * jax.random.normal(ks[3], (3 * HID, HID), jnp.float32)
    b_ih = 0.1 * jax.random.normal(ks[4], (3 * HID,), jnp.float32)
    b_hh = 0.1 * jax.random.normal(ks[5], (3 * HID,), jnp.float32)

    # Conv as padded im2col matmul weight (column order = c*25 + kh*5 + kw).
    ckk = CIN * K * K
    w2d = conv_w.reshape(COUT, ckk).T                          # (100, 5)
    wconv = jnp.zeros((LANES, LANES), jnp.float32).at[:ckk, :COUT].set(w2d)
    bconv = jnp.zeros((1, LANES), jnp.float32).at[0, :COUT].set(conv_b)

    # GRU gate weights packed into ONE 128-lane block: r@[0:8), z@[8:16), n@[16:24).
    wx = jnp.zeros((LANES, LANES), jnp.float32)
    wh = jnp.zeros((LANES, LANES), jnp.float32)
    bih = jnp.zeros((1, LANES), jnp.float32)
    bhh = jnp.zeros((1, LANES), jnp.float32)
    for g in range(3):
        wx = wx.at[:HID, g * G:g * G + HID].set(w_ih[g * HID:(g + 1) * HID, :].T)
        wh = wh.at[:HID, g * G:g * G + HID].set(w_hh[g * HID:(g + 1) * HID, :].T)
        bih = bih.at[0, g * G:g * G + HID].set(b_ih[g * HID:(g + 1) * HID])
        bhh = bhh.at[0, g * G:g * G + HID].set(b_hh[g * HID:(g + 1) * HID])

    # BatchNorm2d defaults: gamma=1, beta=0 (padded lanes are 0 -> zero output).
    gamma = jnp.zeros((1, LANES), jnp.float32).at[0, :COUT].set(1.0)
    beta = jnp.zeros((1, LANES), jnp.float32)

    # MXU operands in bf16 (conv / GRU weights); biases & BN params stay f32.
    return dict(wconv=wconv.astype(jnp.bfloat16), bconv=bconv,
                wx=wx.astype(jnp.bfloat16), wh=wh.astype(jnp.bfloat16),
                bih=bih, bhh=bhh, gamma=gamma, beta=beta)


if __name__ == "__main__":
    key = jax.random.PRNGKey(0)
    kx, kp = jax.random.split(key)
    x = jax.random.normal(kx, (N, CIN, HX, WX), jnp.float32)   # (1, 4, 8, 8)
    params = init_params(kp)

    out, aux = model_forward(x, params)
    jax.block_until_ready((out, aux))

    assert out.shape == (1, 5, 4, 4) and out.dtype == jnp.float32
    assert aux["x1"].shape == (1, 5, 4, 4)
    assert aux["x4"].shape == (16, 1, 5)
    assert bool(jnp.all(jnp.isfinite(out)))
    print("KERNEL_OK")
</pallas_src>

<mosaic_0001>
module attributes {stable_mosaic.version = 11 : i64} {
  func.func @_fused_kernel(%arg0: memref<16x128xi32, #tpu.memory_space<vmem>>, %arg1: memref<16x128xf32, #tpu.memory_space<vmem>>, %arg2: memref<128x128xbf16, #tpu.memory_space<vmem>>, %arg3: memref<1x128xf32, #tpu.memory_space<vmem>>, %arg4: memref<128x128xbf16, #tpu.memory_space<vmem>>, %arg5: memref<128x128xbf16, #tpu.memory_space<vmem>>, %arg6: memref<1x128xf32, #tpu.memory_space<vmem>>, %arg7: memref<1x128xf32, #tpu.memory_space<vmem>>, %arg8: memref<1x128xf32, #tpu.memory_space<vmem>>, %arg9: memref<1x128xf32, #tpu.memory_space<vmem>>, %arg10: memref<16x128xf32, #tpu.memory_space<vmem>>, %arg11: memref<16x128xf32, #tpu.memory_space<vmem>>, %arg12: memref<16x128xf32, #tpu.memory_space<vmem>>) attributes {dimension_semantics = [], scalar_prefetch = 0 : i64, scratch_operands = 0 : i64, tpu.core_type = #tpu.core_type<tc>} {
    %c0 = arith.constant 0 : index
    %c0_0 = arith.constant 0 : index
    %0 = vector.load %arg0[%c0, %c0_0] : memref<16x128xi32, #tpu.memory_space<vmem>>, vector<16x128xi32>
    %c-1640531535_i32 = arith.constant -1640531535 : i32
    %1 = vector.broadcast %c-1640531535_i32 : i32 to vector<16x128xi32>
    %2 = arith.muli %0, %1 : vector<16x128xi32>
    %c-1640519190_i32 = arith.constant -1640519190 : i32
    %3 = vector.broadcast %c-1640519190_i32 : i32 to vector<16x128xi32>
    %4 = arith.addi %2, %3 : vector<16x128xi32>
    %c16_i32 = arith.constant 16 : i32
    %5 = vector.broadcast %c16_i32 : i32 to vector<16x128xi32>
    %6 = arith.shrsi %4, %5 : vector<16x128xi32>
    %c65535_i32 = arith.constant 65535 : i32
    %7 = vector.broadcast %c65535_i32 : i32 to vector<16x128xi32>
    %8 = arith.andi %6, %7 : vector<16x128xi32>
    %9 = arith.xori %4, %8 : vector<16x128xi32>
    %c-2048144789_i32 = arith.constant -2048144789 : i32
    %10 = vector.broadcast %c-2048144789_i32 : i32 to vector<16x128xi32>
    %11 = arith.muli %9, %10 : vector<16x128xi32>
    %c13_i32 = arith.constant 13 : i32
    %12 = vector.broadcast %c13_i32 : i32 to vector<16x128xi32>
    %13 = arith.shrsi %11, %12 : vector<16x128xi32>
    %c524287_i32 = arith.constant 524287 : i32
    %14 = vector.broadcast %c524287_i32 : i32 to vector<16x128xi32>
    %15 = arith.andi %13, %14 : vector<16x128xi32>
    %16 = arith.xori %11, %15 : vector<16x128xi32>
    %c-1028477387_i32 = arith.constant -1028477387 : i32
    %17 = vector.broadcast %c-1028477387_i32 : i32 to vector<16x128xi32>
    %18 = arith.muli %16, %17 : vector<16x128xi32>
    %c16_i32_1 = arith.constant 16 : i32
    %19 = vector.broadcast %c16_i32_1 : i32 to vector<16x128xi32>
    %20 = arith.shrsi %18, %19 : vector<16x128xi32>
    %c65535_i32_2 = arith.constant 65535 : i32
    %21 = vector.broadcast %c65535_i32_2 : i32 to vector<16x128xi32>
    %22 = arith.andi %20, %21 : vector<16x128xi32>
    %23 = arith.xori %18, %22 : vector<16x128xi32>
    %c8388607_i32 = arith.constant 8388607 : i32
    %24 = vector.broadcast %c8388607_i32 : i32 to vector<16x128xi32>
    %25 = arith.andi %23, %24 : vector<16x128xi32>
    %26 = arith.sitofp %25 : vector<16x128xi32> to vector<16x128xf32>
    %cst = arith.constant 1.1920929E-7 : f32
    %27 = vector.broadcast %cst : f32 to vector<16x128xf32>
    %28 = arith.mulf %26, %27 : vector<16x128xf32>
    %cst_3 = arith.constant 5.000000e-01 : f32
    %29 = vector.broadcast %cst_3 : f32 to vector<16x128xf32>
    %30 = arith.cmpf oge, %28, %29 : vector<16x128xf32>
    %c0_4 = arith.constant 0 : index
    %c0_5 = arith.constant 0 : index
    %31 = vector.load %arg1[%c0_4, %c0_5] : memref<16x128xf32, #tpu.memory_space<vmem>>, vector<16x128xf32>
    %cst_6 = arith.constant 2.000000e+00 : f32
    %32 = vector.broadcast %cst_6 : f32 to vector<16x128xf32>
    %33 = arith.mulf %31, %32 : vector<16x128xf32>
    %cst_7 = arith.constant 0.000000e+00 : f32
    %34 = vector.broadcast %cst_7 : f32 to vector<16x128xf32>
    %35 = arith.select %30, %33, %34 : vector<16x128xi1>, vector<16x128xf32>
    %36 = arith.truncf %35 : vector<16x128xf32> to vector<16x128xbf16>
    %c0_8 = arith.constant 0 : index
    %c0_9 = arith.constant 0 : index
    %37 = vector.load %arg2[%c0_8, %c0_9] : memref<128x128xbf16, #tpu.memory_space<vmem>>, vector<128x128xbf16>
    %cst_10 = arith.constant dense<0.000000e+00> : vector<16x128xf32>
    %38 = tpu.matmul %36, %37, %cst_10 {dimension_numbers = #tpu.dot_dimension_numbers<[1], [0], [0], [1], [0, 0, 1, 1], [], []>} : vector<16x128xbf16>, vector<128x128xbf16>, vector<16x128xf32> -> vector<16x128xf32>
    %c0_11 = arith.constant 0 : index
    %c0_12 = arith.constant 0 : index
    %39 = vector.load %arg3[%c0_11, %c0_12] : memref<1x128xf32, #tpu.memory_space<vmem>>, vector<1x128xf32>
    %40 = vector.broadcast %39 : vector<1x128xf32> to vector<16x128xf32>
    %41 = arith.addf %38, %40 : vector<16x128xf32>
    %c0_13 = arith.constant 0 : index
    %c0_14 = arith.constant 0 : index
    %42 = vector.load %arg10[%c0_13, %c0_14] : memref<16x128xf32, #tpu.memory_space<vmem>>, vector<16x128xf32>
    tpu.vector_store %arg10[%c0_13, %c0_14], %41 {strides = array<i32>} : memref<16x128xf32, #tpu.memory_space<vmem>>, vector<16x128xf32>,
    %43 = tpu.iota {dimensions = array<i32: 0>} : vector<16x128xi32>
    %44 = tpu.iota {dimensions = array<i32: 1>} : vector<16x128xi32>
    %c128_i32 = arith.constant 128 : i32
    %45 = vector.broadcast %c128_i32 : i32 to vector<16x128xi32>
    %46 = arith.muli %43, %45 : vector<16x128xi32>
    %47 = arith.addi %46, %44 : vector<16x128xi32>
    %c-1640531535_i32_15 = arith.constant -1640531535 : i32
    %48 = vector.broadcast %c-1640531535_i32_15 : i32 to vector<16x128xi32>
    %49 = arith.muli %47, %48 : vector<16x128xi32>
    %c1013916571_i32 = arith.constant 1013916571 : i32
    %50 = vector.broadcast %c1013916571_i32 : i32 to vector<16x128xi32>
    %51 = arith.addi %49, %50 : vector<16x128xi32>
    %c16_i32_16 = arith.constant 16 : i32
    %52 = vector.broadcast %c16_i32_16 : i32 to vector<16x128xi32>
    %53 = arith.shrsi %51, %52 : vector<16x128xi32>
    %c65535_i32_17 = arith.constant 65535 : i32
    %54 = vector.broadcast %c65535_i32_17 : i32 to vector<16x128xi32>
    %55 = arith.andi %53, %54 : vector<16x128xi32>
    %56 = arith.xori %51, %55 : vector<16x128xi32>
    %c-2048144789_i32_18 = arith.constant -2048144789 : i32
    %57 = vector.broadcast %c-2048144789_i32_18 : i32 to vector<16x128xi32>
    %58 = arith.muli %56, %57 : vector<16x128xi32>
    %c13_i32_19 = arith.constant 13 : i32
    %59 = vector.broadcast %c13_i32_19 : i32 to vector<16x128xi32>
    %60 = arith.shrsi %58, %59 : vector<16x128xi32>
    %c524287_i32_20 = arith.constant 524287 : i32
    %61 = vector.broadcast %c524287_i32_20 : i32 to vector<16x128xi32>
    %62 = arith.andi %60, %61 : vector<16x128xi32>
    %63 = arith.xori %58, %62 : vector<16x128xi32>
    %c-1028477387_i32_21 = arith.constant -1028477387 : i32
    %64 = vector.broadcast %c-1028477387_i32_21 : i32 to vector<16x128xi32>
    %65 = arith.muli %63, %64 : vector<16x128xi32>
    %c16_i32_22 = arith.constant 16 : i32
    %66 = vector.broadcast %c16_i32_22 : i32 to vector<16x128xi32>
    %67 = arith.shrsi %65, %66 : vector<16x128xi32>
    %c65535_i32_23 = arith.constant 65535 : i32
    %68 = vector.broadcast %c65535_i32_23 : i32 to vector<16x128xi32>
    %69 = arith.andi %67, %68 : vector<16x128xi32>
    %70 = arith.xori %65, %69 : vector<16x128xi32>
    %c8388607_i32_24 = arith.constant 8388607 : i32
    %71 = vector.broadcast %c8388607_i32_24 : i32 to vector<16x128xi32>
    %72 = arith.andi %70, %71 : vector<16x128xi32>
    %73 = arith.sitofp %72 : vector<16x128xi32> to vector<16x128xf32>
    %cst_25 = arith.constant 1.1920929E-7 : f32
    %74 = vector.broadcast %cst_25 : f32 to vector<16x128xf32>
    %75 = arith.mulf %73, %74 : vector<16x128xf32>
    %cst_26 = arith.constant dense<0.000000e+00> : vector<128xf32>
    %76 = vector.multi_reduction <add>, %75, %cst_26 [0] : vector<16x128xf32> to vector<128xf32>
    %77 = vector.shape_cast %76 : vector<128xf32> to vector<1x128xf32>
    %cst_27 = arith.constant 1.600000e+01 : f32
    %78 = vector.broadcast %cst_27 : f32 to vector<1x128xf32>
    %79 = arith.divf %77, %78 : vector<1x128xf32>
    %80 = vector.broadcast %79 : vector<1x128xf32> to vector<16x128xf32>
    %81 = arith.subf %75, %80 : vector<16x128xf32>
    %82 = arith.mulf %81, %81 : vector<16x128xf32>
    %cst_28 = arith.constant dense<0.000000e+00> : vector<128xf32>
    %83 = vector.multi_reduction <add>, %82, %cst_28 [0] : vector<16x128xf32> to vector<128xf32>
    %84 = vector.shape_cast %83 : vector<128xf32> to vector<1x128xf32>
    %cst_29 = arith.constant 1.600000e+01 : f32
    %85 = vector.broadcast %cst_29 : f32 to vector<1x128xf32>
    %86 = arith.divf %84, %85 : vector<1x128xf32>
    %c0_30 = arith.constant 0 : index
    %c0_31 = arith.constant 0 : index
    %87 = vector.load %arg8[%c0_30, %c0_31] : memref<1x128xf32, #tpu.memory_space<vmem>>, vector<1x128xf32>
    %88 = vector.broadcast %79 : vector<1x128xf32> to vector<16x128xf32>
    %89 = arith.subf %75, %88 : vector<16x128xf32>
    %90 = vector.broadcast %87 : vector<1x128xf32> to vector<16x128xf32>
    %91 = arith.mulf %90, %89 : vector<16x128xf32>
    %cst_32 = arith.constant 9.99999974E-6 : f32
    %92 = vector.broadcast %cst_32 : f32 to vector<1x128xf32>
    %93 = arith.addf %86, %92 : vector<1x128xf32>
    %94 = math.rsqrt %93 : vector<1x128xf32>
    %95 = vector.broadcast %94 : vector<1x128xf32> to vector<16x128xf32>
    %96 = arith.mulf %91, %95 : vector<16x128xf32>
    %c0_33 = arith.constant 0 : index
    %c0_34 = arith.constant 0 : index
    %97 = vector.load %arg9[%c0_33, %c0_34] : memref<1x128xf32, #tpu.memory_space<vmem>>, vector<1x128xf32>
    %98 = vector.broadcast %97 : vector<1x128xf32> to vector<16x128xf32>
    %99 = arith.addf %96, %98 : vector<16x128xf32>
    %100 = arith.truncf %99 : vector<16x128xf32> to vector<16x128xbf16>
    %c0_35 = arith.constant 0 : index
    %c0_36 = arith.constant 0 : index
    %101 = vector.load %arg4[%c0_35, %c0_36] : memref<128x128xbf16, #tpu.memory_space<vmem>>, vector<128x128xbf16>
    %cst_37 = arith.constant dense<0.000000e+00> : vector<16x128xf32>
    %102 = tpu.matmul %100, %101, %cst_37 {dimension_numbers = #tpu.dot_dimension_numbers<[1], [0], [0], [1], [0, 0, 1, 1], [], []>} : vector<16x128xbf16>, vector<128x128xbf16>, vector<16x128xf32> -> vector<16x128xf32>
    %c0_38 = arith.constant 0 : index
    %c0_39 = arith.constant 0 : index
    %103 = vector.load %arg6[%c0_38, %c0_39] : memref<1x128xf32, #tpu.memory_space<vmem>>, vector<1x128xf32>
    %104 = vector.broadcast %103 : vector<1x128xf32> to vector<16x128xf32>
    %105 = arith.addf %102, %104 : vector<16x128xf32>
    %cst_40 = arith.constant 0.000000e+00 : f32
    %106 = vector.broadcast %cst_40 : f32 to vector<1x120xf32>
    %cst_41 = arith.constant 0.000000e+00 : f32
    %107 = vector.broadcast %cst_41 : f32 to vector<1x128xf32>
    %108 = vector.extract_strided_slice %105 {offsets = [0, 0], sizes = [1, 128], strides = [1, 1]} : vector<16x128xf32> to vector<1x128xf32>
    %109 = arith.truncf %107 : vector<1x128xf32> to vector<1x128xbf16>
    %c0_42 = arith.constant 0 : index
    %c0_43 = arith.constant 0 : index
    %110 = vector.load %arg5[%c0_42, %c0_43] : memref<128x128xbf16, #tpu.memory_space<vmem>>, vector<128x128xbf16>
    %cst_44 = arith.constant dense<0.000000e+00> : vector<1x128xf32>
    %111 = tpu.matmul %109, %110, %cst_44 {dimension_numbers = #tpu.dot_dimension_numbers<[1], [0], [0], [1], [0, 0, 1, 1], [], []>} : vector<1x128xbf16>, vector<128x128xbf16>, vector<1x128xf32> -> vector<1x128xf32>
    %c0_45 = arith.constant 0 : index
    %c0_46 = arith.constant 0 : index
    %112 = vector.load %arg7[%c0_45, %c0_46] : memref<1x128xf32, #tpu.memory_space<vmem>>, vector<1x128xf32>
    %113 = arith.addf %111, %112 : vector<1x128xf32>
    %114 = arith.addf %108, %113 : vector<1x128xf32>
    %115 = arith.negf %114 : vector<1x128xf32>
    %116 = math.exp %115 : vector<1x128xf32>
    %cst_47 = arith.constant 1.000000e+00 : f32
    %117 = vector.broadcast %cst_47 : f32 to vector<1x128xf32>
    %118 = arith.addf %117, %116 : vector<1x128xf32>
    %119 = arith.divf %117, %118 : vector<1x128xf32>
    %120 = vector.extract_strided_slice %119 {offsets = [0, 0], sizes = [1, 8], strides = [1, 1]} : vector<1x128xf32> to vector<1x8xf32>
    %121 = vector.extract_strided_slice %119 {offsets = [0, 8], sizes = [1, 8], strides = [1, 1]} : vector<1x128xf32> to vector<1x8xf32>
    %122 = vector.extract_strided_slice %108 {offsets = [0, 16], sizes = [1, 8], strides = [1, 1]} : vector<1x128xf32> to vector<1x8xf32>
    %123 = vector.extract_strided_slice %113 {offsets = [0, 16], sizes = [1, 8], strides = [1, 1]} : vector<1x128xf32> to vector<1x8xf32>
    %124 = arith.mulf %120, %123 : vector<1x8xf32>
    %125 = arith.addf %122, %124 : vector<1x8xf32>
    %126 = math.tanh %125 : vector<1x8xf32>
    %cst_48 = arith.constant 1.000000e+00 : f32
    %127 = vector.broadcast %cst_48 : f32 to vector<1x8xf32>
    %128 = arith.subf %127, %121 : vector<1x8xf32>
    %129 = arith.mulf %128, %126 : vector<1x8xf32>
    %130 = vector.extract_strided_slice %107 {offsets = [0, 0], sizes = [1, 8], strides = [1, 1]} : vector<1x128xf32> to vector<1x8xf32>
    %131 = arith.mulf %121, %130 : vector<1x8xf32>
    %132 = arith.addf %129, %131 : vector<1x8xf32>
    %133 = tpu.concatenate %132, %106 in 1 : vector<1x8xf32>, vector<1x120xf32> -> vector<1x128xf32>
    %134 = vector.extract_strided_slice %105 {offsets = [1, 0], sizes = [1, 128], strides = [1, 1]} : vector<16x128xf32> to vector<1x128xf32>
    %135 = arith.truncf %133 : vector<1x128xf32> to vector<1x128xbf16>
    %c0_49 = arith.constant 0 : index
    %c0_50 = arith.constant 0 : index
    %136 = vector.load %arg5[%c0_49, %c0_50] : memref<128x128xbf16, #tpu.memory_space<vmem>>, vector<128x128xbf16>
    %cst_51 = arith.constant dense<0.000000e+00> : vector<1x128xf32>
    %137 = tpu.matmul %135, %136, %cst_51 {dimension_numbers = #tpu.dot_dimension_numbers<[1], [0], [0], [1], [0, 0, 1, 1], [], []>} : vector<1x128xbf16>, vector<128x128xbf16>, vector<1x128xf32> -> vector<1x128xf32>
    %c0_52 = arith.constant 0 : index
    %c0_53 = arith.constant 0 : index
    %138 = vector.load %arg7[%c0_52, %c0_53] : memref<1x128xf32, #tpu.memory_space<vmem>>, vector<1x128xf32>
    %139 = arith.addf %137, %138 : vector<1x128xf32>
    %140 = arith.addf %134, %139 : vector<1x128xf32>
    %141 = arith.negf %140 : vector<1x128xf32>
    %142 = math.exp %141 : vector<1x128xf32>
    %cst_54 = arith.constant 1.000000e+00 : f32
    %143 = vector.broadcast %cst_54 : f32 to vector<1x128xf32>
    %144 = arith.addf %143, %142 : vector<1x128xf32>
    %145 = arith.divf %143, %144 : vector<1x128xf32>
    %146 = vector.extract_strided_slice %145 {offsets = [0, 0], sizes = [1, 8], strides = [1, 1]} : vector<1x128xf32> to vector<1x8xf32>
    %147 = vector.extract_strided_slice %145 {offsets = [0, 8], sizes = [1, 8], strides = [1, 1]} : vector<1x128xf32> to vector<1x8xf32>
    %148 = vector.extract_strided_slice %134 {offsets = [0, 16], sizes = [1, 8], strides = [1, 1]} : vector<1x128xf32> to vector<1x8xf32>
    %149 = vector.extract_strided_slice %139 {offsets = [0, 16], sizes = [1, 8], strides = [1, 1]} : vector<1x128xf32> to vector<1x8xf32>
    %150 = arith.mulf %146, %149 : vector<1x8xf32>
    %151 = arith.addf %148, %150 : vector<1x8xf32>
    %152 = math.tanh %151 : vector<1x8xf32>
    %cst_55 = arith.constant 1.000000e+00 : f32
    %153 = vector.broadcast %cst_55 : f32 to vector<1x8xf32>
    %154 = arith.subf %153, %147 : vector<1x8xf32>
    %155 = arith.mulf %154, %152 : vector<1x8xf32>
    %156 = vector.extract_strided_slice %133 {offsets = [0, 0], sizes = [1, 8], strides = [1, 1]} : vector<1x128xf32> to vector<1x8xf32>
    %157 = arith.mulf %147, %156 : vector<1x8xf32>
    %158 = arith.addf %155, %157 : vector<1x8xf32>
    %159 = tpu.concatenate %158, %106 in 1 : vector<1x8xf32>, vector<1x120xf32> -> vector<1x128xf32>
    %160 = vector.extract_strided_slice %105 {offsets = [2, 0], sizes = [1, 128], strides = [1, 1]} : vector<16x128xf32> to vector<1x128xf32>
    %161 = arith.truncf %159 : vector<1x128xf32> to vector<1x128xbf16>
    %c0_56 = arith.constant 0 : index
    %c0_57 = arith.constant 0 : index
    %162 = vector.load %arg5[%c0_56, %c0_57] : memref<128x128xbf16, #tpu.memory_space<vmem>>, vector<128x128xbf16>
    %cst_58 = arith.constant dense<0.000000e+00> : vector<1x128xf32>
    %163 = tpu.matmul %161, %162, %cst_58 {dimension_numbers = #tpu.dot_dimension_numbers<[1], [0], [0], [1], [0, 0, 1, 1], [], []>} : vector<1x128xbf16>, vector<128x128xbf16>, vector<1x128xf32> -> vector<1x128xf32>
    %c0_59 = arith.constant 0 : index
    %c0_60 = arith.constant 0 : index
    %164 = vector.load %arg7[%c0_59, %c0_60] : memref<1x128xf32, #tpu.memory_space<vmem>>, vector<1x128xf32>
    %165 = arith.addf %163, %164 : vector<1x128xf32>
    %166 = arith.addf %160, %165 : vector<1x128xf32>
    %167 = arith.negf %166 : vector<1x128xf32>
    %168 = math.exp %167 : vector<1x128xf32>
    %cst_61 = arith.constant 1.000000e+00 : f32
    %169 = vector.broadcast %cst_61 : f32 to vector<1x128xf32>
    %170 = arith.addf %169, %168 : vector<1x128xf32>
    %171 = arith.divf %169, %170 : vector<1x128xf32>
    %172 = vector.extract_strided_slice %171 {offsets = [0, 0], sizes = [1, 8], strides = [1, 1]} : vector<1x128xf32> to vector<1x8xf32>
    %173 = vector.extract_strided_slice %171 {offsets = [0, 8], sizes = [1, 8], strides = [1, 1]} : vector<1x128xf32> to vector<1x8xf32>
    %174 = vector.extract_strided_slice %160 {offsets = [0, 16], sizes = [1, 8], strides = [1, 1]} : vector<1x128xf32> to vector<1x8xf32>
    %175 = vector.extract_strided_slice %165 {offsets = [0, 16], sizes = [1, 8], strides = [1, 1]} : vector<1x128xf32> to vector<1x8xf32>
    %176 = arith.mulf %172, %175 : vector<1x8xf32>
    %177 = arith.addf %174, %176 : vector<1x8xf32>
    %178 = math.tanh %177 : vector<1x8xf32>
    %cst_62 = arith.constant 1.000000e+00 : f32
    %179 = vector.broadcast %cst_62 : f32 to vector<1x8xf32>
    %180 = arith.subf %179, %173 : vector<1x8xf32>
    %181 = arith.mulf %180, %178 : vector<1x8xf32>
    %182 = vector.extract_strided_slice %159 {offsets = [0, 0], sizes = [1, 8], strides = [1, 1]} : vector<1x128xf32> to vector<1x8xf32>
    %183 = arith.mulf %173, %182 : vector<1x8xf32>
    %184 = arith.addf %181, %183 : vector<1x8xf32>
    %185 = tpu.concatenate %184, %106 in 1 : vector<1x8xf32>, vector<1x120xf32> -> vector<1x128xf32>
    %186 = vector.extract_strided_slice %105 {offsets = [3, 0], sizes = [1, 128], strides = [1, 1]} : vector<16x128xf32> to vector<1x128xf32>
    %187 = arith.truncf %185 : vector<1x128xf32> to vector<1x128xbf16>
    %c0_63 = arith.constant 0 : index
    %c0_64 = arith.constant 0 : index
    %188 = vector.load %arg5[%c0_63, %c0_64] : memref<128x128xbf16, #tpu.memory_space<vmem>>, vector<128x128xbf16>
    %cst_65 = arith.constant dense<0.000000e+00> : vector<1x128xf32>
    %189 = tpu.matmul %187, %188, %cst_65 {dimension_numbers = #tpu.dot_dimension_numbers<[1], [0], [0], [1], [0, 0, 1, 1], [], []>} : vector<1x128xbf16>, vector<128x128xbf16>, vector<1x128xf32> -> vector<1x128xf32>
    %c0_66 = arith.constant 0 : index
    %c0_67 = arith.constant 0 : index
    %190 = vector.load %arg7[%c0_66, %c0_67] : memref<1x128xf32, #tpu.memory_space<vmem>>, vector<1x128xf32>
    %191 = arith.addf %189, %190 : vector<1x128xf32>
    %192 = arith.addf %186, %191 : vector<1x128xf32>
    %193 = arith.negf %192 : vector<1x128xf32>
    %194 = math.exp %193 : vector<1x128xf32>
    %cst_68 = arith.constant 1.000000e+00 : f32
    %195 = vector.broadcast %cst_68 : f32 to vector<1x128xf32>
    %196 = arith.addf %195, %194 : vector<1x128xf32>
    %197 = arith.divf %195, %196 : vector<1x128xf32>
    %198 = vector.extract_strided_slice %197 {offsets = [0, 0], sizes = [1, 8], strides = [1, 1]} : vector<1x128xf32> to vector<1x8xf32>
    %199 = vector.extract_strided_slice %197 {offsets = [0, 8], sizes = [1, 8], strides = [1, 1]} : vector<1x128xf32> to vector<1x8xf32>
    %200 = vector.extract_strided_slice %186 {offsets = [0, 16], sizes = [1, 8], strides = [1, 1]} : vector<1x128xf32> to vector<1x8xf32>
    %201 = vector.extract_strided_slice %191 {offsets = [0, 16], sizes = [1, 8], strides = [1, 1]} : vector<1x128xf32> to vector<1x8xf32>
    %202 = arith.mulf %198, %201 : vector<1x8xf32>
    %203 = arith.addf %200, %202 : vector<1x8xf32>
    %204 = math.tanh %203 : vector<1x8xf32>
    %cst_69 = arith.constant 1.000000e+00 : f32
    %205 = vector.broadcast %cst_69 : f32 to vector<1x8xf32>
    %206 = arith.subf %205, %199 : vector<1x8xf32>
    %207 = arith.mulf %206, %204 : vector<1x8xf32>
    %208 = vector.extract_strided_slice %185 {offsets = [0, 0], sizes = [1, 8], strides = [1, 1]} : vector<1x128xf32> to vector<1x8xf32>
    %209 = arith.mulf %199, %208 : vector<1x8xf32>
    %210 = arith.addf %207, %209 : vector<1x8xf32>
    %211 = tpu.concatenate %210, %106 in 1 : vector<1x8xf32>, vector<1x120xf32> -> vector<1x128xf32>
    %212 = vector.extract_strided_slice %105 {offsets = [4, 0], sizes = [1, 128], strides = [1, 1]} : vector<16x128xf32> to vector<1x128xf32>
    %213 = arith.truncf %211 : vector<1x128xf32> to vector<1x128xbf16>
    %c0_70 = arith.constant 0 : index
    %c0_71 = arith.constant 0 : index
    %214 = vector.load %arg5[%c0_70, %c0_71] : memref<128x128xbf16, #tpu.memory_space<vmem>>, vector<128x128xbf16>
    %cst_72 = arith.constant dense<0.000000e+00> : vector<1x128xf32>
    %215 = tpu.matmul %213, %214, %cst_72 {dimension_numbers = #tpu.dot_dimension_numbers<[1], [0], [0], [1], [0, 0, 1, 1], [], []>} : vector<1x128xbf16>, vector<128x128xbf16>, vector<1x128xf32> -> vector<1x128xf32>
    %c0_73 = arith.constant 0 : index
    %c0_74 = arith.constant 0 : index
    %216 = vector.load %arg7[%c0_73, %c0_74] : memref<1x128xf32, #tpu.memory_space<vmem>>, vector<1x128xf32>
    %217 = arith.addf %215, %216 : vector<1x128xf32>
    %218 = arith.addf %212, %217 : vector<1x128xf32>
    %219 = arith.negf %218 : vector<1x128xf32>
    %220 = math.exp %219 : vector<1x128xf32>
    %cst_75 = arith.constant 1.000000e+00 : f32
    %221 = vector.broadcast %cst_75 : f32 to vector<1x128xf32>
    %222 = arith.addf %221, %220 : vector<1x128xf32>
    %223 = arith.divf %221, %222 : vector<1x128xf32>
    %224 = vector.extract_strided_slice %223 {offsets = [0, 0], sizes = [1, 8], strides = [1, 1]} : vector<1x128xf32> to vector<1x8xf32>
    %225 = vector.extract_strided_slice %223 {offsets = [0, 8], sizes = [1, 8], strides = [1, 1]} : vector<1x128xf32> to vector<1x8xf32>
    %226 = vector.extract_strided_slice %212 {offsets = [0, 16], sizes = [1, 8], strides = [1, 1]} : vector<1x128xf32> to vector<1x8xf32>
    %227 = vector.extract_strided_slice %217 {offsets = [0, 16], sizes = [1, 8], strides = [1, 1]} : vector<1x128xf32> to vector<1x8xf32>
    %228 = arith.mulf %224, %227 : vector<1x8xf32>
    %229 = arith.addf %226, %228 : vector<1x8xf32>
    %230 = math.tanh %229 : vector<1x8xf32>
    %cst_76 = arith.constant 1.000000e+00 : f32
    %231 = vector.broadcast %cst_76 : f32 to vector<1x8xf32>
    %232 = arith.subf %231, %225 : vector<1x8xf32>
    %233 = arith.mulf %232, %230 : vector<1x8xf32>
    %234 = vector.extract_strided_slice %211 {offsets = [0, 0], sizes = [1, 8], strides = [1, 1]} : vector<1x128xf32> to vector<1x8xf32>
    %235 = arith.mulf %225, %234 : vector<1x8xf32>
    %236 = arith.addf %233, %235 : vector<1x8xf32>
    %237 = tpu.concatenate %236, %106 in 1 : vector<1x8xf32>, vector<1x120xf32> -> vector<1x128xf32>
    %238 = vector.extract_strided_slice %105 {offsets = [5, 0], sizes = [1, 128], strides = [1, 1]} : vector<16x128xf32> to vector<1x128xf32>
    %239 = arith.truncf %237 : vector<1x128xf32> to vector<1x128xbf16>
    %c0_77 = arith.constant 0 : index
    %c0_78 = arith.constant 0 : index
    %240 = vector.load %arg5[%c0_77, %c0_78] : memref<128x128xbf16, #tpu.memory_space<vmem>>, vector<128x128xbf16>
    %cst_79 = arith.constant dense<0.000000e+00> : vector<1x128xf32>
    %241 = tpu.matmul %239, %240, %cst_79 {dimension_numbers = #tpu.dot_dimension_numbers<[1], [0], [0], [1], [0, 0, 1, 1], [], []>} : vector<1x128xbf16>, vector<128x128xbf16>, vector<1x128xf32> -> vector<1x128xf32>
    %c0_80 = arith.constant 0 : index
    %c0_81 = arith.constant 0 : index
    %242 = vector.load %arg7[%c0_80, %c0_81] : memref<1x128xf32, #tpu.memory_space<vmem>>, vector<1x128xf32>
    %243 = arith.addf %241, %242 : vector<1x128xf32>
    %244 = arith.addf %238, %243 : vector<1x128xf32>
    %245 = arith.negf %244 : vector<1x128xf32>
    %246 = math.exp %245 : vector<1x128xf32>
    %cst_82 = arith.constant 1.000000e+00 : f32
    %247 = vector.broadcast %cst_82 : f32 to vector<1x128xf32>
    %248 = arith.addf %247, %246 : vector<1x128xf32>
    %249 = arith.divf %247, %248 : vector<1x128xf32>
    %250 = vector.extract_strided_slice %249 {offsets = [0, 0], sizes = [1, 8], strides = [1, 1]} : vector<1x128xf32> to vector<1x8xf32>
    %251 = vector.extract_strided_slice %249 {offsets = [0, 8], sizes = [1, 8], strides = [1, 1]} : vector<1x128xf32> to vector<1x8xf32>
    %252 = vector.extract_strided_slice %238 {offsets = [0, 16], sizes = [1, 8], strides = [1, 1]} : vector<1x128xf32> to vector<1x8xf32>
    %253 = vector.extract_strided_slice %243 {offsets = [0, 16], sizes = [1, 8], strides = [1, 1]} : vector<1x128xf32> to vector<1x8xf32>
    %254 = arith.mulf %250, %253 : vector<1x8xf32>
    %255 = arith.addf %252, %254 : vector<1x8xf32>
    %256 = math.tanh %255 : vector<1x8xf32>
    %cst_83 = arith.constant 1.000000e+00 : f32
    %257 = vector.broadcast %cst_83 : f32 to vector<1x8xf32>
    %258 = arith.subf %257, %251 : vector<1x8xf32>
    %259 = arith.mulf %258, %256 : vector<1x8xf32>
    %260 = vector.extract_strided_slice %237 {offsets = [0, 0], sizes = [1, 8], strides = [1, 1]} : vector<1x128xf32> to vector<1x8xf32>
    %261 = arith.mulf %251, %260 : vector<1x8xf32>
    %262 = arith.addf %259, %261 : vector<1x8xf32>
    %263 = tpu.concatenate %262, %106 in 1 : vector<1x8xf32>, vector<1x120xf32> -> vector<1x128xf32>
    %264 = vector.extract_strided_slice %105 {offsets = [6, 0], sizes = [1, 128], strides = [1, 1]} : vector<16x128xf32> to vector<1x128xf32>
    %265 = arith.truncf %263 : vector<1x128xf32> to vector<1x128xbf16>
    %c0_84 = arith.constant 0 : index
    %c0_85 = arith.constant 0 : index
    %266 = vector.load %arg5[%c0_84, %c0_85] : memref<128x128xbf16, #tpu.memory_space<vmem>>, vector<128x128xbf16>
    %cst_86 = arith.constant dense<0.000000e+00> : vector<1x128xf32>
    %267 = tpu.matmul %265, %266, %cst_86 {dimension_numbers = #tpu.dot_dimension_numbers<[1], [0], [0], [1], [0, 0, 1, 1], [], []>} : vector<1x128xbf16>, vector<128x128xbf16>, vector<1x128xf32> -> vector<1x128xf32>
    %c0_87 = arith.constant 0 : index
    %c0_88 = arith.constant 0 : index
    %268 = vector.load %arg7[%c0_87, %c0_88] : memref<1x128xf32, #tpu.memory_space<vmem>>, vector<1x128xf32>
    %269 = arith.addf %267, %268 : vector<1x128xf32>
    %270 = arith.addf %264, %269 : vector<1x128xf32>
    %271 = arith.negf %270 : vector<1x128xf32>
    %272 = math.exp %271 : vector<1x128xf32>
    %cst_89 = arith.constant 1.000000e+00 : f32
    %273 = vector.broadcast %cst_89 : f32 to vector<1x128xf32>
    %274 = arith.addf %273, %272 : vector<1x128xf32>
    %275 = arith.divf %273, %274 : vector<1x128xf32>
    %276 = vector.extract_strided_slice %275 {offsets = [0, 0], sizes = [1, 8], strides = [1, 1]} : vector<1x128xf32> to vector<1x8xf32>
    %277 = vector.extract_strided_slice %275 {offsets = [0, 8], sizes = [1, 8], strides = [1, 1]} : vector<1x128xf32> to vector<1x8xf32>
    %278 = vector.extract_strided_slice %264 {offsets = [0, 16], sizes = [1, 8], strides = [1, 1]} : vector<1x128xf32> to vector<1x8xf32>
    %279 = vector.extract_strided_slice %269 {offsets = [0, 16], sizes = [1, 8], strides = [1, 1]} : vector<1x128xf32> to vector<1x8xf32>
    %280 = arith.mulf %276, %279 : vector<1x8xf32>
    %281 = arith.addf %278, %280 : vector<1x8xf32>
    %282 = math.tanh %281 : vector<1x8xf32>
    %cst_90 = arith.constant 1.000000e+00 : f32
    %283 = vector.broadcast %cst_90 : f32 to vector<1x8xf32>
    %284 = arith.subf %283, %277 : vector<1x8xf32>
    %285 = arith.mulf %284, %282 : vector<1x8xf32>
    %286 = vector.extract_strided_slice %263 {offsets = [0, 0], sizes = [1, 8], strides = [1, 1]} : vector<1x128xf32> to vector<1x8xf32>
    %287 = arith.mulf %277, %286 : vector<1x8xf32>
    %288 = arith.addf %285, %287 : vector<1x8xf32>
    %289 = tpu.concatenate %288, %106 in 1 : vector<1x8xf32>, vector<1x120xf32> -> vector<1x128xf32>
    %290 = vector.extract_strided_slice %105 {offsets = [7, 0], sizes = [1, 128], strides = [1, 1]} : vector<16x128xf32> to vector<1x128xf32>
    %291 = arith.truncf %289 : vector<1x128xf32> to vector<1x128xbf16>
    %c0_91 = arith.constant 0 : index
    %c0_92 = arith.constant 0 : index
    %292 = vector.load %arg5[%c0_91, %c0_92] : memref<128x128xbf16, #tpu.memory_space<vmem>>, vector<128x128xbf16>
    %cst_93 = arith.constant dense<0.000000e+00> : vector<1x128xf32>
    %293 = tpu.matmul %291, %292, %cst_93 {dimension_numbers = #tpu.dot_dimension_numbers<[1], [0], [0], [1], [0, 0, 1, 1], [], []>} : vector<1x128xbf16>, vector<128x128xbf16>, vector<1x128xf32> -> vector<1x128xf32>
    %c0_94 = arith.constant 0 : index
    %c0_95 = arith.constant 0 : index
    %294 = vector.load %arg7[%c0_94, %c0_95] : memref<1x128xf32, #tpu.memory_space<vmem>>, vector<1x128xf32>
    %295 = arith.addf %293, %294 : vector<1x128xf32>
    %296 = arith.addf %290, %295 : vector<1x128xf32>
    %297 = arith.negf %296 : vector<1x128xf32>
    %298 = math.exp %297 : vector<1x128xf32>
    %cst_96 = arith.constant 1.000000e+00 : f32
    %299 = vector.broadcast %cst_96 : f32 to vector<1x128xf32>
    %300 = arith.addf %299, %298 : vector<1x128xf32>
    %301 = arith.divf %299, %300 : vector<1x128xf32>
    %302 = vector.extract_strided_slice %301 {offsets = [0, 0], sizes = [1, 8], strides = [1, 1]} : vector<1x128xf32> to vector<1x8xf32>
    %303 = vector.extract_strided_slice %301 {offsets = [0, 8], sizes = [1, 8], strides = [1, 1]} : vector<1x128xf32> to vector<1x8xf32>
    %304 = vector.extract_strided_slice %290 {offsets = [0, 16], sizes = [1, 8], strides = [1, 1]} : vector<1x128xf32> to vector<1x8xf32>
    %305 = vector.extract_strided_slice %295 {offsets = [0, 16], sizes = [1, 8], strides = [1, 1]} : vector<1x128xf32> to vector<1x8xf32>
    %306 = arith.mulf %302, %305 : vector<1x8xf32>
    %307 = arith.addf %304, %306 : vector<1x8xf32>
    %308 = math.tanh %307 : vector<1x8xf32>
    %cst_97 = arith.constant 1.000000e+00 : f32
    %309 = vector.broadcast %cst_97 : f32 to vector<1x8xf32>
    %310 = arith.subf %309, %303 : vector<1x8xf32>
    %311 = arith.mulf %310, %308 : vector<1x8xf32>
    %312 = vector.extract_strided_slice %289 {offsets = [0, 0], sizes = [1, 8], strides = [1, 1]} : vector<1x128xf32> to vector<1x8xf32>
    %313 = arith.mulf %303, %312 : vector<1x8xf32>
    %314 = arith.addf %311, %313 : vector<1x8xf32>
    %315 = tpu.concatenate %314, %106 in 1 : vector<1x8xf32>, vector<1x120xf32> -> vector<1x128xf32>
    %316 = vector.extract_strided_slice %105 {offsets = [8, 0], sizes = [1, 128], strides = [1, 1]} : vector<16x128xf32> to vector<1x128xf32>
    %317 = arith.truncf %315 : vector<1x128xf32> to vector<1x128xbf16>
    %c0_98 = arith.constant 0 : index
    %c0_99 = arith.constant 0 : index
    %318 = vector.load %arg5[%c0_98, %c0_99] : memref<128x128xbf16, #tpu.memory_space<vmem>>, vector<128x128xbf16>
    %cst_100 = arith.constant dense<0.000000e+00> : vector<1x128xf32>
    %319 = tpu.matmul %317, %318, %cst_100 {dimension_numbers = #tpu.dot_dimension_numbers<[1], [0], [0], [1], [0, 0, 1, 1], [], []>} : vector<1x128xbf16>, vector<128x128xbf16>, vector<1x128xf32> -> vector<1x128xf32>
    %c0_101 = arith.constant 0 : index
    %c0_102 = arith.constant 0 : index
    %320 = vector.load %arg7[%c0_101, %c0_102] : memref<1x128xf32, #tpu.memory_space<vmem>>, vector<1x128xf32>
    %321 = arith.addf %319, %320 : vector<1x128xf32>
    %322 = arith.addf %316, %321 : vector<1x128xf32>
    %323 = arith.negf %322 : vector<1x128xf32>
    %324 = math.exp %323 : vector<1x128xf32>
    %cst_103 = arith.constant 1.000000e+00 : f32
    %325 = vector.broadcast %cst_103 : f32 to vector<1x128xf32>
    %326 = arith.addf %325, %324 : vector<1x128xf32>
    %327 = arith.divf %325, %326 : vector<1x128xf32>
    %328 = vector.extract_strided_slice %327 {offsets = [0, 0], sizes = [1, 8], strides = [1, 1]} : vector<1x128xf32> to vector<1x8xf32>
    %329 = vector.extract_strided_slice %327 {offsets = [0, 8], sizes = [1, 8], strides = [1, 1]} : vector<1x128xf32> to vector<1x8xf32>
    %330 = vector.extract_strided_slice %316 {offsets = [0, 16], sizes = [1, 8], strides = [1, 1]} : vector<1x128xf32> to vector<1x8xf32>
    %331 = vector.extract_strided_slice %321 {offsets = [0, 16], sizes = [1, 8], strides = [1, 1]} : vector<1x128xf32> to vector<1x8xf32>
    %332 = arith.mulf %328, %331 : vector<1x8xf32>
    %333 = arith.addf %330, %332 : vector<1x8xf32>
    %334 = math.tanh %333 : vector<1x8xf32>
    %cst_104 = arith.constant 1.000000e+00 : f32
    %335 = vector.broadcast %cst_104 : f32 to vector<1x8xf32>
    %336 = arith.subf %335, %329 : vector<1x8xf32>
    %337 = arith.mulf %336, %334 : vector<1x8xf32>
    %338 = vector.extract_strided_slice %315 {offsets = [0, 0], sizes = [1, 8], strides = [1, 1]} : vector<1x128xf32> to vector<1x8xf32>
    %339 = arith.mulf %329, %338 : vector<1x8xf32>
    %340 = arith.addf %337, %339 : vector<1x8xf32>
    %341 = tpu.concatenate %340, %106 in 1 : vector<1x8xf32>, vector<1x120xf32> -> vector<1x128xf32>
    %342 = vector.extract_strided_slice %105 {offsets = [9, 0], sizes = [1, 128], strides = [1, 1]} : vector<16x128xf32> to vector<1x128xf32>
    %343 = arith.truncf %341 : vector<1x128xf32> to vector<1x128xbf16>
    %c0_105 = arith.constant 0 : index
    %c0_106 = arith.constant 0 : index
    %344 = vector.load %arg5[%c0_105, %c0_106] : memref<128x128xbf16, #tpu.memory_space<vmem>>, vector<128x128xbf16>
    %cst_107 = arith.constant dense<0.000000e+00> : vector<1x128xf32>
    %345 = tpu.matmul %343, %344, %cst_107 {dimension_numbers = #tpu.dot_dimension_numbers<[1], [0], [0], [1], [0, 0, 1, 1], [], []>} : vector<1x128xbf16>, vector<128x128xbf16>, vector<1x128xf32> -> vector<1x128xf32>
    %c0_108 = arith.constant 0 : index
    %c0_109 = arith.constant 0 : index
    %346 = vector.load %arg7[%c0_108, %c0_109] : memref<1x128xf32, #tpu.memory_space<vmem>>, vector<1x128xf32>
    %347 = arith.addf %345, %346 : vector<1x128xf32>
    %348 = arith.addf %342, %347 : vector<1x128xf32>
    %349 = arith.negf %348 : vector<1x128xf32>
    %350 = math.exp %349 : vector<1x128xf32>
    %cst_110 = arith.constant 1.000000e+00 : f32
    %351 = vector.broadcast %cst_110 : f32 to vector<1x128xf32>
    %352 = arith.addf %351, %350 : vector<1x128xf32>
    %353 = arith.divf %351, %352 : vector<1x128xf32>
    %354 = vector.extract_strided_slice %353 {offsets = [0, 0], sizes = [1, 8], strides = [1, 1]} : vector<1x128xf32> to vector<1x8xf32>
    %355 = vector.extract_strided_slice %353 {offsets = [0, 8], sizes = [1, 8], strides = [1, 1]} : vector<1x128xf32> to vector<1x8xf32>
    %356 = vector.extract_strided_slice %342 {offsets = [0, 16], sizes = [1, 8], strides = [1, 1]} : vector<1x128xf32> to vector<1x8xf32>
    %357 = vector.extract_strided_slice %347 {offsets = [0, 16], sizes = [1, 8], strides = [1, 1]} : vector<1x128xf32> to vector<1x8xf32>
    %358 = arith.mulf %354, %357 : vector<1x8xf32>
    %359 = arith.addf %356, %358 : vector<1x8xf32>
    %360 = math.tanh %359 : vector<1x8xf32>
    %cst_111 = arith.constant 1.000000e+00 : f32
    %361 = vector.broadcast %cst_111 : f32 to vector<1x8xf32>
    %362 = arith.subf %361, %355 : vector<1x8xf32>
    %363 = arith.mulf %362, %360 : vector<1x8xf32>
    %364 = vector.extract_strided_slice %341 {offsets = [0, 0], sizes = [1, 8], strides = [1, 1]} : vector<1x128xf32> to vector<1x8xf32>
    %365 = arith.mulf %355, %364 : vector<1x8xf32>
    %366 = arith.addf %363, %365 : vector<1x8xf32>
    %367 = tpu.concatenate %366, %106 in 1 : vector<1x8xf32>, vector<1x120xf32> -> vector<1x128xf32>
    %368 = vector.extract_strided_slice %105 {offsets = [10, 0], sizes = [1, 128], strides = [1, 1]} : vector<16x128xf32> to vector<1x128xf32>
    %369 = arith.truncf %367 : vector<1x128xf32> to vector<1x128xbf16>
    %c0_112 = arith.constant 0 : index
    %c0_113 = arith.constant 0 : index
    %370 = vector.load %arg5[%c0_112, %c0_113] : memref<128x128xbf16, #tpu.memory_space<vmem>>, vector<128x128xbf16>
    %cst_114 = arith.constant dense<0.000000e+00> : vector<1x128xf32>
    %371 = tpu.matmul %369, %370, %cst_114 {dimension_numbers = #tpu.dot_dimension_numbers<[1], [0], [0], [1], [0, 0, 1, 1], [], []>} : vector<1x128xbf16>, vector<128x128xbf16>, vector<1x128xf32> -> vector<1x128xf32>
    %c0_115 = arith.constant 0 : index
    %c0_116 = arith.constant 0 : index
    %372 = vector.load %arg7[%c0_115, %c0_116] : memref<1x128xf32, #tpu.memory_space<vmem>>, vector<1x128xf32>
    %373 = arith.addf %371, %372 : vector<1x128xf32>
    %374 = arith.addf %368, %373 : vector<1x128xf32>
    %375 = arith.negf %374 : vector<1x128xf32>
    %376 = math.exp %375 : vector<1x128xf32>
    %cst_117 = arith.constant 1.000000e+00 : f32
    %377 = vector.broadcast %cst_117 : f32 to vector<1x128xf32>
    %378 = arith.addf %377, %376 : vector<1x128xf32>
    %379 = arith.divf %377, %378 : vector<1x128xf32>
    %380 = vector.extract_strided_slice %379 {offsets = [0, 0], sizes = [1, 8], strides = [1, 1]} : vector<1x128xf32> to vector<1x8xf32>
    %381 = vector.extract_strided_slice %379 {offsets = [0, 8], sizes = [1, 8], strides = [1, 1]} : vector<1x128xf32> to vector<1x8xf32>
    %382 = vector.extract_strided_slice %368 {offsets = [0, 16], sizes = [1, 8], strides = [1, 1]} : vector<1x128xf32> to vector<1x8xf32>
    %383 = vector.extract_strided_slice %373 {offsets = [0, 16], sizes = [1, 8], strides = [1, 1]} : vector<1x128xf32> to vector<1x8xf32>
    %384 = arith.mulf %380, %383 : vector<1x8xf32>
    %385 = arith.addf %382, %384 : vector<1x8xf32>
    %386 = math.tanh %385 : vector<1x8xf32>
    %cst_118 = arith.constant 1.000000e+00 : f32
    %387 = vector.broadcast %cst_118 : f32 to vector<1x8xf32>
    %388 = arith.subf %387, %381 : vector<1x8xf32>
    %389 = arith.mulf %388, %386 : vector<1x8xf32>
    %390 = vector.extract_strided_slice %367 {offsets = [0, 0], sizes = [1, 8], strides = [1, 1]} : vector<1x128xf32> to vector<1x8xf32>
    %391 = arith.mulf %381, %390 : vector<1x8xf32>
    %392 = arith.addf %389, %391 : vector<1x8xf32>
    %393 = tpu.concatenate %392, %106 in 1 : vector<1x8xf32>, vector<1x120xf32> -> vector<1x128xf32>
    %394 = vector.extract_strided_slice %105 {offsets = [11, 0], sizes = [1, 128], strides = [1, 1]} : vector<16x128xf32> to vector<1x128xf32>
    %395 = arith.truncf %393 : vector<1x128xf32> to vector<1x128xbf16>
    %c0_119 = arith.constant 0 : index
    %c0_120 = arith.constant 0 : index
    %396 = vector.load %arg5[%c0_119, %c0_120] : memref<128x128xbf16, #tpu.memory_space<vmem>>, vector<128x128xbf16>
    %cst_121 = arith.constant dense<0.000000e+00> : vector<1x128xf32>
    %397 = tpu.matmul %395, %396, %cst_121 {dimension_numbers = #tpu.dot_dimension_numbers<[1], [0], [0], [1], [0, 0, 1, 1], [], []>} : vector<1x128xbf16>, vector<128x128xbf16>, vector<1x128xf32> -> vector<1x128xf32>
    %c0_122 = arith.constant 0 : index
    %c0_123 = arith.constant 0 : index
    %398 = vector.load %arg7[%c0_122, %c0_123] : memref<1x128xf32, #tpu.memory_space<vmem>>, vector<1x128xf32>
    %399 = arith.addf %397, %398 : vector<1x128xf32>
    %400 = arith.addf %394, %399 : vector<1x128xf32>
    %401 = arith.negf %400 : vector<1x128xf32>
    %402 = math.exp %401 : vector<1x128xf32>
    %cst_124 = arith.constant 1.000000e+00 : f32
    %403 = vector.broadcast %cst_124 : f32 to vector<1x128xf32>
    %404 = arith.addf %403, %402 : vector<1x128xf32>
    %405 = arith.divf %403, %404 : vector<1x128xf32>
    %406 = vector.extract_strided_slice %405 {offsets = [0, 0], sizes = [1, 8], strides = [1, 1]} : vector<1x128xf32> to vector<1x8xf32>
    %407 = vector.extract_strided_slice %405 {offsets = [0, 8], sizes = [1, 8], strides = [1, 1]} : vector<1x128xf32> to vector<1x8xf32>
    %408 = vector.extract_strided_slice %394 {offsets = [0, 16], sizes = [1, 8], strides = [1, 1]} : vector<1x128xf32> to vector<1x8xf32>
    %409 = vector.extract_strided_slice %399 {offsets = [0, 16], sizes = [1, 8], strides = [1, 1]} : vector<1x128xf32> to vector<1x8xf32>
    %410 = arith.mulf %406, %409 : vector<1x8xf32>
    %411 = arith.addf %408, %410 : vector<1x8xf32>
    %412 = math.tanh %411 : vector<1x8xf32>
    %cst_125 = arith.constant 1.000000e+00 : f32
    %413 = vector.broadcast %cst_125 : f32 to vector<1x8xf32>
    %414 = arith.subf %413, %407 : vector<1x8xf32>
    %415 = arith.mulf %414, %412 : vector<1x8xf32>
    %416 = vector.extract_strided_slice %393 {offsets = [0, 0], sizes = [1, 8], strides = [1, 1]} : vector<1x128xf32> to vector<1x8xf32>
    %417 = arith.mulf %407, %416 : vector<1x8xf32>
    %418 = arith.addf %415, %417 : vector<1x8xf32>
    %419 = tpu.concatenate %418, %106 in 1 : vector<1x8xf32>, vector<1x120xf32> -> vector<1x128xf32>
    %420 = vector.extract_strided_slice %105 {offsets = [12, 0], sizes = [1, 128], strides = [1, 1]} : vector<16x128xf32> to vector<1x128xf32>
    %421 = arith.truncf %419 : vector<1x128xf32> to vector<1x128xbf16>
    %c0_126 = arith.constant 0 : index
    %c0_127 = arith.constant 0 : index
    %422 = vector.load %arg5[%c0_126, %c0_127] : memref<128x128xbf16, #tpu.memory_space<vmem>>, vector<128x128xbf16>
    %cst_128 = arith.constant dense<0.000000e+00> : vector<1x128xf32>
    %423 = tpu.matmul %421, %422, %cst_128 {dimension_numbers = #tpu.dot_dimension_numbers<[1], [0], [0], [1], [0, 0, 1, 1], [], []>} : vector<1x128xbf16>, vector<128x128xbf16>, vector<1x128xf32> -> vector<1x128xf32>
    %c0_129 = arith.constant 0 : index
    %c0_130 = arith.constant 0 : index
    %424 = vector.load %arg7[%c0_129, %c0_130] : memref<1x128xf32, #tpu.memory_space<vmem>>, vector<1x128xf32>
    %425 = arith.addf %423, %424 : vector<1x128xf32>
    %426 = arith.addf %420, %425 : vector<1x128xf32>
    %427 = arith.negf %426 : vector<1x128xf32>
    %428 = math.exp %427 : vector<1x128xf32>
    %cst_131 = arith.constant 1.000000e+00 : f32
    %429 = vector.broadcast %cst_131 : f32 to vector<1x128xf32>
    %430 = arith.addf %429, %428 : vector<1x128xf32>
    %431 = arith.divf %429, %430 : vector<1x128xf32>
    %432 = vector.extract_strided_slice %431 {offsets = [0, 0], sizes = [1, 8], strides = [1, 1]} : vector<1x128xf32> to vector<1x8xf32>
    %433 = vector.extract_strided_slice %431 {offsets = [0, 8], sizes = [1, 8], strides = [1, 1]} : vector<1x128xf32> to vector<1x8xf32>
    %434 = vector.extract_strided_slice %420 {offsets = [0, 16], sizes = [1, 8], strides = [1, 1]} : vector<1x128xf32> to vector<1x8xf32>
    %435 = vector.extract_strided_slice %425 {offsets = [0, 16], sizes = [1, 8], strides = [1, 1]} : vector<1x128xf32> to vector<1x8xf32>
    %436 = arith.mulf %432, %435 : vector<1x8xf32>
    %437 = arith.addf %434, %436 : vector<1x8xf32>
    %438 = math.tanh %437 : vector<1x8xf32>
    %cst_132 = arith.constant 1.000000e+00 : f32
    %439 = vector.broadcast %cst_132 : f32 to vector<1x8xf32>
    %440 = arith.subf %439, %433 : vector<1x8xf32>
    %441 = arith.mulf %440, %438 : vector<1x8xf32>
    %442 = vector.extract_strided_slice %419 {offsets = [0, 0], sizes = [1, 8], strides = [1, 1]} : vector<1x128xf32> to vector<1x8xf32>
    %443 = arith.mulf %433, %442 : vector<1x8xf32>
    %444 = arith.addf %441, %443 : vector<1x8xf32>
    %445 = tpu.concatenate %444, %106 in 1 : vector<1x8xf32>, vector<1x120xf32> -> vector<1x128xf32>
    %446 = vector.extract_strided_slice %105 {offsets = [13, 0], sizes = [1, 128], strides = [1, 1]} : vector<16x128xf32> to vector<1x128xf32>
    %447 = arith.truncf %445 : vector<1x128xf32> to vector<1x128xbf16>
    %c0_133 = arith.constant 0 : index
    %c0_134 = arith.constant 0 : index
    %448 = vector.load %arg5[%c0_133, %c0_134] : memref<128x128xbf16, #tpu.memory_space<vmem>>, vector<128x128xbf16>
    %cst_135 = arith.constant dense<0.000000e+00> : vector<1x128xf32>
    %449 = tpu.matmul %447, %448, %cst_135 {dimension_numbers = #tpu.dot_dimension_numbers<[1], [0], [0], [1], [0, 0, 1, 1], [], []>} : vector<1x128xbf16>, vector<128x128xbf16>, vector<1x128xf32> -> vector<1x128xf32>
    %c0_136 = arith.constant 0 : index
    %c0_137 = arith.constant 0 : index
    %450 = vector.load %arg7[%c0_136, %c0_137] : memref<1x128xf32, #tpu.memory_space<vmem>>, vector<1x128xf32>
    %451 = arith.addf %449, %450 : vector<1x128xf32>
    %452 = arith.addf %446, %451 : vector<1x128xf32>
    %453 = arith.negf %452 : vector<1x128xf32>
    %454 = math.exp %453 : vector<1x128xf32>
    %cst_138 = arith.constant 1.000000e+00 : f32
    %455 = vector.broadcast %cst_138 : f32 to vector<1x128xf32>
    %456 = arith.addf %455, %454 : vector<1x128xf32>
    %457 = arith.divf %455, %456 : vector<1x128xf32>
    %458 = vector.extract_strided_slice %457 {offsets = [0, 0], sizes = [1, 8], strides = [1, 1]} : vector<1x128xf32> to vector<1x8xf32>
    %459 = vector.extract_strided_slice %457 {offsets = [0, 8], sizes = [1, 8], strides = [1, 1]} : vector<1x128xf32> to vector<1x8xf32>
    %460 = vector.extract_strided_slice %446 {offsets = [0, 16], sizes = [1, 8], strides = [1, 1]} : vector<1x128xf32> to vector<1x8xf32>
    %461 = vector.extract_strided_slice %451 {offsets = [0, 16], sizes = [1, 8], strides = [1, 1]} : vector<1x128xf32> to vector<1x8xf32>
    %462 = arith.mulf %458, %461 : vector<1x8xf32>
    %463 = arith.addf %460, %462 : vector<1x8xf32>
    %464 = math.tanh %463 : vector<1x8xf32>
    %cst_139 = arith.constant 1.000000e+00 : f32
    %465 = vector.broadcast %cst_139 : f32 to vector<1x8xf32>
    %466 = arith.subf %465, %459 : vector<1x8xf32>
    %467 = arith.mulf %466, %464 : vector<1x8xf32>
    %468 = vector.extract_strided_slice %445 {offsets = [0, 0], sizes = [1, 8], strides = [1, 1]} : vector<1x128xf32> to vector<1x8xf32>
    %469 = arith.mulf %459, %468 : vector<1x8xf32>
    %470 = arith.addf %467, %469 : vector<1x8xf32>
    %471 = tpu.concatenate %470, %106 in 1 : vector<1x8xf32>, vector<1x120xf32> -> vector<1x128xf32>
    %472 = vector.extract_strided_slice %105 {offsets = [14, 0], sizes = [1, 128], strides = [1, 1]} : vector<16x128xf32> to vector<1x128xf32>
    %473 = arith.truncf %471 : vector<1x128xf32> to vector<1x128xbf16>
    %c0_140 = arith.constant 0 : index
    %c0_141 = arith.constant 0 : index
    %474 = vector.load %arg5[%c0_140, %c0_141] : memref<128x128xbf16, #tpu.memory_space<vmem>>, vector<128x128xbf16>
    %cst_142 = arith.constant dense<0.000000e+00> : vector<1x128xf32>
    %475 = tpu.matmul %473, %474, %cst_142 {dimension_numbers = #tpu.dot_dimension_numbers<[1], [0], [0], [1], [0, 0, 1, 1], [], []>} : vector<1x128xbf16>, vector<128x128xbf16>, vector<1x128xf32> -> vector<1x128xf32>
    %c0_143 = arith.constant 0 : index
    %c0_144 = arith.constant 0 : index
    %476 = vector.load %arg7[%c0_143, %c0_144] : memref<1x128xf32, #tpu.memory_space<vmem>>, vector<1x128xf32>
    %477 = arith.addf %475, %476 : vector<1x128xf32>
    %478 = arith.addf %472, %477 : vector<1x128xf32>
    %479 = arith.negf %478 : vector<1x128xf32>
    %480 = math.exp %479 : vector<1x128xf32>
    %cst_145 = arith.constant 1.000000e+00 : f32
    %481 = vector.broadcast %cst_145 : f32 to vector<1x128xf32>
    %482 = arith.addf %481, %480 : vector<1x128xf32>
    %483 = arith.divf %481, %482 : vector<1x128xf32>
    %484 = vector.extract_strided_slice %483 {offsets = [0, 0], sizes = [1, 8], strides = [1, 1]} : vector<1x128xf32> to vector<1x8xf32>
    %485 = vector.extract_strided_slice %483 {offsets = [0, 8], sizes = [1, 8], strides = [1, 1]} : vector<1x128xf32> to vector<1x8xf32>
    %486 = vector.extract_strided_slice %472 {offsets = [0, 16], sizes = [1, 8], strides = [1, 1]} : vector<1x128xf32> to vector<1x8xf32>
    %487 = vector.extract_strided_slice %477 {offsets = [0, 16], sizes = [1, 8], strides = [1, 1]} : vector<1x128xf32> to vector<1x8xf32>
    %488 = arith.mulf %484, %487 : vector<1x8xf32>
    %489 = arith.addf %486, %488 : vector<1x8xf32>
    %490 = math.tanh %489 : vector<1x8xf32>
    %cst_146 = arith.constant 1.000000e+00 : f32
    %491 = vector.broadcast %cst_146 : f32 to vector<1x8xf32>
    %492 = arith.subf %491, %485 : vector<1x8xf32>
    %493 = arith.mulf %492, %490 : vector<1x8xf32>
    %494 = vector.extract_strided_slice %471 {offsets = [0, 0], sizes = [1, 8], strides = [1, 1]} : vector<1x128xf32> to vector<1x8xf32>
    %495 = arith.mulf %485, %494 : vector<1x8xf32>
    %496 = arith.addf %493, %495 : vector<1x8xf32>
    %497 = tpu.concatenate %496, %106 in 1 : vector<1x8xf32>, vector<1x120xf32> -> vector<1x128xf32>
    %498 = vector.extract_strided_slice %105 {offsets = [15, 0], sizes = [1, 128], strides = [1, 1]} : vector<16x128xf32> to vector<1x128xf32>
    %499 = arith.truncf %497 : vector<1x128xf32> to vector<1x128xbf16>
    %c0_147 = arith.constant 0 : index
    %c0_148 = arith.constant 0 : index
    %500 = vector.load %arg5[%c0_147, %c0_148] : memref<128x128xbf16, #tpu.memory_space<vmem>>, vector<128x128xbf16>
    %cst_149 = arith.constant dense<0.000000e+00> : vector<1x128xf32>
    %501 = tpu.matmul %499, %500, %cst_149 {dimension_numbers = #tpu.dot_dimension_numbers<[1], [0], [0], [1], [0, 0, 1, 1], [], []>} : vector<1x128xbf16>, vector<128x128xbf16>, vector<1x128xf32> -> vector<1x128xf32>
    %c0_150 = arith.constant 0 : index
    %c0_151 = arith.constant 0 : index
    %502 = vector.load %arg7[%c0_150, %c0_151] : memref<1x128xf32, #tpu.memory_space<vmem>>, vector<1x128xf32>
    %503 = arith.addf %501, %502 : vector<1x128xf32>
    %504 = arith.addf %498, %503 : vector<1x128xf32>
    %505 = arith.negf %504 : vector<1x128xf32>
    %506 = math.exp %505 : vector<1x128xf32>
    %cst_152 = arith.constant 1.000000e+00 : f32
    %507 = vector.broadcast %cst_152 : f32 to vector<1x128xf32>
    %508 = arith.addf %507, %506 : vector<1x128xf32>
    %509 = arith.divf %507, %508 : vector<1x128xf32>
    %510 = vector.extract_strided_slice %509 {offsets = [0, 0], sizes = [1, 8], strides = [1, 1]} : vector<1x128xf32> to vector<1x8xf32>
    %511 = vector.extract_strided_slice %509 {offsets = [0, 8], sizes = [1, 8], strides = [1, 1]} : vector<1x128xf32> to vector<1x8xf32>
    %512 = vector.extract_strided_slice %498 {offsets = [0, 16], sizes = [1, 8], strides = [1, 1]} : vector<1x128xf32> to vector<1x8xf32>
    %513 = vector.extract_strided_slice %503 {offsets = [0, 16], sizes = [1, 8], strides = [1, 1]} : vector<1x128xf32> to vector<1x8xf32>
    %514 = arith.mulf %510, %513 : vector<1x8xf32>
    %515 = arith.addf %512, %514 : vector<1x8xf32>
    %516 = math.tanh %515 : vector<1x8xf32>
    %cst_153 = arith.constant 1.000000e+00 : f32
    %517 = vector.broadcast %cst_153 : f32 to vector<1x8xf32>
    %518 = arith.subf %517, %511 : vector<1x8xf32>
    %519 = arith.mulf %518, %516 : vector<1x8xf32>
    %520 = vector.extract_strided_slice %497 {offsets = [0, 0], sizes = [1, 8], strides = [1, 1]} : vector<1x128xf32> to vector<1x8xf32>
    %521 = arith.mulf %511, %520 : vector<1x8xf32>
    %522 = arith.addf %519, %521 : vector<1x8xf32>
    %523 = tpu.concatenate %522, %106 in 1 : vector<1x8xf32>, vector<1x120xf32> -> vector<1x128xf32>
    %524 = tpu.concatenate %133, %159, %185, %211, %237, %263, %289, %315, %341, %367, %393, %419, %445, %471, %497, %523 in 0 : vector<1x128xf32>, vector<1x128xf32>, vector<1x128xf32>, vector<1x128xf32>, vector<1x128xf32>, vector<1x128xf32>, vector<1x128xf32>, vector<1x128xf32>, vector<1x128xf32>, vector<1x128xf32>, vector<1x128xf32>, vector<1x128xf32>, vector<1x128xf32>, vector<1x128xf32>, vector<1x128xf32>, vector<1x128xf32> -> vector<16x128xf32>
    %c0_154 = arith.constant 0 : index
    %c0_155 = arith.constant 0 : index
    %525 = vector.load %arg11[%c0_154, %c0_155] : memref<16x128xf32, #tpu.memory_space<vmem>>, vector<16x128xf32>
    tpu.vector_store %arg11[%c0_154, %c0_155], %524 {strides = array<i32>} : memref<16x128xf32, #tpu.memory_space<vmem>>, vector<16x128xf32>,
    %c-1640531535_i32_156 = arith.constant -1640531535 : i32
    %526 = vector.broadcast %c-1640531535_i32_156 : i32 to vector<16x128xi32>
    %527 = arith.muli %47, %526 : vector<16x128xi32>
    %c-626614964_i32 = arith.constant -626614964 : i32
    %528 = vector.broadcast %c-626614964_i32 : i32 to vector<16x128xi32>
    %529 = arith.addi %527, %528 : vector<16x128xi32>
    %c16_i32_157 = arith.constant 16 : i32
    %530 = vector.broadcast %c16_i32_157 : i32 to vector<16x128xi32>
    %531 = arith.shrsi %529, %530 : vector<16x128xi32>
    %c65535_i32_158 = arith.constant 65535 : i32
    %532 = vector.broadcast %c65535_i32_158 : i32 to vector<16x128xi32>
    %533 = arith.andi %531, %532 : vector<16x128xi32>
    %534 = arith.xori %529, %533 : vector<16x128xi32>
    %c-2048144789_i32_159 = arith.constant -2048144789 : i32
    %535 = vector.broadcast %c-2048144789_i32_159 : i32 to vector<16x128xi32>
    %536 = arith.muli %534, %535 : vector<16x128xi32>
    %c13_i32_160 = arith.constant 13 : i32
    %537 = vector.broadcast %c13_i32_160 : i32 to vector<16x128xi32>
    %538 = arith.shrsi %536, %537 : vector<16x128xi32>
    %c524287_i32_161 = arith.constant 524287 : i32
    %539 = vector.broadcast %c524287_i32_161 : i32 to vector<16x128xi32>
    %540 = arith.andi %538, %539 : vector<16x128xi32>
    %541 = arith.xori %536, %540 : vector<16x128xi32>
    %c-1028477387_i32_162 = arith.constant -1028477387 : i32
    %542 = vector.broadcast %c-1028477387_i32_162 : i32 to vector<16x128xi32>
    %543 = arith.muli %541, %542 : vector<16x128xi32>
    %c16_i32_163 = arith.constant 16 : i32
    %544 = vector.broadcast %c16_i32_163 : i32 to vector<16x128xi32>
    %545 = arith.shrsi %543, %544 : vector<16x128xi32>
    %c65535_i32_164 = arith.constant 65535 : i32
    %546 = vector.broadcast %c65535_i32_164 : i32 to vector<16x128xi32>
    %547 = arith.andi %545, %546 : vector<16x128xi32>
    %548 = arith.xori %543, %547 : vector<16x128xi32>
    %c8388607_i32_165 = arith.constant 8388607 : i32
    %549 = vector.broadcast %c8388607_i32_165 : i32 to vector<16x128xi32>
    %550 = arith.andi %548, %549 : vector<16x128xi32>
    %551 = arith.sitofp %550 : vector<16x128xi32> to vector<16x128xf32>
    %cst_166 = arith.constant 1.1920929E-7 : f32
    %552 = vector.broadcast %cst_166 : f32 to vector<16x128xf32>
    %553 = arith.mulf %551, %552 : vector<16x128xf32>
    %cst_167 = arith.constant dense<0.000000e+00> : vector<128xf32>
    %554 = vector.multi_reduction <add>, %553, %cst_167 [0] : vector<16x128xf32> to vector<128xf32>
    %555 = vector.shape_cast %554 : vector<128xf32> to vector<1x128xf32>
    %cst_168 = arith.constant 1.600000e+01 : f32
    %556 = vector.broadcast %cst_168 : f32 to vector<1x128xf32>
    %557 = arith.divf %555, %556 : vector<1x128xf32>
    %558 = vector.broadcast %557 : vector<1x128xf32> to vector<16x128xf32>
    %559 = arith.subf %553, %558 : vector<16x128xf32>
    %560 = arith.mulf %559, %559 : vector<16x128xf32>
    %cst_169 = arith.constant dense<0.000000e+00> : vector<128xf32>
    %561 = vector.multi_reduction <add>, %560, %cst_169 [0] : vector<16x128xf32> to vector<128xf32>
    %562 = vector.shape_cast %561 : vector<128xf32> to vector<1x128xf32>
    %cst_170 = arith.constant 1.600000e+01 : f32
    %563 = vector.broadcast %cst_170 : f32 to vector<1x128xf32>
    %564 = arith.divf %562, %563 : vector<1x128xf32>
    %c0_171 = arith.constant 0 : index
    %c0_172 = arith.constant 0 : index
    %565 = vector.load %arg8[%c0_171, %c0_172] : memref<1x128xf32, #tpu.memory_space<vmem>>, vector<1x128xf32>
    %566 = vector.broadcast %557 : vector<1x128xf32> to vector<16x128xf32>
    %567 = arith.subf %553, %566 : vector<16x128xf32>
    %568 = vector.broadcast %565 : vector<1x128xf32> to vector<16x128xf32>
    %569 = arith.mulf %568, %567 : vector<16x128xf32>
    %cst_173 = arith.constant 9.99999974E-6 : f32
    %570 = vector.broadcast %cst_173 : f32 to vector<1x128xf32>
    %571 = arith.addf %564, %570 : vector<1x128xf32>
    %572 = math.rsqrt %571 : vector<1x128xf32>
    %573 = vector.broadcast %572 : vector<1x128xf32> to vector<16x128xf32>
    %574 = arith.mulf %569, %573 : vector<16x128xf32>
    %c0_174 = arith.constant 0 : index
    %c0_175 = arith.constant 0 : index
    %575 = vector.load %arg9[%c0_174, %c0_175] : memref<1x128xf32, #tpu.memory_space<vmem>>, vector<1x128xf32>
    %576 = vector.broadcast %575 : vector<1x128xf32> to vector<16x128xf32>
    %577 = arith.addf %574, %576 : vector<16x128xf32>
    %c-1640531535_i32_176 = arith.constant -1640531535 : i32
    %578 = vector.broadcast %c-1640531535_i32_176 : i32 to vector<16x128xi32>
    %579 = arith.muli %47, %578 : vector<16x128xi32>
    %c2027820797_i32 = arith.constant 2027820797 : i32
    %580 = vector.broadcast %c2027820797_i32 : i32 to vector<16x128xi32>
    %581 = arith.addi %579, %580 : vector<16x128xi32>
    %c16_i32_177 = arith.constant 16 : i32
    %582 = vector.broadcast %c16_i32_177 : i32 to vector<16x128xi32>
    %583 = arith.shrsi %581, %582 : vector<16x128xi32>
    %c65535_i32_178 = arith.constant 65535 : i32
    %584 = vector.broadcast %c65535_i32_178 : i32 to vector<16x128xi32>
    %585 = arith.andi %583, %584 : vector<16x128xi32>
    %586 = arith.xori %581, %585 : vector<16x128xi32>
    %c-2048144789_i32_179 = arith.constant -2048144789 : i32
    %587 = vector.broadcast %c-2048144789_i32_179 : i32 to vector<16x128xi32>
    %588 = arith.muli %586, %587 : vector<16x128xi32>
    %c13_i32_180 = arith.constant 13 : i32
    %589 = vector.broadcast %c13_i32_180 : i32 to vector<16x128xi32>
    %590 = arith.shrsi %588, %589 : vector<16x128xi32>
    %c524287_i32_181 = arith.constant 524287 : i32
    %591 = vector.broadcast %c524287_i32_181 : i32 to vector<16x128xi32>
    %592 = arith.andi %590, %591 : vector<16x128xi32>
    %593 = arith.xori %588, %592 : vector<16x128xi32>
    %c-1028477387_i32_182 = arith.constant -1028477387 : i32
    %594 = vector.broadcast %c-1028477387_i32_182 : i32 to vector<16x128xi32>
    %595 = arith.muli %593, %594 : vector<16x128xi32>
    %c16_i32_183 = arith.constant 16 : i32
    %596 = vector.broadcast %c16_i32_183 : i32 to vector<16x128xi32>
    %597 = arith.shrsi %595, %596 : vector<16x128xi32>
    %c65535_i32_184 = arith.constant 65535 : i32
    %598 = vector.broadcast %c65535_i32_184 : i32 to vector<16x128xi32>
    %599 = arith.andi %597, %598 : vector<16x128xi32>
    %600 = arith.xori %595, %599 : vector<16x128xi32>
    %c8388607_i32_185 = arith.constant 8388607 : i32
    %601 = vector.broadcast %c8388607_i32_185 : i32 to vector<16x128xi32>
    %602 = arith.andi %600, %601 : vector<16x128xi32>
    %603 = arith.sitofp %602 : vector<16x128xi32> to vector<16x128xf32>
    %cst_186 = arith.constant 1.1920929E-7 : f32
    %604 = vector.broadcast %cst_186 : f32 to vector<16x128xf32>
    %605 = arith.mulf %603, %604 : vector<16x128xf32>
    %cst_187 = arith.constant 5.000000e-01 : f32
    %606 = vector.broadcast %cst_187 : f32 to vector<16x128xf32>
    %607 = arith.cmpf oge, %605, %606 : vector<16x128xf32>
    %cst_188 = arith.constant 2.000000e+00 : f32
    %608 = vector.broadcast %cst_188 : f32 to vector<16x128xf32>
    %609 = arith.mulf %577, %608 : vector<16x128xf32>
    %cst_189 = arith.constant 0.000000e+00 : f32
    %610 = vector.broadcast %cst_189 : f32 to vector<16x128xf32>
    %611 = arith.select %607, %609, %610 : vector<16x128xi1>, vector<16x128xf32>
    %c0_190 = arith.constant 0 : index
    %c0_191 = arith.constant 0 : index
    %612 = vector.load %arg12[%c0_190, %c0_191] : memref<16x128xf32, #tpu.memory_space<vmem>>, vector<16x128xf32>
    tpu.vector_store %arg12[%c0_190, %c0_191], %611 {strides = array<i32>} : memref<16x128xf32, #tpu.memory_space<vmem>>, vector<16x128xf32>,
    return
  }
}

</mosaic_0001>

<bundles_post_ra>
// kernel: model_forward.1
= control target key start
LH: loop header
LB: loop body
LE: loop exit
PB: predicated region body
PF: predicated region fallthrough
CT: control target
= control target key end

     0   :  { %18 = vsyncpa [#allocation3], 0  ;;  %v2727_v1 = vmov 0.0   ;;  %vm2728_vm0 = vmmov 0   ;;  %v198_v4 = vlaneseq  ;;  %s3511_s0 = inlined_call_operand.vmem [shape: s32[16,128], index: 0, kind: input, shape index: {}]   ;;  %s3512_s1 = inlined_call_operand.vmem [shape: f32[16,128], index: 1, kind: input, shape index: {}]   ;;  %s3513_s2 = inlined_call_operand.vmem [shape: bf16[128,128], index: 2, kind: input, shape index: {}]   ;;  %s3514_s3 = inlined_call_operand.vmem [shape: f32[1,128], index: 3, kind: input, shape index: {}]   ;;  %s3515_s4 = inlined_call_operand.vmem [shape: bf16[128,128], index: 4, kind: input, shape index: {}]   ;;  %s3516_s5 = inlined_call_operand.vmem [shape: bf16[128,128], index: 5, kind: input, shape index: {}]   ;;  %s3517_s6 = inlined_call_operand.vmem [shape: f32[1,128], index: 6, kind: input, shape index: {}]   ;;  %s3518_s7 = inlined_call_operand.vmem [shape: f32[1,128], index: 7, kind: input, shape index: {}]   ;;  %s3519_s8 = inlined_call_operand.vmem [shape: f32[1,128], index: 8, kind: input, shape index: {}]   ;;  %s3520_s9 = inlined_call_operand.vmem [shape: f32[1,128], index: 9, kind: input, shape index: {}]   ;;  %s3521_s10 = inlined_call_operand.hbm [shape: f32[16,128], index: 10, kind: output, shape index: {0}]   ;;  %s3522_s11 = inlined_call_operand.vmem [shape: f32[16,128], index: 11, kind: output, shape index: {1}]   ;;  %s3523_s12 = inlined_call_operand.hbm [shape: f32[16,128], index: 12, kind: output, shape index: {2}]  }
   0x1   :  { %v2546_v0 = vld [vmem:[%s3513_s2] sm:$0xff]   ;;  %2176 = vmatprep.subr.bf16.mxu0 %v2727_v1  ;;  %2196 = vmatprep.subr.bf16.mxu1 %v2727_v1  ;;  %v2547_v2 = vld [vmem:[%s3513_s2 + $0x8] sm:$0xff]   ;;  %v2548_v3 = vld [vmem:[%s3513_s2 + $0x10] sm:$0xff]  }
   0x2   :  { %2177 = vmatpush3.bf16.msra.mxu0 %v2546_v0  ;;  %2192 = vmatprep.mubr.msk.bf16.mxu0 %vm2728_vm0, %v2727_v1  ;;  %v41_v5 = vld [vmem:[%s3511_s0] sm:$0xff]  ;;  %v42_v6 = vld [vmem:[%s3511_s0 + $0x8] sm:$0xff]  ;;  %v2549_v9 = vld [vmem:[%s3513_s2 + $0x18] sm:$0xff]   ;;  %v199_v10 = vshrl.u32 %v198_v4, 7  ;;  %v202_v19 = vand.u32 127, %v198_v4 }
   0x3   :  { %2178 = vmatprep.subr.bf16.mxu0 %v2727_v1  ;;  %2212 = vmatprep.mubr.msk.bf16.mxu1 %vm2728_vm0, %v2727_v1  ;;  %v43_v7 = vmul.u32 2654435761, %v41_v5  ;;  %v44_v8 = vmul.u32 2654435761, %v42_v6  ;;  %v2550_v13 = vld [vmem:[%s3513_s2 + $0x20] sm:$0xff]   ;;  %v2551_v22 = vld [vmem:[%s3513_s2 + $0x28] sm:$0xff]  }
   0x4   :  { %v200_v18 = vadd.s32 8, %v199_v10  ;;  %v203_v23 = vmul.u32 128, %v199_v10  ;;  %v2561_v26 = vld [vmem:[%s3515_s4] sm:$0xff]   ;;  %v2563_v30 = vld [vmem:[%s3515_s4 + $0x8] sm:$0xff]   ;;  %v2552_v31 = vld [vmem:[%s3513_s2 + $0x30] sm:$0xff]  }
   0x5   :  { %v45_v11 = vadd.s32 2654448106, %v43_v7  ;;  %v46_v12 = vadd.s32 2654448106, %v44_v8  ;;  %2197 = vmatpush3.bf16.msra.mxu1 %v2561_v26  ;;  %v77_v34 = vld [vmem:[%s3512_s1] sm:$0xff]  ;;  %v2553_v36 = vld [vmem:[%s3513_s2 + $0x38] sm:$0xff]  }
   0x6   :  { %2179 = vmatpush3.bf16.msra.mxu0 %v2547_v2  ;;  %v204_v27 = vmul.u32 128, %v200_v18  ;;  %2198 = vmatprep.subr.bf16.mxu1 %v2727_v1  ;;  %v205_v35 = vadd.s32 %v203_v23, %v202_v19  ;;  %v78_v40 = vld [vmem:[%s3512_s1 + $0x8] sm:$0xff]  ;;  %v2564_v41 = vld [vmem:[%s3515_s4 + $0x10] sm:$0xff]   ;;  %v79_v45 = vmul.f32 2.0, %v77_v34  ;;  %v2565_v47 = vld [vmem:[%s3515_s4 + $0x18] sm:$0xff]  }
   0x7   :  { %2180 = vmatprep.subr.bf16.mxu0 %v2727_v1  ;;  %v1935_v14 = vshrl.u32 %v45_v11, 16  ;;  %v1936_v15 = vshrl.u32 %v46_v12, 16  ;;  %v80_v46 = vmul.f32 2.0, %v78_v40 }
   0x8   :  { %v206_v37 = vadd.s32 %v204_v27, %v202_v19  ;;  %v2862_v44 = vmul.u32 2654435761, %v205_v35 }
   0x9   :  { %v51_v16 = vxor.u32 %v1935_v14, %v45_v11  ;;  %v52_v17 = vxor.u32 %v1936_v15, %v46_v12  ;;  %2199 = vmatpush3.bf16.msra.mxu1 %v2563_v30 }
   0xa   :  { %2181 = vmatpush3.bf16.msra.mxu0 %v2548_v3  ;;  %2200 = vmatprep.subr.bf16.mxu1 %v2727_v1  ;;  %v2867_v48 = vmul.u32 2654435761, %v206_v37  ;;  %v209_v51 = vadd.s32 1013916571, %v2862_v44 }
   0xb   :  { %2182 = vmatprep.subr.bf16.mxu0 %v2727_v1  ;;  %v53_v20 = vmul.u32 2246822507, %v51_v16  ;;  %v54_v21 = vmul.u32 2246822507, %v52_v17 }
   0xc   :  { %v210_v52 = vadd.s32 1013916571, %v2867_v48 }
   0xd   :  { %v1937_v24 = vshrl.u32 %v53_v20, 13  ;;  %v1938_v25 = vshrl.u32 %v54_v21, 13  ;;  %2201 = vmatpush3.bf16.msra.mxu1 %v2564_v41 }
   0xe   :  { %2183 = vmatpush3.bf16.msra.mxu0 %v2549_v9  ;;  %2202 = vmatprep.subr.bf16.mxu1 %v2727_v1 }
   0xf   :  { %2184 = vmatprep.subr.bf16.mxu0 %v2727_v1  ;;  %v59_v28 = vxor.u32 %v1937_v24, %v53_v20  ;;  %v60_v29 = vxor.u32 %v1938_v25, %v54_v21 }
  0x11   :  { %v61_v32 = vmul.u32 3266489909, %v59_v28  ;;  %v62_v33 = vmul.u32 3266489909, %v60_v29 }
  0x12   :  { %2185 = vmatpush3.bf16.msra.mxu0 %v2550_v13 }
  0x13   :  { %2186 = vmatprep.subr.bf16.mxu0 %v2727_v1  ;;  %v1939_v38 = vshrl.u32 %v61_v32, 16  ;;  %v1940_v39 = vshrl.u32 %v62_v33, 16 }
  0x15   :  { %v67_v42 = vxor.u32 %v1939_v38, %v61_v32  ;;  %v68_v43 = vxor.u32 %v1940_v39, %v62_v33 }
  0x16   :  { %2187 = vmatpush3.bf16.msra.mxu0 %v2551_v22 }
  0x17   :  { %2188 = vmatprep.subr.bf16.mxu0 %v2727_v1  ;;  %v69_v49 = vand.u32 8388607, %v67_v42  ;;  %v70_v50 = vand.u32 8388607, %v68_v43 }
  0x1a   :  { %2189 = vmatpush3.bf16.msra.mxu0 %v2552_v31 }
  0x1b   :  { %2190 = vmatprep.subr.bf16.mxu0 %v2727_v1 }
  0x1e   :  { %2191 = vmatpush3.bf16.msra.mxu0 %v2553_v36 }
  0x1f   :  { %19 = vsyncpa [#allocation5], 0  ;;  %v71_v53 = vcvt.s32.f32 %v69_v49  ;;  %v72_v54 = vcvt.s32.f32 %v70_v50  ;;  %2216 = vmatprep.subr.bf16.mxu0 %v2727_v1  ;;  %v1953_v55 = vshrl.u32 %v209_v51, 16  ;;  %v1954_v56 = vshrl.u32 %v210_v52, 16  ;;  %2203 = vmatpush3.bf16.msra.mxu1 %v2565_v47  ;;  %v2566_v60 = vld [vmem:[%s3515_s4 + $0x20] sm:$0xff]   ;;  %v2567_v3 = vld [vmem:[%s3515_s4 + $0x28] sm:$0xff]  }
  0x20   :  { %v1951_v59 = vpack.c.bf16 %v80_v46, %v79_v45  ;;  %v2879_v62 = vld [vmem:[%s3516_s5] sm:$0xff]   ;;  %2204 = vmatprep.subr.bf16.mxu1 %v2727_v1  ;;  %v2889_v5 = vld [vmem:[%s3516_s5 + $0x8] sm:$0xff]   ;;  %v2568_v9 = vld [vmem:[%s3515_s4 + $0x30] sm:$0xff]   ;;  %v2729_v37 = vmov 0   ;;  %s2730_s23 = smov 112   ;;  %s2731_s25 = smov 16  }
  0x21   :  { %v73_v57 = vmul.f32 1.1920929e-07, %v71_v53  ;;  %v74_v58 = vmul.f32 1.1920929e-07, %v72_v54  ;;  %v215_v61 = vxor.u32 %v1953_v55, %v209_v51  ;;  %v216_v63 = vxor.u32 %v1954_v56, %v210_v52  ;;  %v2902_v11 = vld [vmem:[%s3516_s5 + $0x10] sm:$0xff]   ;;  %v2569_v15 = vld [vmem:[%s3515_s4 + $0x38] sm:$0xff]   ;;  %v2921_v22 = vld [vmem:[%s3516_s5 + $0x20] sm:$0xff]   ;;  %s2733_s26 = smov 8  }
  0x22   :  { %v2913_v17 = vld [vmem:[%s3516_s5 + $0x18] sm:$0xff]   ;;  %v2929_v26 = vld [vmem:[%s3516_s5 + $0x28] sm:$0xff]   ;;  %v2936_v29 = vld [vmem:[%s3516_s5 + $0x30] sm:$0xff]   ;;  %vm530_vm4 = vcmask 64512   ;;  %vm1766_vm6 = vcmask 1040384   ;;  %vm1768_vm7 = vcmask 1041408  }
  0x23   :  { %vm75_vm1 = vcmp.ge.f32.partialorder %v73_v57, 0.5  ;;  %vm76_vm2 = vcmp.ge.f32.partialorder %v74_v58, 0.5  ;;  %v217_v0 = vmul.u32 2246822507, %v215_v61  ;;  %v218_v2 = vmul.u32 2246822507, %v216_v63  ;;  %2205 = vmatpush3.bf16.msra.mxu1 %v2566_v60  ;;  %vm3014_vm5 = vmpackc.low %vm530_vm4, %vm530_vm4 }
  0x24   :  { %vm1950_vm3 = vmpackc.low %vm76_vm2, %vm75_vm1  ;;  %2206 = vmatprep.subr.bf16.mxu1 %v2727_v1  ;;  %v2943_v32 = vld [vmem:[%s3516_s5 + $0x38] sm:$0xff]   ;;  %v1959_v53 = vld [vmem:[%s3519_s8] ss:$0 sm:$0xff]  ;;  %vm1770_vm8 = vcmask 1042432   ;;  %vm1772_vm9 = vcmask 1043456   ;;  %vm1774_vm10 = vcmask 1044480  }
  0x25   :  { %2193 = vmatmul.mubr.msk.bf16.vlgmr.msra.gmra.mrb[0].mxu0 %vm1950_vm3, %v1951_v59  ;;  %v1955_v4 = vshrl.u32 %v217_v0, 13  ;;  %v1956_v6 = vshrl.u32 %v218_v2, 13  ;;  %v1960_v57 = vld [vmem:[%s3520_s9] ss:$0 sm:$0xff]  ;;  %vm1776_vm11 = vcmask 1045504   ;;  %vm1778_vm12 = vcmask 1046528  }
  0x26   :  { %2217 = vmatpush3.bf16.msra.mxu0 %v2879_v62  ;;  %2232 = vmatprep.mubr.msk.bf16.mxu0 %vm2728_vm0, %v2727_v1  ;;  %s2734_s24 = smov [#allocation2]  }
  0x27   :  { %2218 = vmatprep.subr.bf16.mxu0 %v2727_v1  ;;  %v223_v7 = vxor.u32 %v1955_v4, %v217_v0  ;;  %v224_v8 = vxor.u32 %v1956_v6, %v218_v2  ;;  %2207 = vmatpush3.bf16.msra.mxu1 %v2567_v3  ;;  %v1941_v0 = vld [vmem:[%s3514_s3] ss:$0 sm:$0xff] }
  0x28   :  { %2208 = vmatprep.subr.bf16.mxu1 %v2727_v1 }
  0x29   :  { %v225_v10 = vmul.u32 3266489909, %v223_v7  ;;  %v226_v12 = vmul.u32 3266489909, %v224_v8 }
  0x2a   :  { %2219 = vmatpush3.bf16.msra.mxu0 %v2889_v5 }
  0x2b   :  { %2220 = vmatprep.subr.bf16.mxu0 %v2727_v1  ;;  %v1957_v13 = vshrl.u32 %v225_v10, 16  ;;  %v1958_v14 = vshrl.u32 %v226_v12, 16  ;;  %2209 = vmatpush3.bf16.msra.mxu1 %v2568_v9  ;;  %v2996_v9 = vld [vmem:[%s3518_s7] sm:$0x1] }
  0x2c   :  { %2210 = vmatprep.subr.bf16.mxu1 %v2727_v1 }
  0x2d   :  { %v231_v16 = vxor.u32 %v1957_v13, %v225_v10  ;;  %v232_v18 = vxor.u32 %v1958_v14, %v226_v12 }
  0x2e   :  { %2221 = vmatpush3.bf16.msra.mxu0 %v2902_v11 }
  0x2f   :  { %2222 = vmatprep.subr.bf16.mxu0 %v2727_v1  ;;  %v233_v19 = vand.u32 8388607, %v231_v16  ;;  %v234_v20 = vand.u32 8388607, %v232_v18  ;;  %2211 = vmatpush3.bf16.msra.mxu1 %v2569_v15 }
  0x30   :  { %2236 = vmatprep.subr.bf16.mxu1 %v2727_v1 }
  0x31   :  { %v235_v21 = vcvt.s32.f32 %v233_v19  ;;  %v236_v23 = vcvt.s32.f32 %v234_v20  ;;  %v1961_v19 = vld [vmem:[%s3517_s6] ss:$0 sm:$0xff]  ;;  %s2732_s6 = smov 120  }
  0x32   :  { %2223 = vmatpush3.bf16.msra.mxu0 %v2913_v17 }
  0x33   :  { %2224 = vmatprep.subr.bf16.mxu0 %v2727_v1  ;;  %v237_v24 = vmul.f32 1.1920929e-07, %v235_v21  ;;  %v238_v25 = vmul.f32 1.1920929e-07, %v236_v23 }
  0x35   :  { %v239_v27 = vadd.f32 %v238_v25, %v237_v24 }
  0x36   :  { %2225 = vmatpush3.bf16.msra.mxu0 %v2921_v22 }
  0x37   :  { %2226 = vmatprep.subr.bf16.mxu0 %v2727_v1  ;;  %v240_v28 = vrot.slane %v239_v27, 4 }
  0x39   :  { %v241_v30 = vadd.f32 %v240_v28, %v239_v27 }
  0x3a   :  { %2227 = vmatpush3.bf16.msra.mxu0 %v2929_v26 }
  0x3b   :  { %2228 = vmatprep.subr.bf16.mxu0 %v2727_v1  ;;  %v242_v31 = vrot.slane %v241_v30, 2 }
  0x3d   :  { %v243_v33 = vadd.f32 %v242_v31, %v241_v30 }
  0x3e   :  { %2229 = vmatpush3.bf16.msra.mxu0 %v2936_v29 }
  0x3f   :  { %2230 = vmatprep.subr.bf16.mxu0 %v2727_v1  ;;  %v244_v34 = vrot.slane %v243_v33, 1 }
  0x41   :  { %v245_v35 = vadd.f32 %v244_v34, %v243_v33 }
  0x42   :  { %2231 = vmatpush3.bf16.msra.mxu0 %v2943_v32 }
  0x43   :  { %2256 = vmatprep.subr.bf16.mxu0 %v2727_v1  ;;  %v247_v36 = vmul.f32 0.0625, %v245_v35 }
  0x45   :  { %2233 = vmatmul.mubr.bf16.vlgmr.msra.gmra.mrb[4].mxu0 %v2729_v37  ;;  %v248_v38 = vsub.f32 %v237_v24, %v247_v36  ;;  %v249_v39 = vsub.f32 %v238_v25, %v247_v36 }
  0x46   :  { %2257 = vmatpush3.bf16.msra.mxu0 %v2879_v62  ;;  %2272 = vmatprep.mubr.msk.bf16.mxu0 %vm2728_vm0, %v2727_v1 }
  0x47   :  { %2258 = vmatprep.subr.bf16.mxu0 %v2727_v1  ;;  %v250_v40 = vmul.f32 %v248_v38, %v248_v38  ;;  %v251_v41 = vmul.f32 %v249_v39, %v249_v39  ;;  %v267_v54 = vmul.f32 %v1959_v53, %v248_v38  ;;  %v268_v55 = vmul.f32 %v1959_v53, %v249_v39 }
  0x49   :  { %v252_v42 = vadd.f32 %v251_v41, %v250_v40 }
  0x4a   :  { %2259 = vmatpush3.bf16.msra.mxu0 %v2889_v5 }
  0x4b   :  { %2260 = vmatprep.subr.bf16.mxu0 %v2727_v1  ;;  %v253_v43 = vrot.slane %v252_v42, 4 }
  0x4d   :  { %v254_v45 = vadd.f32 %v253_v43, %v252_v42 }
  0x4e   :  { %2261 = vmatpush3.bf16.msra.mxu0 %v2902_v11 }
  0x4f   :  { %2262 = vmatprep.subr.bf16.mxu0 %v2727_v1  ;;  %v255_v46 = vrot.slane %v254_v45, 2 }
  0x51   :  { %v256_v47 = vadd.f32 %v255_v46, %v254_v45 }
  0x52   :  { %2263 = vmatpush3.bf16.msra.mxu0 %v2913_v17 }
  0x53   :  { %2264 = vmatprep.subr.bf16.mxu0 %v2727_v1  ;;  %v257_v49 = vrot.slane %v256_v47, 1 }
  0x55   :  { %v258_v50 = vadd.f32 %v257_v49, %v256_v47 }
  0x56   :  { %2265 = vmatpush3.bf16.msra.mxu0 %v2921_v22 }
  0x57   :  { %2266 = vmatprep.subr.bf16.mxu0 %v2727_v1  ;;  %v259_v51 = vmul.f32 0.0625, %v258_v50 }
  0x59   :  { %v269_v52 = vadd.f32 1e-05, %v259_v51 }
  0x5a   :  { %2267 = vmatpush3.bf16.msra.mxu0 %v2929_v26 }
  0x5b   :  { %2268 = vmatprep.subr.bf16.mxu0 %v2727_v1  ;;  %2570 = vrsqrt.f32 %v269_v52 }
  0x5e   :  { %2269 = vmatpush3.bf16.msra.mxu0 %v2936_v29 }
  0x5f   :  { %2270 = vmatprep.subr.bf16.mxu0 %v2727_v1 }
  0x62   :  { %2271 = vmatpush3.bf16.msra.mxu0 %v2943_v32 }
  0x63   :  { %2296 = vmatprep.subr.bf16.mxu0 %v2727_v1 }
  0x65   :  { %v2571_v56 = vpop.eup %2570 }
  0x66   :  { %v271_v58 = vmul.f32 %v2571_v56, %v267_v54  ;;  %v272_v59 = vmul.f32 %v2571_v56, %v268_v55 }
  0x68   :  { %v280_v60 = vadd.f32 %v1960_v57, %v271_v58  ;;  %v281_v61 = vadd.f32 %v1960_v57, %v272_v59 }
  0x6a   :  { %v282_v63 = vpack.c.bf16 %v281_v61, %v280_v60 }
  0x6c   :  { %2213 = vmatmul.mubr.bf16.vlgmr.msra.gmra.mrb[0].mxu1 %v282_v63 }
  0x6d   :  { %2237 = vmatpush3.bf16.msra.mxu1 %v2879_v62  ;;  %2252 = vmatprep.mubr.msk.bf16.mxu1 %vm2728_vm0, %v2727_v1 }
  0x6e   :  { %2238 = vmatprep.subr.bf16.mxu1 %v2727_v1 }
  0x71   :  { %2239 = vmatpush3.bf16.msra.mxu1 %v2889_v5 }
  0x72   :  { %2240 = vmatprep.subr.bf16.mxu1 %v2727_v1 }
  0x75   :  { %2241 = vmatpush3.bf16.msra.mxu1 %v2902_v11 }
  0x76   :  { %2242 = vmatprep.subr.bf16.mxu1 %v2727_v1 }
  0x79   :  { %2243 = vmatpush3.bf16.msra.mxu1 %v2913_v17 }
  0x7a   :  { %2244 = vmatprep.subr.bf16.mxu1 %v2727_v1 }
  0x7d   :  { %2245 = vmatpush3.bf16.msra.mxu1 %v2921_v22 }
  0x7e   :  { %2246 = vmatprep.subr.bf16.mxu1 %v2727_v1 }
  0x81   :  { %2247 = vmatpush3.bf16.msra.mxu1 %v2929_v26 }
  0x82   :  { %2248 = vmatprep.subr.bf16.mxu1 %v2727_v1 }
  0x85   :  { %2249 = vmatpush3.bf16.msra.mxu1 %v2936_v29 }
  0x86   :  { %2250 = vmatprep.subr.bf16.mxu1 %v2727_v1 }
  0x89   :  { %2251 = vmatpush3.bf16.msra.mxu1 %v2943_v32 }
  0x8a   :  { %2276 = vmatprep.subr.bf16.mxu1 %v2727_v1 }
  0xf8   :  { %v189_v2 = vpop.f32.mrb[0].mxu0 }
  0xf9   :  { %v190_v3 = vadd.f32 %v1941_v0, %v189_v2  ;;  %v2194_v4 = vpop.f32.mrb[1].mxu0 }
  0xfa   :  { %v192_v6 = vpop.f32.mrb[2].mxu0 }
  0xfb   :  { %196 = vst [vmem:[#allocation2] sm:$0xff] %v190_v3  ;;  %v193_v7 = vadd.f32 %v1941_v0, %v192_v6  ;;  %v2195_v8 = vpop.f32.mrb[3].mxu0 }
  0xfd   :  { %197 = vst [vmem:[#allocation2 + $0x8] sm:$0xff] %v193_v7 }
 0x118   :  { %v494_v10 = vpop.f32.mrb[4].mxu0 }
 0x119   :  { %v495_v12 = vadd.f32 %v494_v10, %v2996_v9  ;;  %v2234_v13 = vpop.f32.mrb[5].mxu0 }
 0x11a   :  { %v497_v14 = vpop.f32.mrb[6].mxu0 }
 0x11b   :  { %508 = vrot.lane.b32.xlu0 %v495_v12, %s2730_s23  ;;  %v2235_v15 = vpop.f32.mrb[7].mxu0 }
 0x13f   :  { %v388_v16 = vpop.f32.mrb[0].mxu1 }
 0x140   :  { %v2214_v18 = vpop.f32.mrb[1].mxu1  ;;  %v3005_v24 = vadd.f32 %v1961_v19, %v388_v16 }
 0x141   :  { %v391_v20 = vpop.f32.mrb[2].mxu1 }
 0x142   :  { %v3003_v21 = vadd.f32 %v1961_v19, %v391_v20  ;;  %v2215_v23 = vpop.f32.mrb[3].mxu1  ;;  %v500_v25 = vadd.f32 %v495_v12, %v3005_v24 }
 0x144   :  { %v1978_v27 = vmul.f32 -1.442695, %v500_v25 }
 0x146   :  { %2572 = vpow2.f32 %v1978_v27 }
 0x150   :  { %v2573_v28 = vpop.eup %2572 }
 0x151   :  { %v504_v30 = vadd.f32 1.0, %v2573_v28 }
 0x153   :  { %2574 = vrcp.f32 %v504_v30 }
 0x15d   :  { %v2575_v31 = vpop.eup %2574 }
 0x15e   :  { %v518_v38 = vsub.f32 1.0, %v2575_v31  ;;  %v524_v40 = vmul.f32 0.0, %v2575_v31 }
 0x18d   :  { %v509_v33 = vpop.permute.xlu0 %508 }
 0x18e   :  { %v511_v34 = vmul.f32 %v2575_v31, %v509_v33 }
 0x190   :  { %513 = vrot.lane.b32.xlu0 %v511_v34, %s2731_s25 }
 0x202   :  { %v514_v35 = vpop.permute.xlu0 %513 }
 0x203   :  { %v516_v36 = vadd.f32 %v514_v35, %v3005_v24 }
 0x205   :  { %2576 = vtanh.f32 %v516_v36 }
 0x20f   :  { %v2577_v37 = vpop.eup %2576 }
 0x210   :  { %520 = vrot.lane.b32.xlu1 %v2577_v37, %s2732_s6 }
 0x282   :  { %v521_v39 = vpop.permute.xlu1 %520 }
 0x283   :  { %v523_v41 = vmul.f32 %v521_v39, %v518_v38 }
 0x285   :  { %v525_v42 = vadd.f32 %v524_v40, %v523_v41 }
 0x287   :  { %527 = vrot.lane.b32.xlu1 %v525_v42, %s2732_s6 }
 0x2f9   :  { %v528_v43 = vpop.permute.xlu1 %527 }
 0x2fa   :  { %v1980_v46 = vpack.c.bf16 %v528_v43, %v528_v43  ;;  %v3042_v61 = vsel %vm530_vm4, %v528_v43, 0.0 }
 0x2fb   :  { %v600_v63 = vrot.slane %v3042_v61, 7 }
 0x2fc   :  { %2253 = vmatmul.mubr.msk.bf16.vlgmr.msra.gmra.mrb[4].mxu1 %vm3014_vm5, %v1980_v46 }
 0x2fd   :  { %2277 = vmatpush3.bf16.msra.mxu1 %v2879_v62  ;;  %2292 = vmatprep.mubr.msk.bf16.mxu1 %vm2728_vm0, %v2727_v1 }
 0x2fe   :  { %2278 = vmatprep.subr.bf16.mxu1 %v2727_v1 }
 0x301   :  { %2279 = vmatpush3.bf16.msra.mxu1 %v2889_v5 }
 0x302   :  { %2280 = vmatprep.subr.bf16.mxu1 %v2727_v1 }
 0x305   :  { %2281 = vmatpush3.bf16.msra.mxu1 %v2902_v11 }
 0x306   :  { %2282 = vmatprep.subr.bf16.mxu1 %v2727_v1 }
 0x309   :  { %2283 = vmatpush3.bf16.msra.mxu1 %v2913_v17 }
 0x30a   :  { %2284 = vmatprep.subr.bf16.mxu1 %v2727_v1 }
 0x30d   :  { %2285 = vmatpush3.bf16.msra.mxu1 %v2921_v22 }
 0x30e   :  { %2286 = vmatprep.subr.bf16.mxu1 %v2727_v1 }
 0x311   :  { %2287 = vmatpush3.bf16.msra.mxu1 %v2929_v26 }
 0x312   :  { %2288 = vmatprep.subr.bf16.mxu1 %v2727_v1 }
 0x315   :  { %2289 = vmatpush3.bf16.msra.mxu1 %v2936_v29 }
 0x316   :  { %2290 = vmatprep.subr.bf16.mxu1 %v2727_v1 }
 0x319   :  { %2291 = vmatpush3.bf16.msra.mxu1 %v2943_v32 }
 0x31a   :  { %2316 = vmatprep.subr.bf16.mxu1 %v2727_v1 }
 0x3cf   :  { %v567_v47 = vpop.f32.mrb[4].mxu1 }
 0x3d0   :  { %v568_v49 = vadd.f32 %v567_v47, %v2996_v9  ;;  %v2254_v50 = vpop.f32.mrb[5].mxu1 }
 0x3d1   :  { %v570_v51 = vpop.f32.mrb[6].mxu1 }
 0x3d2   :  { %v574_v52 = vrot.slane %v568_v49, 7  ;;  %v2255_v53 = vpop.f32.mrb[7].mxu1 }
 0x3d4   :  { %583 = vrot.lane.b32.xlu0 %v574_v52, %s2730_s23  ;;  %v576_v54 = vadd.f32 %v574_v52, %v3005_v24 }
 0x3d6   :  { %v1982_v55 = vmul.f32 -1.442695, %v576_v54 }
 0x3d8   :  { %2578 = vpow2.f32 %v1982_v55 }
 0x3e2   :  { %v2579_v56 = vpop.eup %2578 }
 0x3e3   :  { %v580_v57 = vadd.f32 1.0, %v2579_v56 }
 0x3e5   :  { %2580 = vrcp.f32 %v580_v57 }
 0x3ef   :  { %v2581_v58 = vpop.eup %2580 }
 0x3f0   :  { %v593_v6 = vsub.f32 1.0, %v2581_v58 }
 0x446   :  { %v584_v59 = vpop.permute.xlu0 %583 }
 0x447   :  { %v586_v60 = vmul.f32 %v2581_v58, %v584_v59 }
 0x449   :  { %588 = vrot.lane.b32.xlu1 %v586_v60, %s2731_s25 }
 0x44d   :  { %601 = vrot.lane.b32.xlu1 %v600_v63, %s2733_s26 }
 0x4bb   :  { %v589_v0 = vpop.permute.xlu1 %588 }
 0x4bc   :  { %v591_v2 = vadd.f32 %v589_v0, %v3005_v24 }
 0x4be   :  { %2582 = vtanh.f32 %v591_v2 }
 0x4bf   :  { %v602_v4 = vpop.permute.xlu1 %601 }
 0x4c0   :  { %v604_v8 = vmul.f32 %v2581_v58, %v602_v4 }
 0x4c8   :  { %v2583_v3 = vpop.eup %2582 }
 0x4c9   :  { %595 = vrot.lane.b32.xlu0 %v2583_v3, %s2732_s6 }
 0x53b   :  { %v596_v7 = vpop.permute.xlu0 %595 }
 0x53c   :  { %v598_v10 = vmul.f32 %v596_v7, %v593_v6 }
 0x53e   :  { %v605_v12 = vadd.f32 %v604_v8, %v598_v10 }
 0x540   :  { %607 = vrot.lane.b32.xlu0 %v605_v12, %s2732_s6 }
 0x5b2   :  { %v608_v13 = vpop.permute.xlu0 %607 }
 0x5b3   :  { %v610_v14 = vsel %vm530_vm4, %v608_v13, 0.0 }
 0x5b4   :  { %v611_v15 = vpack.c.bf16 %v610_v14, %v610_v14  ;;  %v683_v37 = vrot.slane %v610_v14, 7  ;;  %v1767_v51 = vsel %vm1766_vm6, %v3042_v61, %v610_v14 }
 0x5b6   :  { %v613_v16 = vshrl.u32 %v611_v15, 16 }
 0x5b8   :  { %2273 = vmatmul.mubr.bf16.vlgmr.msra.gmra.mrb[8].mxu0 %v613_v16 }
 0x5b9   :  { %2297 = vmatpush3.bf16.msra.mxu0 %v2879_v62  ;;  %2312 = vmatprep.mubr.msk.bf16.mxu0 %vm2728_vm0, %v2727_v1 }
 0x5ba   :  { %2298 = vmatprep.subr.bf16.mxu0 %v2727_v1 }
 0x5bd   :  { %2299 = vmatpush3.bf16.msra.mxu0 %v2889_v5 }
 0x5be   :  { %2300 = vmatprep.subr.bf16.mxu0 %v2727_v1 }
 0x5c1   :  { %2301 = vmatpush3.bf16.msra.mxu0 %v2902_v11 }
 0x5c2   :  { %2302 = vmatprep.subr.bf16.mxu0 %v2727_v1 }
 0x5c5   :  { %2303 = vmatpush3.bf16.msra.mxu0 %v2913_v17 }
 0x5c6   :  { %2304 = vmatprep.subr.bf16.mxu0 %v2727_v1 }
 0x5c9   :  { %2305 = vmatpush3.bf16.msra.mxu0 %v2921_v22 }
 0x5ca   :  { %2306 = vmatprep.subr.bf16.mxu0 %v2727_v1 }
 0x5cd   :  { %2307 = vmatpush3.bf16.msra.mxu0 %v2929_v26 }
 0x5ce   :  { %2308 = vmatprep.subr.bf16.mxu0 %v2727_v1 }
 0x5d1   :  { %2309 = vmatpush3.bf16.msra.mxu0 %v2936_v29 }
 0x5d2   :  { %2310 = vmatprep.subr.bf16.mxu0 %v2727_v1 }
 0x5d5   :  { %2311 = vmatpush3.bf16.msra.mxu0 %v2943_v32 }
 0x5d6   :  { %2336 = vmatprep.subr.bf16.mxu0 %v2727_v1 }
 0x68b   :  { %v650_v18 = vpop.f32.mrb[8].mxu0 }
 0x68c   :  { %v651_v19 = vadd.f32 %v650_v18, %v2996_v9  ;;  %v2274_v20 = vpop.f32.mrb[9].mxu0 }
 0x68d   :  { %v653_v23 = vpop.f32.mrb[10].mxu0 }
 0x68e   :  { %v657_v25 = vrot.slane %v651_v19, 6  ;;  %v2275_v27 = vpop.f32.mrb[11].mxu0 }
 0x690   :  { %666 = vrot.lane.b32.xlu1 %v657_v25, %s2730_s23  ;;  %v659_v28 = vadd.f32 %v657_v25, %v3005_v24 }
 0x692   :  { %v1983_v30 = vmul.f32 -1.442695, %v659_v28 }
 0x694   :  { %2584 = vpow2.f32 %v1983_v30 }
 0x69e   :  { %v2585_v31 = vpop.eup %2584 }
 0x69f   :  { %v663_v33 = vadd.f32 1.0, %v2585_v31 }
 0x6a1   :  { %2586 = vrcp.f32 %v663_v33 }
 0x6ab   :  { %v2587_v34 = vpop.eup %2586 }
 0x6ac   :  { %v676_v42 = vsub.f32 1.0, %v2587_v34 }
 0x702   :  { %v667_v35 = vpop.permute.xlu1 %666 }
 0x703   :  { %v669_v36 = vmul.f32 %v2587_v34, %v667_v35 }
 0x705   :  { %671 = vrot.lane.b32.xlu0 %v669_v36, %s2731_s25 }
 0x709   :  { %684 = vrot.lane.b32.xlu0 %v683_v37, %s2733_s26 }
 0x777   :  { %v672_v38 = vpop.permute.xlu0 %671 }
 0x778   :  { %v674_v39 = vadd.f32 %v672_v38, %v3005_v24 }
 0x77a   :  { %2588 = vtanh.f32 %v674_v39 }
 0x77b   :  { %v685_v41 = vpop.permute.xlu0 %684 }
 0x77c   :  { %v687_v46 = vmul.f32 %v2587_v34, %v685_v41 }
 0x784   :  { %v2589_v40 = vpop.eup %2588 }
 0x785   :  { %678 = vrot.lane.b32.xlu1 %v2589_v40, %s2732_s6 }
 0x7f7   :  { %v679_v43 = vpop.permute.xlu1 %678 }
 0x7f8   :  { %v681_v47 = vmul.f32 %v679_v43, %v676_v42 }
 0x7fa   :  { %v688_v49 = vadd.f32 %v687_v46, %v681_v47 }
 0x7fc   :  { %690 = vrot.lane.b32.xlu1 %v688_v49, %s2732_s6 }
 0x86e   :  { %v691_v50 = vpop.permute.xlu1 %690 }
 0x86f   :  { %v693_v52 = vsel %vm530_vm4, %v691_v50, 0.0 }
 0x870   :  { %v694_v53 = vpack.c.bf16 %v693_v52, %v693_v52  ;;  %v1769_v54 = vsel %vm1768_vm7, %v1767_v51, %v693_v52  ;;  %v765_v8 = vrot.slane %v693_v52, 7 }
 0x872   :  { %v696_v55 = vrot.slane %v694_v53, 1 }
 0x874   :  { %2293 = vmatmul.mubr.bf16.vlgmr.msra.gmra.mrb[8].mxu1 %v696_v55 }
 0x875   :  { %2317 = vmatpush3.bf16.msra.mxu1 %v2879_v62  ;;  %2332 = vmatprep.mubr.msk.bf16.mxu1 %vm2728_vm0, %v2727_v1 }
 0x876   :  { %2318 = vmatprep.subr.bf16.mxu1 %v2727_v1 }
 0x879   :  { %2319 = vmatpush3.bf16.msra.mxu1 %v2889_v5 }
 0x87a   :  { %2320 = vmatprep.subr.bf16.mxu1 %v2727_v1 }
 0x87d   :  { %2321 = vmatpush3.bf16.msra.mxu1 %v2902_v11 }
 0x87e   :  { %2322 = vmatprep.subr.bf16.mxu1 %v2727_v1 }
 0x881   :  { %2323 = vmatpush3.bf16.msra.mxu1 %v2913_v17 }
 0x882   :  { %2324 = vmatprep.subr.bf16.mxu1 %v2727_v1 }
 0x885   :  { %2325 = vmatpush3.bf16.msra.mxu1 %v2921_v22 }
 0x886   :  { %2326 = vmatprep.subr.bf16.mxu1 %v2727_v1 }
 0x889   :  { %2327 = vmatpush3.bf16.msra.mxu1 %v2929_v26 }
 0x88a   :  { %2328 = vmatprep.subr.bf16.mxu1 %v2727_v1 }
 0x88d   :  { %2329 = vmatpush3.bf16.msra.mxu1 %v2936_v29 }
 0x88e   :  { %2330 = vmatprep.subr.bf16.mxu1 %v2727_v1 }
 0x891   :  { %2331 = vmatpush3.bf16.msra.mxu1 %v2943_v32 }
 0x892   :  { %2356 = vmatprep.subr.bf16.mxu1 %v2727_v1 }
 0x947   :  { %v732_v56 = vpop.f32.mrb[8].mxu1 }
 0x948   :  { %v733_v57 = vadd.f32 %v732_v56, %v2996_v9  ;;  %v2294_v58 = vpop.f32.mrb[9].mxu1 }
 0x949   :  { %v735_v59 = vpop.f32.mrb[10].mxu1 }
 0x94a   :  { %v739_v60 = vrot.slane %v733_v57, 5  ;;  %v2295_v61 = vpop.f32.mrb[11].mxu1 }
 0x94c   :  { %748 = vrot.lane.b32.xlu0 %v739_v60, %s2730_s23  ;;  %v741_v63 = vadd.f32 %v739_v60, %v3005_v24 }
 0x94e   :  { %v1984_v0 = vmul.f32 -1.442695, %v741_v63 }
 0x950   :  { %2590 = vpow2.f32 %v1984_v0 }
 0x95a   :  { %v2591_v2 = vpop.eup %2590 }
 0x95b   :  { %v745_v3 = vadd.f32 1.0, %v2591_v2 }
 0x95d   :  { %2592 = vrcp.f32 %v745_v3 }
 0x967   :  { %v2593_v4 = vpop.eup %2592 }
 0x968   :  { %v758_v15 = vsub.f32 1.0, %v2593_v4 }
 0x9be   :  { %v749_v6 = vpop.permute.xlu0 %748 }
 0x9bf   :  { %v751_v7 = vmul.f32 %v2593_v4, %v749_v6 }
 0x9c1   :  { %753 = vrot.lane.b32.xlu1 %v751_v7, %s2731_s25 }
 0x9c5   :  { %766 = vrot.lane.b32.xlu1 %v765_v8, %s2733_s26 }
 0xa33   :  { %v754_v10 = vpop.permute.xlu1 %753 }
 0xa34   :  { %v756_v12 = vadd.f32 %v754_v10, %v3005_v24 }
 0xa36   :  { %2594 = vtanh.f32 %v756_v12 }
 0xa37   :  { %v767_v14 = vpop.permute.xlu1 %766 }
 0xa38   :  { %v769_v18 = vmul.f32 %v2593_v4, %v767_v14 }
 0xa40   :  { %v2595_v13 = vpop.eup %2594 }
 0xa41   :  { %760 = vrot.lane.b32.xlu0 %v2595_v13, %s2732_s6 }
 0xab3   :  { %v761_v16 = vpop.permute.xlu0 %760 }
 0xab4   :  { %v763_v19 = vmul.f32 %v761_v16, %v758_v15 }
 0xab6   :  { %v770_v20 = vadd.f32 %v769_v18, %v763_v19 }
 0xab8   :  { %772 = vrot.lane.b32.xlu0 %v770_v20, %s2732_s6 }
 0xb2a   :  { %v773_v23 = vpop.permute.xlu0 %772 }
 0xb2b   :  { %v775_v25 = vsel %vm530_vm4, %v773_v23, 0.0 }
 0xb2c   :  { %v776_v27 = vpack.c.bf16 %v775_v25, %v775_v25  ;;  %v1771_v28 = vsel %vm1770_vm8, %v1769_v54, %v775_v25  ;;  %v849_v49 = vrot.slane %v775_v25, 7 }
 0xb2e   :  { %v778_v30 = vshrl.u32 %v776_v27, 16 }
 0xb30   :  { %v780_v31 = vrot.slane %v778_v30, 1 }
 0xb32   :  { %2313 = vmatmul.mubr.bf16.vlgmr.msra.gmra.mrb[12].mxu0 %v780_v31 }
 0xb33   :  { %2337 = vmatpush3.bf16.msra.mxu0 %v2879_v62  ;;  %2352 = vmatprep.mubr.msk.bf16.mxu0 %vm2728_vm0, %v2727_v1 }
 0xb34   :  { %2338 = vmatprep.subr.bf16.mxu0 %v2727_v1 }
 0xb37   :  { %2339 = vmatpush3.bf16.msra.mxu0 %v2889_v5 }
 0xb38   :  { %2340 = vmatprep.subr.bf16.mxu0 %v2727_v1 }
 0xb3b   :  { %2341 = vmatpush3.bf16.msra.mxu0 %v2902_v11 }
 0xb3c   :  { %2342 = vmatprep.subr.bf16.mxu0 %v2727_v1 }
 0xb3f   :  { %2343 = vmatpush3.bf16.msra.mxu0 %v2913_v17 }
 0xb40   :  { %2344 = vmatprep.subr.bf16.mxu0 %v2727_v1 }
 0xb43   :  { %2345 = vmatpush3.bf16.msra.mxu0 %v2921_v22 }
 0xb44   :  { %2346 = vmatprep.subr.bf16.mxu0 %v2727_v1 }
 0xb47   :  { %2347 = vmatpush3.bf16.msra.mxu0 %v2929_v26 }
 0xb48   :  { %2348 = vmatprep.subr.bf16.mxu0 %v2727_v1 }
 0xb4b   :  { %2349 = vmatpush3.bf16.msra.mxu0 %v2936_v29 }
 0xb4c   :  { %2350 = vmatprep.subr.bf16.mxu0 %v2727_v1 }
 0xb4f   :  { %2351 = vmatpush3.bf16.msra.mxu0 %v2943_v32 }
 0xb50   :  { %2376 = vmatprep.subr.bf16.mxu0 %v2727_v1 }
 0xc05   :  { %v816_v33 = vpop.f32.mrb[12].mxu0 }
 0xc06   :  { %v817_v34 = vadd.f32 %v816_v33, %v2996_v9  ;;  %v2314_v35 = vpop.f32.mrb[13].mxu0 }
 0xc07   :  { %v819_v36 = vpop.f32.mrb[14].mxu0 }
 0xc08   :  { %v823_v37 = vrot.slane %v817_v34, 4  ;;  %v2315_v38 = vpop.f32.mrb[15].mxu0 }
 0xc0a   :  { %832 = vrot.lane.b32.xlu1 %v823_v37, %s2730_s23  ;;  %v825_v39 = vadd.f32 %v823_v37, %v3005_v24 }
 0xc0c   :  { %v1985_v40 = vmul.f32 -1.442695, %v825_v39 }
 0xc0e   :  { %2596 = vpow2.f32 %v1985_v40 }
 0xc18   :  { %v2597_v41 = vpop.eup %2596 }
 0xc19   :  { %v829_v42 = vadd.f32 1.0, %v2597_v41 }
 0xc1b   :  { %2598 = vrcp.f32 %v829_v42 }
 0xc25   :  { %v2599_v43 = vpop.eup %2598 }
 0xc26   :  { %v842_v54 = vsub.f32 1.0, %v2599_v43 }
 0xc7c   :  { %v833_v46 = vpop.permute.xlu1 %832 }
 0xc7d   :  { %v835_v47 = vmul.f32 %v2599_v43, %v833_v46 }
 0xc7f   :  { %837 = vrot.lane.b32.xlu0 %v835_v47, %s2731_s25 }
 0xc83   :  { %850 = vrot.lane.b32.xlu0 %v849_v49, %s2733_s26 }
 0xcf1   :  { %v838_v50 = vpop.permute.xlu0 %837 }
 0xcf2   :  { %v840_v51 = vadd.f32 %v838_v50, %v3005_v24 }
 0xcf4   :  { %2600 = vtanh.f32 %v840_v51 }
 0xcf5   :  { %v851_v53 = vpop.permute.xlu0 %850 }
 0xcf6   :  { %v853_v56 = vmul.f32 %v2599_v43, %v851_v53 }
 0xcfe   :  { %v2601_v52 = vpop.eup %2600 }
 0xcff   :  { %844 = vrot.lane.b32.xlu1 %v2601_v52, %s2732_s6 }
 0xd71   :  { %v845_v55 = vpop.permute.xlu1 %844 }
 0xd72   :  { %v847_v57 = vmul.f32 %v845_v55, %v842_v54 }
 0xd74   :  { %v854_v58 = vadd.f32 %v853_v56, %v847_v57 }
 0xd76   :  { %856 = vrot.lane.b32.xlu1 %v854_v58, %s2732_s6 }
 0xde8   :  { %v857_v59 = vpop.permute.xlu1 %856 }
 0xde9   :  { %v859_v60 = vsel %vm530_vm4, %v857_v59, 0.0 }
 0xdea   :  { %v860_v61 = vpack.c.bf16 %v859_v60, %v859_v60  ;;  %v1773_v63 = vsel %vm1772_vm9, %v1771_v28, %v859_v60  ;;  %v931_v19 = vrot.slane %v859_v60, 7 }
 0xdec   :  { %v862_v0 = vrot.slane %v860_v61, 2 }
 0xdee   :  { %2333 = vmatmul.mubr.bf16.vlgmr.msra.gmra.mrb[12].mxu1 %v862_v0 }
 0xdef   :  { %2357 = vmatpush3.bf16.msra.mxu1 %v2879_v62  ;;  %2372 = vmatprep.mubr.msk.bf16.mxu1 %vm2728_vm0, %v2727_v1 }
 0xdf0   :  { %2358 = vmatprep.subr.bf16.mxu1 %v2727_v1 }
 0xdf3   :  { %2359 = vmatpush3.bf16.msra.mxu1 %v2889_v5 }
 0xdf4   :  { %2360 = vmatprep.subr.bf16.mxu1 %v2727_v1 }
 0xdf7   :  { %2361 = vmatpush3.bf16.msra.mxu1 %v2902_v11 }
 0xdf8   :  { %2362 = vmatprep.subr.bf16.mxu1 %v2727_v1 }
 0xdfb   :  { %2363 = vmatpush3.bf16.msra.mxu1 %v2913_v17 }
 0xdfc   :  { %2364 = vmatprep.subr.bf16.mxu1 %v2727_v1 }
 0xdff   :  { %2365 = vmatpush3.bf16.msra.mxu1 %v2921_v22 }
 0xe00   :  { %2366 = vmatprep.subr.bf16.mxu1 %v2727_v1 }
 0xe03   :  { %2367 = vmatpush3.bf16.msra.mxu1 %v2929_v26 }
 0xe04   :  { %2368 = vmatprep.subr.bf16.mxu1 %v2727_v1 }
 0xe07   :  { %2369 = vmatpush3.bf16.msra.mxu1 %v2936_v29 }
 0xe08   :  { %2370 = vmatprep.subr.bf16.mxu1 %v2727_v1 }
 0xe0b   :  { %2371 = vmatpush3.bf16.msra.mxu1 %v2943_v32 }
 0xe0c   :  { %2396 = vmatprep.subr.bf16.mxu1 %v2727_v1 }
 0xec1   :  { %v898_v2 = vpop.f32.mrb[12].mxu1 }
 0xec2   :  { %v899_v3 = vadd.f32 %v898_v2, %v2996_v9  ;;  %v2334_v4 = vpop.f32.mrb[13].mxu1 }
 0xec3   :  { %v901_v6 = vpop.f32.mrb[14].mxu1 }
 0xec4   :  { %v905_v7 = vrot.slane %v899_v3, 3  ;;  %v2335_v8 = vpop.f32.mrb[15].mxu1 }
 0xec6   :  { %914 = vrot.lane.b32.xlu0 %v905_v7, %s2730_s23  ;;  %v907_v10 = vadd.f32 %v905_v7, %v3005_v24 }
 0xec8   :  { %v1986_v12 = vmul.f32 -1.442695, %v907_v10 }
 0xeca   :  { %2602 = vpow2.f32 %v1986_v12  ;;  %v3196_v12 = vld [vmem:[%s3516_s5] sm:$0xff]  }
 0xed4   :  { %v2603_v13 = vpop.eup %2602 }
 0xed5   :  { %v911_v14 = vadd.f32 1.0, %v2603_v13 }
 0xed7   :  { %2604 = vrcp.f32 %v911_v14 }
 0xee1   :  { %v2605_v15 = vpop.eup %2604 }
 0xee2   :  { %v924_v28 = vsub.f32 1.0, %v2605_v15 }
 0xf38   :  { %v915_v16 = vpop.permute.xlu0 %914 }
 0xf39   :  { %v917_v18 = vmul.f32 %v2605_v15, %v915_v16 }
 0xf3b   :  { %919 = vrot.lane.b32.xlu1 %v917_v18, %s2731_s25 }
 0xf3f   :  { %932 = vrot.lane.b32.xlu1 %v931_v19, %s2733_s26 }
 0xfad   :  { %v920_v20 = vpop.permute.xlu1 %919 }
 0xfae   :  { %v922_v23 = vadd.f32 %v920_v20, %v3005_v24 }
 0xfb0   :  { %2606 = vtanh.f32 %v922_v23 }
 0xfb1   :  { %v933_v27 = vpop.permute.xlu1 %932 }
 0xfb2   :  { %v935_v31 = vmul.f32 %v2605_v15, %v933_v27 }
 0xfba   :  { %v2607_v25 = vpop.eup %2606 }
 0xfbb   :  { %926 = vrot.lane.b32.xlu0 %v2607_v25, %s2732_s6 }
0x102d   :  { %v927_v30 = vpop.permute.xlu0 %926 }
0x102e   :  { %v929_v33 = vmul.f32 %v927_v30, %v924_v28 }
0x1030   :  { %v936_v34 = vadd.f32 %v935_v31, %v929_v33 }
0x1032   :  { %938 = vrot.lane.b32.xlu0 %v936_v34, %s2732_s6 }
0x10a4   :  { %v939_v35 = vpop.permute.xlu0 %938 }
0x10a5   :  { %v941_v36 = vsel %vm530_vm4, %v939_v35, 0.0 }
0x10a6   :  { %v942_v37 = vpack.c.bf16 %v941_v36, %v941_v36  ;;  %v1775_v38 = vsel %vm1774_vm10, %v1773_v63, %v941_v36  ;;  %v1015_v56 = vrot.slane %v941_v36, 7 }
0x10a8   :  { %v944_v39 = vshrl.u32 %v942_v37, 16 }
0x10aa   :  { %v946_v40 = vrot.slane %v944_v39, 2 }
0x10ac   :  { %2353 = vmatmul.mubr.bf16.vlgmr.msra.gmra.mrb[16].mxu0 %v946_v40 }
0x10ad   :  { %2377 = vmatpush3.bf16.msra.mxu0 %v2879_v62  ;;  %2392 = vmatprep.mubr.msk.bf16.mxu0 %vm2728_vm0, %v2727_v1 }
0x10ae   :  { %2378 = vmatprep.subr.bf16.mxu0 %v2727_v1 }
0x10b1   :  { %2379 = vmatpush3.bf16.msra.mxu0 %v2889_v5 }
0x10b2   :  { %2380 = vmatprep.subr.bf16.mxu0 %v2727_v1 }
0x10b5   :  { %2381 = vmatpush3.bf16.msra.mxu0 %v2902_v11 }
0x10b6   :  { %2382 = vmatprep.subr.bf16.mxu0 %v2727_v1 }
0x10b9   :  { %2383 = vmatpush3.bf16.msra.mxu0 %v2913_v17 }
0x10ba   :  { %2384 = vmatprep.subr.bf16.mxu0 %v2727_v1 }
0x10bd   :  { %2385 = vmatpush3.bf16.msra.mxu0 %v2921_v22 }
0x10be   :  { %2386 = vmatprep.subr.bf16.mxu0 %v2727_v1 }
0x10c1   :  { %2387 = vmatpush3.bf16.msra.mxu0 %v2929_v26 }
0x10c2   :  { %2388 = vmatprep.subr.bf16.mxu0 %v2727_v1 }
0x10c5   :  { %2389 = vmatpush3.bf16.msra.mxu0 %v2936_v29 }
0x10c6   :  { %2390 = vmatprep.subr.bf16.mxu0 %v2727_v1 }
0x10c9   :  { %2391 = vmatpush3.bf16.msra.mxu0 %v2943_v32 }
0x10ca   :  { %2416 = vmatprep.subr.bf16.mxu0 %v2727_v1 }
0x117f   :  { %v982_v62 = vpop.f32.mrb[16].mxu0 }
0x1180   :  { %v983_v41 = vadd.f32 %v982_v62, %v2996_v9  ;;  %v2354_v42 = vpop.f32.mrb[17].mxu0  ;;  %v3236_v62 = vld [vmem:[%s3516_s5 + $0x8] sm:$0xff]  }
0x1181   :  { %v985_v43 = vpop.f32.mrb[18].mxu0  ;;  %v3250_v42 = vld [vmem:[%s3516_s5 + $0x18] sm:$0xff]  }
0x1182   :  { %v989_v46 = vrot.slane %v983_v41, 2  ;;  %v2355_v47 = vpop.f32.mrb[19].mxu0  ;;  %v3243_v41 = vld [vmem:[%s3516_s5 + $0x10] sm:$0xff]   ;;  %v3257_v43 = vld [vmem:[%s3516_s5 + $0x20] sm:$0xff]  }
0x1183   :  { %v3271_v47 = vld [vmem:[%s3516_s5 + $0x30] sm:$0xff]  }
0x1184   :  { %998 = vrot.lane.b32.xlu1 %v989_v46, %s2730_s23  ;;  %v991_v49 = vadd.f32 %v989_v46, %v3005_v24  ;;  %v3264_v46 = vld [vmem:[%s3516_s5 + $0x28] sm:$0xff]  }
0x1186   :  { %v1987_v50 = vmul.f32 -1.442695, %v991_v49  ;;  %v3278_v49 = vld [vmem:[%s3516_s5 + $0x38] sm:$0xff]  }
0x1188   :  { %2608 = vpow2.f32 %v1987_v50 }
0x1192   :  { %v2609_v51 = vpop.eup %2608 }
0x1193   :  { %v995_v52 = vadd.f32 1.0, %v2609_v51 }
0x1195   :  { %2610 = vrcp.f32 %v995_v52 }
0x119f   :  { %v2611_v53 = vpop.eup %2610 }
0x11a0   :  { %v1008_v61 = vsub.f32 1.0, %v2611_v53 }
0x11f6   :  { %v999_v54 = vpop.permute.xlu1 %998 }
0x11f7   :  { %v1001_v55 = vmul.f32 %v2611_v53, %v999_v54 }
0x11f9   :  { %1003 = vrot.lane.b32.xlu0 %v1001_v55, %s2731_s25 }
0x11fd   :  { %1016 = vrot.lane.b32.xlu0 %v1015_v56, %s2733_s26 }
0x126b   :  { %v1004_v57 = vpop.permute.xlu0 %1003 }
0x126c   :  { %v1006_v58 = vadd.f32 %v1004_v57, %v3005_v24 }
0x126e   :  { %2612 = vtanh.f32 %v1006_v58 }
0x126f   :  { %v1017_v60 = vpop.permute.xlu0 %1016 }
0x1270   :  { %v1019_v0 = vmul.f32 %v2611_v53, %v1017_v60 }
0x1278   :  { %v2613_v59 = vpop.eup %2612 }
0x1279   :  { %1010 = vrot.lane.b32.xlu1 %v2613_v59, %s2732_s6 }
0x12eb   :  { %v1011_v63 = vpop.permute.xlu1 %1010 }
0x12ec   :  { %v1013_v2 = vmul.f32 %v1011_v63, %v1008_v61 }
0x12ee   :  { %v1020_v3 = vadd.f32 %v1019_v0, %v1013_v2 }
0x12f0   :  { %1022 = vrot.lane.b32.xlu1 %v1020_v3, %s2732_s6 }
0x1362   :  { %v1023_v4 = vpop.permute.xlu1 %1022 }
0x1363   :  { %v1025_v6 = vsel %vm530_vm4, %v1023_v4, 0.0 }
0x1364   :  { %v1026_v7 = vpack.c.bf16 %v1025_v6, %v1025_v6  ;;  %v1777_v8 = vsel %vm1776_vm11, %v1775_v38, %v1025_v6  ;;  %v1097_v20 = vrot.slane %v1025_v6, 7 }
0x1366   :  { %v1028_v10 = vrot.slane %v1026_v7, 3 }
0x1368   :  { %2373 = vmatmul.mubr.bf16.vlgmr.msra.gmra.mrb[16].mxu1 %v1028_v10 }
0x1369   :  { %2397 = vmatpush3.bf16.msra.mxu1 %v3196_v12  ;;  %2412 = vmatprep.mubr.msk.bf16.mxu1 %vm2728_vm0, %v2727_v1 }
0x136a   :  { %2398 = vmatprep.subr.bf16.mxu1 %v2727_v1 }
0x136d   :  { %2399 = vmatpush3.bf16.msra.mxu1 %v2889_v5 }
0x136e   :  { %2400 = vmatprep.subr.bf16.mxu1 %v2727_v1 }
0x1371   :  { %2401 = vmatpush3.bf16.msra.mxu1 %v2902_v11 }
0x1372   :  { %2402 = vmatprep.subr.bf16.mxu1 %v2727_v1 }
0x1375   :  { %2403 = vmatpush3.bf16.msra.mxu1 %v2913_v17 }
0x1376   :  { %2404 = vmatprep.subr.bf16.mxu1 %v2727_v1 }
0x1379   :  { %2405 = vmatpush3.bf16.msra.mxu1 %v2921_v22 }
0x137a   :  { %2406 = vmatprep.subr.bf16.mxu1 %v2727_v1 }
0x137d   :  { %2407 = vmatpush3.bf16.msra.mxu1 %v2929_v26 }
0x137e   :  { %2408 = vmatprep.subr.bf16.mxu1 %v2727_v1 }
0x1381   :  { %2409 = vmatpush3.bf16.msra.mxu1 %v2936_v29 }
0x1382   :  { %2410 = vmatprep.subr.bf16.mxu1 %v2727_v1 }
0x1385   :  { %2411 = vmatpush3.bf16.msra.mxu1 %v2943_v32 }
0x1386   :  { %2436 = vmatprep.subr.bf16.mxu1 %v2727_v1 }
0x143b   :  { %v1064_v5 = vpop.f32.mrb[16].mxu1 }
0x143c   :  { %v1065_v11 = vadd.f32 %v1064_v5, %v2996_v9  ;;  %v2374_v17 = vpop.f32.mrb[17].mxu1 }
0x143d   :  { %v1067_v13 = vpop.f32.mrb[18].mxu1 }
0x143e   :  { %v1071_v22 = vrot.slane %v1065_v11, 1  ;;  %v2375_v14 = vpop.f32.mrb[19].mxu1 }
0x1440   :  { %1080 = vrot.lane.b32.xlu0 %v1071_v22, %s2730_s23  ;;  %v1073_v26 = vadd.f32 %v1071_v22, %v3005_v24 }
0x1442   :  { %v1988_v15 = vmul.f32 -1.442695, %v1073_v26 }
0x1444   :  { %2614 = vpow2.f32 %v1988_v15 }
0x144e   :  { %v2615_v29 = vpop.eup %2614 }
0x144f   :  { %v1077_v16 = vadd.f32 1.0, %v2615_v29 }
0x1451   :  { %2616 = vrcp.f32 %v1077_v16 }
0x145b   :  { %v2617_v18 = vpop.eup %2616 }
0x145c   :  { %v1090_v30 = vsub.f32 1.0, %v2617_v18 }
0x14b2   :  { %v1081_v32 = vpop.permute.xlu0 %1080 }
0x14b3   :  { %v1083_v19 = vmul.f32 %v2617_v18, %v1081_v32 }
0x14b5   :  { %1085 = vrot.lane.b32.xlu1 %v1083_v19, %s2731_s25 }
0x14b9   :  { %1098 = vrot.lane.b32.xlu1 %v1097_v20, %s2733_s26 }
0x1527   :  { %v1086_v23 = vpop.permute.xlu1 %1085 }
0x1528   :  { %v1088_v25 = vadd.f32 %v1086_v23, %v3005_v24 }
0x152a   :  { %2618 = vtanh.f32 %v1088_v25 }
0x152b   :  { %v1099_v28 = vpop.permute.xlu1 %1098 }
0x152c   :  { %v1101_v33 = vmul.f32 %v2617_v18, %v1099_v28 }
0x1534   :  { %v2619_v27 = vpop.eup %2618 }
0x1535   :  { %1092 = vrot.lane.b32.xlu0 %v2619_v27, %s2732_s6 }
0x15a7   :  { %v1093_v31 = vpop.permute.xlu0 %1092 }
0x15a8   :  { %v1095_v34 = vmul.f32 %v1093_v31, %v1090_v30 }
0x15aa   :  { %v1102_v35 = vadd.f32 %v1101_v33, %v1095_v34 }
0x15ac   :  { %1104 = vrot.lane.b32.xlu0 %v1102_v35, %s2732_s6 }
0x161e   :  { %v1105_v36 = vpop.permute.xlu0 %1104 }
0x161f   :  { %v1107_v37 = vsel %vm530_vm4, %v1105_v36, 0.0 }
0x1620   :  { %v1108_v38 = vpack.c.bf16 %v1107_v37, %v1107_v37  ;;  %v1779_v39 = vsel %vm1778_vm12, %v1777_v8, %v1107_v37  ;;  %v1179_v63 = vrot.slane %v1107_v37, 7 }
0x1621   :  { %1787 = vst [vmem:[%s3522_s11] sm:$0xff] %v1779_v39 }
0x1622   :  { %v1110_v24 = vshrl.u32 %v1108_v38, 16 }
0x1624   :  { %v1112_v40 = vrot.slane %v1110_v24, 3 }
0x1626   :  { %2393 = vmatmul.mubr.bf16.vlgmr.msra.gmra.mrb[20].mxu0 %v1112_v40 }
0x1627   :  { %2417 = vmatpush3.bf16.msra.mxu0 %v3196_v12  ;;  %2432 = vmatprep.mubr.msk.bf16.mxu0 %vm2728_vm0, %v2727_v1 }
0x1628   :  { %2418 = vmatprep.subr.bf16.mxu0 %v2727_v1 }
0x162b   :  { %2419 = vmatpush3.bf16.msra.mxu0 %v3236_v62 }
0x162c   :  { %2420 = vmatprep.subr.bf16.mxu0 %v2727_v1 }
0x162f   :  { %2421 = vmatpush3.bf16.msra.mxu0 %v3243_v41 }
0x1630   :  { %2422 = vmatprep.subr.bf16.mxu0 %v2727_v1 }
0x1633   :  { %2423 = vmatpush3.bf16.msra.mxu0 %v3250_v42 }
0x1634   :  { %2424 = vmatprep.subr.bf16.mxu0 %v2727_v1 }
0x1637   :  { %2425 = vmatpush3.bf16.msra.mxu0 %v3257_v43 }
0x1638   :  { %2426 = vmatprep.subr.bf16.mxu0 %v2727_v1 }
0x163b   :  { %2427 = vmatpush3.bf16.msra.mxu0 %v3264_v46 }
0x163c   :  { %2428 = vmatprep.subr.bf16.mxu0 %v2727_v1 }
0x163f   :  { %2429 = vmatpush3.bf16.msra.mxu0 %v3271_v47 }
0x1640   :  { %2430 = vmatprep.subr.bf16.mxu0 %v2727_v1 }
0x1643   :  { %2431 = vmatpush3.bf16.msra.mxu0 %v3278_v49 }
0x1644   :  { %2456 = vmatprep.subr.bf16.mxu0 %v2727_v1 }
0x16f9   :  { %v1148_v50 = vpop.f32.mrb[20].mxu0 }
0x16fa   :  { %v1149_v51 = vadd.f32 %v1148_v50, %v2996_v9  ;;  %v2394_v52 = vpop.f32.mrb[21].mxu0 }
0x16fb   :  { %v1151_v53 = vpop.f32.mrb[22].mxu0 }
0x16fc   :  { %1162 = vrot.lane.b32.xlu1 %v1149_v51, %s2730_s23  ;;  %v2395_v54 = vpop.f32.mrb[23].mxu0  ;;  %v1154_v55 = vadd.f32 %v1149_v51, %v3003_v21  ;;  %v3344_v51 = vld [vmem:[%s3518_s7] sm:$0x1] }
0x16fe   :  { %v1989_v56 = vmul.f32 -1.442695, %v1154_v55 }
0x1700   :  { %2620 = vpow2.f32 %v1989_v56 }
0x170a   :  { %v2621_v57 = vpop.eup %2620 }
0x170b   :  { %v1158_v58 = vadd.f32 1.0, %v2621_v57 }
0x170d   :  { %2622 = vrcp.f32 %v1158_v58 }
0x1717   :  { %v2623_v59 = vpop.eup %2622 }
0x1718   :  { %v1172_v6 = vsub.f32 1.0, %v2623_v59 }
0x176e   :  { %v1163_v60 = vpop.permute.xlu1 %1162 }
0x176f   :  { %v1165_v61 = vmul.f32 %v2623_v59, %v1163_v60 }
0x1771   :  { %1167 = vrot.lane.b32.xlu0 %v1165_v61, %s2731_s25 }
0x1775   :  { %1180 = vrot.lane.b32.xlu0 %v1179_v63, %s2733_s26 }
0x17e3   :  { %v1168_v0 = vpop.permute.xlu0 %1167 }
0x17e4   :  { %v1170_v2 = vadd.f32 %v1168_v0, %v3003_v21 }
0x17e6   :  { %2624 = vtanh.f32 %v1170_v2 }
0x17e7   :  { %v1181_v4 = vpop.permute.xlu0 %1180 }
0x17e8   :  { %v1183_v8 = vmul.f32 %v2623_v59, %v1181_v4 }
0x17f0   :  { %v2625_v3 = vpop.eup %2624 }
0x17f1   :  { %1174 = vrot.lane.b32.xlu1 %v2625_v3, %s2732_s6 }
0x1863   :  { %v1175_v7 = vpop.permute.xlu1 %1174 }
0x1864   :  { %v1177_v10 = vmul.f32 %v1175_v7, %v1172_v6 }
0x1866   :  { %v1184_v5 = vadd.f32 %v1183_v8, %v1177_v10 }
0x1868   :  { %1186 = vrot.lane.b32.xlu1 %v1184_v5, %s2732_s6 }
0x18da   :  { %v1187_v11 = vpop.permute.xlu1 %1186 }
0x18db   :  { %v1991_v17 = vpack.c.bf16 %v1187_v11, %v1187_v11  ;;  %v3314_v25 = vsel %vm530_vm4, %v1187_v11, 0.0 }
0x18dd   :  { %2413 = vmatmul.mubr.msk.bf16.vlgmr.msra.gmra.mrb[20].mxu1 %vm3014_vm5, %v1991_v17 }
0x18de   :  { %2437 = vmatpush3.bf16.msra.mxu1 %v3196_v12  ;;  %2452 = vmatprep.mubr.msk.bf16.mxu1 %vm2728_vm0, %v2727_v1 }
0x18df   :  { %2438 = vmatprep.subr.bf16.mxu1 %v2727_v1 }
0x18e2   :  { %2439 = vmatpush3.bf16.msra.mxu1 %v3236_v62 }
0x18e3   :  { %2440 = vmatprep.subr.bf16.mxu1 %v2727_v1 }
0x18e6   :  { %2441 = vmatpush3.bf16.msra.mxu1 %v3243_v41 }
0x18e7   :  { %2442 = vmatprep.subr.bf16.mxu1 %v2727_v1 }
0x18ea   :  { %2443 = vmatpush3.bf16.msra.mxu1 %v3250_v42 }
0x18eb   :  { %2444 = vmatprep.subr.bf16.mxu1 %v2727_v1 }
0x18ee   :  { %2445 = vmatpush3.bf16.msra.mxu1 %v3257_v43 }
0x18ef   :  { %2446 = vmatprep.subr.bf16.mxu1 %v2727_v1 }
0x18f2   :  { %2447 = vmatpush3.bf16.msra.mxu1 %v3264_v46 }
0x18f3   :  { %2448 = vmatprep.subr.bf16.mxu1 %v2727_v1 }
0x18f6   :  { %2449 = vmatpush3.bf16.msra.mxu1 %v3271_v47 }
0x18f7   :  { %2450 = vmatprep.subr.bf16.mxu1 %v2727_v1 }
0x18fa   :  { %2451 = vmatpush3.bf16.msra.mxu1 %v3278_v49 }
0x18fb   :  { %2476 = vmatprep.subr.bf16.mxu1 %v2727_v1 }
0x19b0   :  { %v1225_v45 = vpop.f32.mrb[20].mxu1 }
0x19b1   :  { %v1226_v13 = vadd.f32 %v1225_v45, %v2996_v9  ;;  %v2414_v22 = vpop.f32.mrb[21].mxu1  ;;  %v1258_v9 = vrot.slane %v3314_v25, 7 }
0x19b2   :  { %v1228_v14 = vpop.f32.mrb[22].mxu1 }
0x19b3   :  { %v1232_v26 = vrot.slane %v1226_v13, 7  ;;  %v2415_v15 = vpop.f32.mrb[23].mxu1 }
0x19b5   :  { %1241 = vrot.lane.b32.xlu0 %v1232_v26, %s2730_s23  ;;  %v1234_v29 = vadd.f32 %v1232_v26, %v3003_v21 }
0x19b7   :  { %v1993_v16 = vmul.f32 -1.442695, %v1234_v29 }
0x19b9   :  { %2626 = vpow2.f32 %v1993_v16 }
0x19c3   :  { %v2627_v18 = vpop.eup %2626 }
0x19c4   :  { %v1238_v32 = vadd.f32 1.0, %v2627_v18 }
0x19c6   :  { %2628 = vrcp.f32 %v1238_v32 }
0x19d0   :  { %v2629_v19 = vpop.eup %2628 }
0x19d1   :  { %v1251_v33 = vsub.f32 1.0, %v2629_v19 }
0x1a27   :  { %v1242_v20 = vpop.permute.xlu0 %1241 }
0x1a28   :  { %v1244_v23 = vmul.f32 %v2629_v19, %v1242_v20 }
0x1a2a   :  { %1246 = vrot.lane.b32.xlu1 %v1244_v23, %s2731_s25 }
0x1a2e   :  { %1259 = vrot.lane.b32.xlu1 %v1258_v9, %s2733_s26 }
0x1a9c   :  { %v1247_v27 = vpop.permute.xlu1 %1246 }
0x1a9d   :  { %v1249_v28 = vadd.f32 %v1247_v27, %v3003_v21 }
0x1a9f   :  { %2630 = vtanh.f32 %v1249_v28 }
0x1aa0   :  { %v1260_v31 = vpop.permute.xlu1 %1259 }
0x1aa1   :  { %v1262_v35 = vmul.f32 %v2629_v19, %v1260_v31 }
0x1aa9   :  { %v2631_v30 = vpop.eup %2630 }
0x1aaa   :  { %1253 = vrot.lane.b32.xlu0 %v2631_v30, %s2732_s6 }
0x1b1c   :  { %v1254_v34 = vpop.permute.xlu0 %1253 }
0x1b1d   :  { %v1256_v36 = vmul.f32 %v1254_v34, %v1251_v33 }
0x1b1f   :  { %v1263_v37 = vadd.f32 %v1262_v35, %v1256_v36 }
0x1b21   :  { %1265 = vrot.lane.b32.xlu0 %v1263_v37, %s2732_s6 }
0x1b93   :  { %v1266_v38 = vpop.permute.xlu0 %1265 }
0x1b94   :  { %v1268_v39 = vsel %vm530_vm4, %v1266_v38, 0.0 }
0x1b95   :  { %v1269_v24 = vpack.c.bf16 %v1268_v39, %v1268_v39  ;;  %v1341_v2 = vrot.slane %v1268_v39, 7  ;;  %v1780_v13 = vsel %vm1766_vm6, %v3314_v25, %v1268_v39 }
0x1b97   :  { %v1271_v40 = vshrl.u32 %v1269_v24, 16 }
0x1b99   :  { %2433 = vmatmul.mubr.bf16.vlgmr.msra.gmra.mrb[24].mxu0 %v1271_v40 }
0x1b9a   :  { %2457 = vmatpush3.bf16.msra.mxu0 %v3196_v12  ;;  %2472 = vmatprep.mubr.msk.bf16.mxu0 %vm2728_vm0, %v2727_v1 }
0x1b9b   :  { %2458 = vmatprep.subr.bf16.mxu0 %v2727_v1 }
0x1b9e   :  { %2459 = vmatpush3.bf16.msra.mxu0 %v3236_v62 }
0x1b9f   :  { %2460 = vmatprep.subr.bf16.mxu0 %v2727_v1 }
0x1ba2   :  { %2461 = vmatpush3.bf16.msra.mxu0 %v3243_v41 }
0x1ba3   :  { %2462 = vmatprep.subr.bf16.mxu0 %v2727_v1 }
0x1ba6   :  { %2463 = vmatpush3.bf16.msra.mxu0 %v3250_v42 }
0x1ba7   :  { %2464 = vmatprep.subr.bf16.mxu0 %v2727_v1 }
0x1baa   :  { %2465 = vmatpush3.bf16.msra.mxu0 %v3257_v43 }
0x1bab   :  { %2466 = vmatprep.subr.bf16.mxu0 %v2727_v1 }
0x1bae   :  { %2467 = vmatpush3.bf16.msra.mxu0 %v3264_v46 }
0x1baf   :  { %2468 = vmatprep.subr.bf16.mxu0 %v2727_v1 }
0x1bb2   :  { %2469 = vmatpush3.bf16.msra.mxu0 %v3271_v47 }
0x1bb3   :  { %2470 = vmatprep.subr.bf16.mxu0 %v2727_v1 }
0x1bb6   :  { %2471 = vmatpush3.bf16.msra.mxu0 %v3278_v49 }
0x1bb7   :  { %2496 = vmatprep.subr.bf16.mxu0 %v2727_v1 }
0x1c6c   :  { %v1308_v50 = vpop.f32.mrb[24].mxu0 }
0x1c6d   :  { %v1309_v52 = vadd.f32 %v3344_v51, %v1308_v50  ;;  %v2434_v53 = vpop.f32.mrb[25].mxu0 }
0x1c6e   :  { %v1311_v54 = vpop.f32.mrb[26].mxu0 }
0x1c6f   :  { %v1315_v55 = vrot.slane %v1309_v52, 6  ;;  %v2435_v56 = vpop.f32.mrb[27].mxu0 }
0x1c71   :  { %1324 = vrot.lane.b32.xlu1 %v1315_v55, %s2730_s23  ;;  %v1317_v57 = vadd.f32 %v1315_v55, %v3003_v21 }
0x1c73   :  { %v1994_v58 = vmul.f32 -1.442695, %v1317_v57 }
0x1c75   :  { %2632 = vpow2.f32 %v1994_v58 }
0x1c7f   :  { %v2633_v59 = vpop.eup %2632 }
0x1c80   :  { %v1321_v60 = vadd.f32 1.0, %v2633_v59 }
0x1c82   :  { %2634 = vrcp.f32 %v1321_v60 }
0x1c8c   :  { %v2635_v61 = vpop.eup %2634 }
0x1c8d   :  { %v1334_v8 = vsub.f32 1.0, %v2635_v61 }
0x1ce3   :  { %v1325_v63 = vpop.permute.xlu1 %1324 }
0x1ce4   :  { %v1327_v0 = vmul.f32 %v2635_v61, %v1325_v63 }
0x1ce6   :  { %1329 = vrot.lane.b32.xlu0 %v1327_v0, %s2731_s25 }
0x1cea   :  { %1342 = vrot.lane.b32.xlu0 %v1341_v2, %s2733_s26 }
0x1d58   :  { %v1330_v3 = vpop.permute.xlu0 %1329 }
0x1d59   :  { %v1332_v4 = vadd.f32 %v1330_v3, %v3003_v21 }
0x1d5b   :  { %2636 = vtanh.f32 %v1332_v4 }
0x1d5c   :  { %v1343_v7 = vpop.permute.xlu0 %1342 }
0x1d5d   :  { %v1345_v5 = vmul.f32 %v2635_v61, %v1343_v7 }
0x1d65   :  { %v2637_v6 = vpop.eup %2636 }
0x1d66   :  { %1336 = vrot.lane.b32.xlu1 %v2637_v6, %s2732_s6 }
0x1dd8   :  { %v1337_v10 = vpop.permute.xlu1 %1336 }
0x1dd9   :  { %v1339_v11 = vmul.f32 %v1337_v10, %v1334_v8 }
0x1ddb   :  { %v1346_v17 = vadd.f32 %v1345_v5, %v1339_v11 }
0x1ddd   :  { %1348 = vrot.lane.b32.xlu1 %v1346_v17, %s2732_s6 }
0x1e4f   :  { %v1349_v45 = vpop.permute.xlu1 %1348 }
0x1e50   :  { %v1351_v22 = vsel %vm530_vm4, %v1349_v45, 0.0 }
0x1e51   :  { %v1352_v14 = vpack.c.bf16 %v1351_v22, %v1351_v22  ;;  %v1781_v26 = vsel %vm1768_vm7, %v1780_v13, %v1351_v22  ;;  %v1423_v33 = vrot.slane %v1351_v22, 7 }
0x1e53   :  { %v1354_v15 = vrot.slane %v1352_v14, 1 }
0x1e55   :  { %2453 = vmatmul.mubr.bf16.vlgmr.msra.gmra.mrb[24].mxu1 %v1354_v15 }
0x1e56   :  { %2477 = vmatpush3.bf16.msra.mxu1 %v3196_v12  ;;  %2492 = vmatprep.mubr.msk.bf16.mxu1 %vm2728_vm0, %v2727_v1 }
0x1e57   :  { %2478 = vmatprep.subr.bf16.mxu1 %v2727_v1 }
0x1e5a   :  { %2479 = vmatpush3.bf16.msra.mxu1 %v3236_v62 }
0x1e5b   :  { %2480 = vmatprep.subr.bf16.mxu1 %v2727_v1 }
0x1e5e   :  { %2481 = vmatpush3.bf16.msra.mxu1 %v3243_v41 }
0x1e5f   :  { %2482 = vmatprep.subr.bf16.mxu1 %v2727_v1 }
0x1e62   :  { %2483 = vmatpush3.bf16.msra.mxu1 %v3250_v42 }
0x1e63   :  { %2484 = vmatprep.subr.bf16.mxu1 %v2727_v1 }
0x1e66   :  { %2485 = vmatpush3.bf16.msra.mxu1 %v3257_v43 }
0x1e67   :  { %2486 = vmatprep.subr.bf16.mxu1 %v2727_v1 }
0x1e6a   :  { %2487 = vmatpush3.bf16.msra.mxu1 %v3264_v46 }
0x1e6b   :  { %2488 = vmatprep.subr.bf16.mxu1 %v2727_v1 }
0x1e6e   :  { %2489 = vmatpush3.bf16.msra.mxu1 %v3271_v47 }
0x1e6f   :  { %2490 = vmatprep.subr.bf16.mxu1 %v2727_v1 }
0x1e72   :  { %2491 = vmatpush3.bf16.msra.mxu1 %v3278_v49 }
0x1e73   :  { %2516 = vmatprep.subr.bf16.mxu1 %v2727_v1 }
0x1f28   :  { %v1390_v29 = vpop.f32.mrb[24].mxu1 }
0x1f29   :  { %v1391_v16 = vadd.f32 %v3344_v51, %v1390_v29  ;;  %v2454_v18 = vpop.f32.mrb[25].mxu1 }
0x1f2a   :  { %v1393_v32 = vpop.f32.mrb[26].mxu1 }
0x1f2b   :  { %v1397_v19 = vrot.slane %v1391_v16, 5  ;;  %v2455_v20 = vpop.f32.mrb[27].mxu1 }
0x1f2d   :  { %1406 = vrot.lane.b32.xlu0 %v1397_v19, %s2730_s23  ;;  %v1399_v23 = vadd.f32 %v1397_v19, %v3003_v21 }
0x1f2f   :  { %v1995_v25 = vmul.f32 -1.442695, %v1399_v23 }
0x1f31   :  { %2638 = vpow2.f32 %v1995_v25 }
0x1f3b   :  { %v2639_v9 = vpop.eup %2638 }
0x1f3c   :  { %v1403_v27 = vadd.f32 1.0, %v2639_v9 }
0x1f3e   :  { %2640 = vrcp.f32 %v1403_v27 }
0x1f48   :  { %v2641_v28 = vpop.eup %2640 }
0x1f49   :  { %v1416_v38 = vsub.f32 1.0, %v2641_v28 }
0x1f9f   :  { %v1407_v30 = vpop.permute.xlu0 %1406 }
0x1fa0   :  { %v1409_v31 = vmul.f32 %v2641_v28, %v1407_v30 }
0x1fa2   :  { %1411 = vrot.lane.b32.xlu1 %v1409_v31, %s2731_s25 }
0x1fa6   :  { %1424 = vrot.lane.b32.xlu1 %v1423_v33, %s2733_s26 }
0x2014   :  { %v1412_v34 = vpop.permute.xlu1 %1411 }
0x2015   :  { %v1414_v35 = vadd.f32 %v1412_v34, %v3003_v21 }
0x2017   :  { %2642 = vtanh.f32 %v1414_v35 }
0x2018   :  { %v1425_v37 = vpop.permute.xlu1 %1424 }
0x2019   :  { %v1427_v24 = vmul.f32 %v2641_v28, %v1425_v37 }
0x2021   :  { %v2643_v36 = vpop.eup %2642 }
0x2022   :  { %1418 = vrot.lane.b32.xlu0 %v2643_v36, %s2732_s6 }
0x2094   :  { %v1419_v39 = vpop.permute.xlu0 %1418 }
0x2095   :  { %v1421_v40 = vmul.f32 %v1419_v39, %v1416_v38 }
0x2097   :  { %v1428_v50 = vadd.f32 %v1427_v24, %v1421_v40 }
0x2099   :  { %1430 = vrot.lane.b32.xlu0 %v1428_v50, %s2732_s6 }
0x210b   :  { %v1431_v52 = vpop.permute.xlu0 %1430 }
0x210c   :  { %v1433_v53 = vsel %vm530_vm4, %v1431_v52, 0.0 }
0x210d   :  { %v1434_v54 = vpack.c.bf16 %v1433_v53, %v1433_v53  ;;  %v1782_v55 = vsel %vm1770_vm8, %v1781_v26, %v1433_v53  ;;  %v1507_v5 = vrot.slane %v1433_v53, 7 }
0x210f   :  { %v1436_v56 = vshrl.u32 %v1434_v54, 16 }
0x2111   :  { %v1438_v57 = vrot.slane %v1436_v56, 1 }
0x2113   :  { %2473 = vmatmul.mubr.bf16.vlgmr.msra.gmra.mrb[28].mxu0 %v1438_v57 }
0x2114   :  { %2497 = vmatpush3.bf16.msra.mxu0 %v3196_v12  ;;  %2512 = vmatprep.mubr.msk.bf16.mxu0 %vm2728_vm0, %v2727_v1 }
0x2115   :  { %2498 = vmatprep.subr.bf16.mxu0 %v2727_v1 }
0x2118   :  { %2499 = vmatpush3.bf16.msra.mxu0 %v3236_v62 }
0x2119   :  { %2500 = vmatprep.subr.bf16.mxu0 %v2727_v1 }
0x211c   :  { %2501 = vmatpush3.bf16.msra.mxu0 %v3243_v41 }
0x211d   :  { %2502 = vmatprep.subr.bf16.mxu0 %v2727_v1 }
0x2120   :  { %2503 = vmatpush3.bf16.msra.mxu0 %v3250_v42 }
0x2121   :  { %2504 = vmatprep.subr.bf16.mxu0 %v2727_v1 }
0x2124   :  { %2505 = vmatpush3.bf16.msra.mxu0 %v3257_v43 }
0x2125   :  { %2506 = vmatprep.subr.bf16.mxu0 %v2727_v1 }
0x2128   :  { %2507 = vmatpush3.bf16.msra.mxu0 %v3264_v46 }
0x2129   :  { %2508 = vmatprep.subr.bf16.mxu0 %v2727_v1 }
0x212c   :  { %2509 = vmatpush3.bf16.msra.mxu0 %v3271_v47 }
0x212d   :  { %2510 = vmatprep.subr.bf16.mxu0 %v2727_v1 }
0x2130   :  { %2511 = vmatpush3.bf16.msra.mxu0 %v3278_v49 }
0x21e6   :  { %v1474_v58 = vpop.f32.mrb[28].mxu0 }
0x21e7   :  { %v1475_v59 = vadd.f32 %v3344_v51, %v1474_v58  ;;  %v2474_v60 = vpop.f32.mrb[29].mxu0 }
0x21e8   :  { %v1477_v61 = vpop.f32.mrb[30].mxu0 }
0x21e9   :  { %v1481_v63 = vrot.slane %v1475_v59, 4  ;;  %v2475_v0 = vpop.f32.mrb[31].mxu0 }
0x21eb   :  { %1490 = vrot.lane.b32.xlu1 %v1481_v63, %s2730_s23  ;;  %v1483_v2 = vadd.f32 %v1481_v63, %v3003_v21 }
0x21ed   :  { %v1996_v3 = vmul.f32 -1.442695, %v1483_v2 }
0x21ef   :  { %2644 = vpow2.f32 %v1996_v3 }
0x21f9   :  { %v2645_v4 = vpop.eup %2644 }
0x21fa   :  { %v1487_v6 = vadd.f32 1.0, %v2645_v4 }
0x21fc   :  { %2646 = vrcp.f32 %v1487_v6 }
0x2206   :  { %v2647_v7 = vpop.eup %2646 }
0x2207   :  { %v1500_v22 = vsub.f32 1.0, %v2647_v7 }
0x225d   :  { %v1491_v8 = vpop.permute.xlu1 %1490 }
0x225e   :  { %v1493_v10 = vmul.f32 %v2647_v7, %v1491_v8 }
0x2260   :  { %1495 = vrot.lane.b32.xlu0 %v1493_v10, %s2731_s25 }
0x2264   :  { %1508 = vrot.lane.b32.xlu0 %v1507_v5, %s2733_s26 }
0x22d2   :  { %v1496_v11 = vpop.permute.xlu0 %1495 }
0x22d3   :  { %v1498_v17 = vadd.f32 %v1496_v11, %v3003_v21 }
0x22d5   :  { %2648 = vtanh.f32 %v1498_v17 }
0x22d6   :  { %v1509_v13 = vpop.permute.xlu0 %1508 }
0x22d7   :  { %v1511_v26 = vmul.f32 %v2647_v7, %v1509_v13 }
0x22df   :  { %v2649_v45 = vpop.eup %2648 }
0x22e0   :  { %1502 = vrot.lane.b32.xlu1 %v2649_v45, %s2732_s6 }
0x2352   :  { %v1503_v14 = vpop.permute.xlu1 %1502 }
0x2353   :  { %v1505_v15 = vmul.f32 %v1503_v14, %v1500_v22 }
0x2355   :  { %v1512_v29 = vadd.f32 %v1511_v26, %v1505_v15 }
0x2357   :  { %1514 = vrot.lane.b32.xlu1 %v1512_v29, %s2732_s6 }
0x23c9   :  { %v1515_v16 = vpop.permute.xlu1 %1514 }
0x23ca   :  { %v1517_v18 = vsel %vm530_vm4, %v1515_v16, 0.0 }
0x23cb   :  { %v1518_v32 = vpack.c.bf16 %v1517_v18, %v1517_v18  ;;  %v1783_v19 = vsel %vm1772_vm9, %v1782_v55, %v1517_v18 }
0x23cd   :  { %v1520_v20 = vrot.slane %v1518_v32, 2 }
0x23cf   :  { %2493 = vmatmul.mubr.bf16.vlgmr.msra.gmra.mrb[28].mxu1 %v1520_v20 }
0x23d0   :  { %2517 = vmatpush3.bf16.msra.mxu1 %v3196_v12  ;;  %2532 = vmatprep.mubr.msk.bf16.mxu1 %vm2728_vm0, %v2727_v1 }
0x23d1   :  { %2518 = vmatprep.subr.bf16.mxu1 %v2727_v1 }
0x23d4   :  { %2519 = vmatpush3.bf16.msra.mxu1 %v3236_v62 }
0x23d5   :  { %2520 = vmatprep.subr.bf16.mxu1 %v2727_v1 }
0x23d8   :  { %2521 = vmatpush3.bf16.msra.mxu1 %v3243_v41 }
0x23d9   :  { %2522 = vmatprep.subr.bf16.mxu1 %v2727_v1 }
0x23dc   :  { %2523 = vmatpush3.bf16.msra.mxu1 %v3250_v42 }
0x23dd   :  { %2524 = vmatprep.subr.bf16.mxu1 %v2727_v1 }
0x23e0   :  { %2525 = vmatpush3.bf16.msra.mxu1 %v3257_v43 }
0x23e1   :  { %2526 = vmatprep.subr.bf16.mxu1 %v2727_v1 }
0x23e4   :  { %2527 = vmatpush3.bf16.msra.mxu1 %v3264_v46 }
0x23e5   :  { %2528 = vmatprep.subr.bf16.mxu1 %v2727_v1 }
0x23e8   :  { %2529 = vmatpush3.bf16.msra.mxu1 %v3271_v47 }
0x23e9   :  { %2530 = vmatprep.subr.bf16.mxu1 %v2727_v1 }
0x23ec   :  { %2531 = vmatpush3.bf16.msra.mxu1 %v3278_v49  ;;  %v1589_v49 = vrot.slane %v1517_v18, 7 }
0x24a2   :  { %v1556_v12 = vpop.f32.mrb[28].mxu1 }
0x24a3   :  { %v1557_v62 = vadd.f32 %v3344_v51, %v1556_v12  ;;  %v2494_v41 = vpop.f32.mrb[29].mxu1 }
0x24a4   :  { %v1559_v42 = vpop.f32.mrb[30].mxu1 }
0x24a5   :  { %v1563_v23 = vrot.slane %v1557_v62, 3  ;;  %v2495_v25 = vpop.f32.mrb[31].mxu1 }
0x24a7   :  { %1572 = vrot.lane.b32.xlu0 %v1563_v23, %s2730_s23  ;;  %v1565_v43 = vadd.f32 %v1563_v23, %v3003_v21 }
0x24a9   :  { %v1997_v46 = vmul.f32 -1.442695, %v1565_v43 }
0x24ab   :  { %2650 = vpow2.f32 %v1997_v46 }
0x24b5   :  { %v2651_v9 = vpop.eup %2650 }
0x24b6   :  { %v1569_v27 = vadd.f32 1.0, %v2651_v9 }
0x24b8   :  { %2652 = vrcp.f32 %v1569_v27 }
0x24c2   :  { %v2653_v47 = vpop.eup %2652 }
0x24c3   :  { %v1582_v35 = vsub.f32 1.0, %v2653_v47 }
0x2519   :  { %v1573_v1 = vpop.permute.xlu0 %1572 }
0x251a   :  { %v1575_v28 = vmul.f32 %v2653_v47, %v1573_v1 }
0x251c   :  { %1577 = vrot.lane.b32.xlu1 %v1575_v28, %s2731_s25 }
0x2520   :  { %1590 = vrot.lane.b32.xlu1 %v1589_v49, %s2733_s26  ;;  %v1789_v49 = vadd.s32 3668352332, %v2862_v44 }
0x258e   :  { %v1578_v30 = vpop.permute.xlu1 %1577 }
0x258f   :  { %v1580_v31 = vadd.f32 %v1578_v30, %v3003_v21  ;;  %v1790_v30 = vadd.s32 3668352332, %v2867_v48 }
0x2591   :  { %2654 = vtanh.f32 %v1580_v31  ;;  %v2000_v31 = vshrl.u32 %v1789_v49, 16 }
0x2592   :  { %v1591_v34 = vpop.permute.xlu1 %1590 }
0x2593   :  { %v1593_v37 = vmul.f32 %v2653_v47, %v1591_v34  ;;  %v1795_v34 = vxor.u32 %v2000_v31, %v1789_v49 }
0x259b   :  { %v2655_v33 = vpop.eup %2654 }
0x259c   :  { %1584 = vrot.lane.b32.xlu0 %v2655_v33, %s2732_s6  ;;  %v2001_v33 = vshrl.u32 %v1790_v30, 16 }
0x260e   :  { %v1585_v36 = vpop.permute.xlu0 %1584 }
0x260f   :  { %v1587_v38 = vmul.f32 %v1585_v36, %v1582_v35  ;;  %v1796_v35 = vxor.u32 %v2001_v33, %v1790_v30  ;;  %v1797_v36 = vmul.u32 2246822507, %v1795_v34 }
0x2611   :  { %v1594_v39 = vadd.f32 %v1593_v37, %v1587_v38  ;;  %v1798_v37 = vmul.u32 2246822507, %v1796_v35  ;;  %v2002_v38 = vshrl.u32 %v1797_v36, 13 }
0x2613   :  { %1596 = vrot.lane.b32.xlu0 %v1594_v39, %s2732_s6  ;;  %v2003_v39 = vshrl.u32 %v1798_v37, 13 }
0x2685   :  { %v1597_v24 = vpop.permute.xlu0 %1596 }
0x2686   :  { %v1599_v40 = vsel %vm530_vm4, %v1597_v24, 0.0  ;;  %v1803_v24 = vxor.u32 %v2002_v38, %v1797_v36 }
0x2687   :  { %v1600_v50 = vpack.c.bf16 %v1599_v40, %v1599_v40  ;;  %v1784_v52 = vsel %vm1774_vm10, %v1783_v19, %v1599_v40  ;;  %v1673_v7 = vrot.slane %v1599_v40, 7  ;;  %v1804_v40 = vxor.u32 %v2003_v39, %v1798_v37 }
0x2689   :  { %v1602_v53 = vshrl.u32 %v1600_v50, 16  ;;  %v1805_v50 = vmul.u32 3266489909, %v1803_v24 }
0x268b   :  { %v1604_v54 = vrot.slane %v1602_v53, 2 }
0x268d   :  { %2513 = vmatmul.mubr.bf16.vlgmr.msra.gmra.mrb[32].mxu0 %v1604_v54 }
0x2760   :  { %v1640_v55 = vpop.f32.mrb[32].mxu0 }
0x2761   :  { %v1641_v56 = vadd.f32 %v3344_v51, %v1640_v55  ;;  %v2514_v57 = vpop.f32.mrb[33].mxu0 }
0x2762   :  { %v1643_v58 = vpop.f32.mrb[34].mxu0 }
0x2763   :  { %v1647_v59 = vrot.slane %v1641_v56, 2  ;;  %v2515_v60 = vpop.f32.mrb[35].mxu0 }
0x2765   :  { %1656 = vrot.lane.b32.xlu1 %v1647_v59, %s2730_s23  ;;  %v1649_v61 = vadd.f32 %v1647_v59, %v3003_v21 }
0x2767   :  { %v1998_v63 = vmul.f32 -1.442695, %v1649_v61 }
0x2769   :  { %2656 = vpow2.f32 %v1998_v63 }
0x2773   :  { %v2657_v0 = vpop.eup %2656 }
0x2774   :  { %v1653_v2 = vadd.f32 1.0, %v2657_v0 }
0x2776   :  { %2658 = vrcp.f32 %v1653_v2 }
0x2780   :  { %v2659_v3 = vpop.eup %2658 }
0x2781   :  { %v1666_v17 = vsub.f32 1.0, %v2659_v3 }
0x27d7   :  { %v1657_v4 = vpop.permute.xlu1 %1656 }
0x27d8   :  { %v1659_v6 = vmul.f32 %v2659_v3, %v1657_v4 }
0x27da   :  { %1661 = vrot.lane.b32.xlu0 %v1659_v6, %s2731_s25 }
0x27de   :  { %1674 = vrot.lane.b32.xlu0 %v1673_v7, %s2733_s26 }
0x284c   :  { %v1662_v8 = vpop.permute.xlu0 %1661 }
0x284d   :  { %v1664_v10 = vadd.f32 %v1662_v8, %v3003_v21 }
0x284f   :  { %2660 = vtanh.f32 %v1664_v10 }
0x2850   :  { %v1675_v11 = vpop.permute.xlu0 %1674 }
0x2851   :  { %v1677_v13 = vmul.f32 %v2659_v3, %v1675_v11 }
0x2859   :  { %v2661_v5 = vpop.eup %2660 }
0x285a   :  { %1668 = vrot.lane.b32.xlu1 %v2661_v5, %s2732_s6 }
0x28cc   :  { %v1669_v45 = vpop.permute.xlu1 %1668 }
0x28cd   :  { %v1671_v22 = vmul.f32 %v1669_v45, %v1666_v17 }
0x28cf   :  { %v1678_v14 = vadd.f32 %v1677_v13, %v1671_v22 }
0x28d1   :  { %1680 = vrot.lane.b32.xlu1 %v1678_v14, %s2732_s6 }
0x2943   :  { %v1681_v26 = vpop.permute.xlu1 %1680 }
0x2944   :  { %v1683_v15 = vsel %vm530_vm4, %v1681_v26, 0.0 }
0x2945   :  { %v1684_v29 = vpack.c.bf16 %v1683_v15, %v1683_v15  ;;  %v3450_v16 = vsel %vm1776_vm11, %v1784_v52, %v1683_v15  ;;  %v2004_v52 = vshrl.u32 %v1805_v50, 16 }
0x2947   :  { %v1686_v18 = vrot.slane %v1684_v29, 3  ;;  %v1811_v54 = vxor.u32 %v2004_v52, %v1805_v50  ;;  %v1861_v29 = vadd.s32 2027820797, %v2862_v44  ;;  %v2006_v44 = vld [vmem:[%s3519_s8] ss:$0 sm:$0xff] }
0x2949   :  { %2533 = vmatmul.mubr.bf16.vlgmr.msra.gmra.mrb[32].mxu1 %v1686_v18  ;;  %v1813_v56 = vand.u32 8388607, %v1811_v54  ;;  %v1862_v18 = vadd.s32 2027820797, %v2867_v48 }
0x294b   :  { %v1815_v58 = vcvt.s32.f32 %v1813_v56 }
0x294d   :  { %v1817_v60 = vmul.f32 1.1920929e-07, %v1815_v58 }
0x2a1c   :  { %v1722_v32 = vpop.f32.mrb[32].mxu1 }
0x2a1d   :  { %v1723_v19 = vadd.f32 %v3344_v51, %v1722_v32  ;;  %v2534_v20 = vpop.f32.mrb[33].mxu1  ;;  %v1755_v51 = vrot.slane %v1683_v15, 7 }
0x2a1e   :  { %v1725_v12 = vpop.f32.mrb[34].mxu1  ;;  %v2009_v20 = vshrl.u32 %v1862_v18, 16 }
0x2a1f   :  { %v1729_v62 = vrot.slane %v1723_v19, 1  ;;  %v2535_v41 = vpop.f32.mrb[35].mxu1  ;;  %v2008_v19 = vshrl.u32 %v1861_v29, 16 }
0x2a20   :  { %v1868_v41 = vxor.u32 %v2009_v20, %v1862_v18 }
0x2a21   :  { %1738 = vrot.lane.b32.xlu0 %v1729_v62, %s2730_s23  ;;  %v1731_v42 = vadd.f32 %v1729_v62, %v3003_v21  ;;  %v1867_v62 = vxor.u32 %v2008_v19, %v1861_v29 }
0x2a23   :  { %v1999_v23 = vmul.f32 -1.442695, %v1731_v42 }
0x2a25   :  { %2662 = vpow2.f32 %v1999_v23  ;;  %v1869_v23 = vmul.u32 2246822507, %v1867_v62 }
0x2a2f   :  { %v2663_v25 = vpop.eup %2662 }
0x2a30   :  { %v1735_v43 = vadd.f32 1.0, %v2663_v25  ;;  %v1870_v25 = vmul.u32 2246822507, %v1868_v41 }
0x2a32   :  { %2664 = vrcp.f32 %v1735_v43  ;;  %v2010_v43 = vshrl.u32 %v1869_v23, 13 }
0x2a3c   :  { %v3455_v46 = vpop.eup %2664 }
0x2a93   :  { %v1739_v9 = vpop.permute.xlu0 %1738 }
0x2a94   :  { %v1741_v27 = vmul.f32 %v3455_v46, %v1739_v9  ;;  %v2011_v9 = vshrl.u32 %v1870_v25, 13 }
0x2a96   :  { %1743 = vrot.lane.b32.xlu1 %v1741_v27, %s2731_s25  ;;  %v1875_v27 = vxor.u32 %v2010_v43, %v1869_v23  ;;  %s1904_s25 = sshll.u32 %s2734_s24, 4  ;;  %s1905_s25 = int_to_ptr.vmem [resolvable:$true] %s1904_s25 }
0x2a97   :  { %s2679_s27 = scalar_lea.vmem %s1905_s25, 256  ;;  %p2684_p1 = scmp.lt.s32.totalorder %s1905_s25, %s1905_s25 }
0x2a98   :  { %p2680_p0 = scmp.ne.s32.totalorder %s1905_s25, %s2679_s27  ;;  %p2685_p2 = scmp.lt.s32.totalorder %s2679_s27, %s2679_s27 }
0x2a9a   :  { %1756 = vrot.lane.b32.xlu1 %v1755_v51, %s2733_s26  ;;  %v1876_v51 = vxor.u32 %v2011_v9, %v1870_v25  ;;  %p2686_p3 = por %p2685_p2, %p2684_p1 }
0x2a9c   :  { %p2687_p4 = pnand %p2686_p3, %p2680_p0 }
0x2b08   :  { %v1744_v47 = vpop.permute.xlu1 %1743 }
0x2b09   :  { %v1746_v1 = vadd.f32 %v1744_v47, %v3003_v21  ;;  %v1806_v21 = vmul.u32 3266489909, %v1804_v40  ;;  %v1877_v47 = vmul.u32 3266489909, %v1875_v27 }
0x2b0b   :  { %2666 = vtanh.f32 %v1746_v1  ;;  %v2005_v53 = vshrl.u32 %v1806_v21, 16  ;;  %v1878_v1 = vmul.u32 3266489909, %v1876_v51  ;;  %v2012_v48 = vshrl.u32 %v1877_v47, 16 }
0x2b0d   :  { %v1812_v55 = vxor.u32 %v2005_v53, %v1806_v21 }
0x2b0f   :  { %v1814_v57 = vand.u32 8388607, %v1812_v55 }
0x2b11   :  { %v1816_v59 = vcvt.s32.f32 %v1814_v57 }
0x2b13   :  { %v1818_v61 = vmul.f32 1.1920929e-07, %v1816_v59 }
0x2b15   :  { %v2667_v28 = vpop.eup %2666  ;;  %v1819_v63 = vadd.f32 %v1818_v61, %v1817_v60 }
0x2b16   :  { %1750 = vrot.lane.b32.xlu0 %v2667_v28, %s2732_s6  ;;  %v2013_v28 = vshrl.u32 %v1878_v1, 16 }
0x2b17   :  { %v1820_v0 = vrot.slane %v1819_v63, 4 }
0x2b19   :  { %v1821_v2 = vadd.f32 %v1820_v0, %v1819_v63 }
0x2b1b   :  { %v1822_v3 = vrot.slane %v1821_v2, 2 }
0x2b1d   :  { %v1823_v4 = vadd.f32 %v1822_v3, %v1821_v2 }
0x2b1f   :  { %v1824_v6 = vrot.slane %v1823_v4, 1 }
0x2b21   :  { %v1825_v7 = vadd.f32 %v1824_v6, %v1823_v4 }
0x2b23   :  { %v1826_v8 = vmul.f32 0.0625, %v1825_v7 }
0x2b25   :  { %v1827_v10 = vsub.f32 %v1817_v60, %v1826_v8  ;;  %v1828_v5 = vsub.f32 %v1818_v61, %v1826_v8 }
0x2b27   :  { %v1829_v11 = vmul.f32 %v1827_v10, %v1827_v10  ;;  %v1830_v17 = vmul.f32 %v1828_v5, %v1828_v5  ;;  %v1846_v49 = vmul.f32 %v2006_v44, %v1827_v10  ;;  %v1847_v30 = vmul.f32 %v2006_v44, %v1828_v5 }
0x2b29   :  { %v1831_v45 = vadd.f32 %v1830_v17, %v1829_v11 }
0x2b2b   :  { %v1832_v13 = vrot.slane %v1831_v45, 4 }
0x2b2d   :  { %v1833_v22 = vadd.f32 %v1832_v13, %v1831_v45 }
0x2b2f   :  { %v1834_v14 = vrot.slane %v1833_v22, 2 }
0x2b31   :  { %v1835_v26 = vadd.f32 %v1834_v14, %v1833_v22 }
0x2b33   :  { %v1836_v15 = vrot.slane %v1835_v26, 1 }
0x2b35   :  { %v1837_v32 = vadd.f32 %v1836_v15, %v1835_v26 }
0x2b37   :  { %v1838_v12 = vmul.f32 0.0625, %v1837_v32 }
0x2b39   :  { %v1848_v42 = vadd.f32 1e-05, %v1838_v12 }
0x2b3b   :  { %2668 = vrsqrt.f32 %v1848_v42 }
0x2b3c   :  { %2690 = shalt.err (!%p2687_p4)
}
0x2b3d   :  { %s2691_s29 = scalar_lea.hbm %s3521_s10, 256 }
0x2b3e   :  { %p2692_p5 = scmp.ne.s32.totalorder %s3521_s10, %s2691_s29  ;;  %p2695_p6 = scmp.lt.u32.totalorder %s2691_s29, %s3521_s10 }
0x2b40   :  { %p2697_p7 = pnand %p2695_p6, %p2692_p5 }
0x2b42   :  { %2700 = shalt.err (!%p2697_p7)
}
0x2b43   :  { %s2735_s14 = smov 128   ;;  %v1883_v31 = vxor.u32 %v2012_v48, %v1877_v47  ;;  %v1884_v33 = vxor.u32 %v2013_v28, %v1878_v1  ;;  %v1757_v34 = vpop.permute.xlu1 %1756  ;;  %v2007_v35 = vld [vmem:[%s3520_s9] ss:$0 sm:$0xff]  ;;  %v1748_v37 = vsub.f32 1.0, %v3455_v46 }
0x2b44   :  { %1910 = dma.vmem_to_hbm [thread:$0]  %s1905_s25, 256, %s3521_s10, [#allocation3], %s2735_s14, %s2735_s14, %s2733_s26   ;;  %v1759_v21 = vmul.f32 %v3455_v46, %v1757_v34 }
0x2b45   :  { %v2669_v36 = vpop.eup %2668  ;;  %v1885_v38 = vand.u32 8388607, %v1883_v31  ;;  %v1886_v39 = vand.u32 8388607, %v1884_v33  ;;  %s2736_s10 = smov [#allocation4]  }
0x2b46   :  { %v1850_v40 = vmul.f32 %v2669_v36, %v1846_v49  ;;  %v1851_v50 = vmul.f32 %v2669_v36, %v1847_v30  ;;  %s1918_s17 = sshll.u32 %s2736_s10, 4  ;;  %s1919_s17 = int_to_ptr.vmem [resolvable:$true] %s1918_s17 }
0x2b47   :  { %v1887_v53 = vcvt.s32.f32 %v1885_v38  ;;  %v1888_v54 = vcvt.s32.f32 %v1886_v39  ;;  %s2701_s9 = scalar_lea.vmem %s1919_s17, 256  ;;  %p2706_p9 = scmp.lt.s32.totalorder %s1919_s17, %s1919_s17 }
0x2b48   :  { %v1859_v55 = vadd.f32 %v2007_v35, %v1850_v40  ;;  %v1860_v56 = vadd.f32 %v2007_v35, %v1851_v50  ;;  %p2702_p8 = scmp.ne.s32.totalorder %s1919_s17, %s2701_s9  ;;  %p2707_p10 = scmp.lt.s32.totalorder %s2701_s9, %s2701_s9 }
0x2b49   :  { %v1889_v58 = vmul.f32 1.1920929e-07, %v1887_v53  ;;  %v1890_v59 = vmul.f32 1.1920929e-07, %v1888_v54 }
0x2b4a   :  { %v1893_v60 = vmul.f32 2.0, %v1859_v55  ;;  %v1894_v61 = vmul.f32 2.0, %v1860_v56  ;;  %p2708_p11 = por %p2707_p10, %p2706_p9 }
0x2b4b   :  { %vm1891_vm13 = vcmp.ge.f32.partialorder %v1889_v58, 0.5  ;;  %vm1892_vm14 = vcmp.ge.f32.partialorder %v1890_v59, 0.5 }
0x2b4c   :  { %v1895_v63 = vsel %vm1891_vm13, %v1893_v60, 0.0  ;;  %v1896_v0 = vsel %vm1892_vm14, %v1894_v61, 0.0  ;;  %p2709_p12 = pnand %p2708_p11, %p2702_p8 }
0x2b4d   :  { %1897 = vst [vmem:[#allocation4] sm:$0xff] %v1895_v63  ;;  %1898 = vst [vmem:[#allocation4 + $0x8] sm:$0xff] %v1896_v0 }
0x2b88   :  { %v1751_v24 = vpop.permute.xlu0 %1750 }
0x2b89   :  { %v1753_v52 = vmul.f32 %v1751_v24, %v1748_v37 }
0x2b8b   :  { %v1760_v57 = vadd.f32 %v1759_v21, %v1753_v52 }
0x2b8d   :  { %1762 = vrot.lane.b32.xlu0 %v1760_v57, %s2732_s6 }
0x2b8e   :  { %2712 = shalt.err (!%p2709_p12)
}
0x2b8f   :  { %s2713_s20 = scalar_lea.hbm %s3523_s12, 256 }
0x2b90   :  { %p2714_p13 = scmp.ne.s32.totalorder %s3523_s12, %s2713_s20  ;;  %p2717_p0 = scmp.lt.u32.totalorder %s2713_s20, %s3523_s12 }
0x2b92   :  { %p2719_p1 = pnand %p2717_p0, %p2714_p13 }
0x2b94   :  { %2722 = shalt.err (!%p2719_p1)
}
0x2b95   :  { %1924 = dma.vmem_to_hbm [thread:$0]  %s1919_s17, 256, %s3523_s12, [#allocation5], %s2735_s14, %s2735_s14, %s2733_s26  }
0x2bff   :  { %v1763_v46 = vpop.permute.xlu0 %1762 }
0x2c00   :  { %v1765_v2 = vsel %vm530_vm4, %v1763_v46, 0.0 }
0x2c01   :  { %v1786_v3 = vsel %vm1778_vm12, %v3450_v16, %v1765_v2 }
0x2c02   :  { %1788 = vst [vmem:[%s3522_s11 + $0x8] sm:$0xff] %v1786_v3 }
0x2c03   :  { %2723 = dma.done.wait [#allocation3], 256  }
0x2c04   :  { %2724 = vsyncadd [#allocation3], 4294967040 }
0x2c05   :  { %2725 = dma.done.wait [#allocation5], 256  }
0x2c06   :  { %2726 = vsyncadd [#allocation5], 4294967040 }
0x2c07   :  { %1933 = vsyncpa [#allocation3], 1 }
0x2c08   :  { %1934 = vsyncpa [#allocation5], 1 }

</bundles_post_ra>
